<compile_context>
chip_gen: v7x
topology: tpu7x:2x2x1
jax: 0.10.0
libtpu: 0.0.40
codegen_flags: <defaults>
</compile_context>

<pallas_src>
import functools

import jax
import jax.numpy as jnp
import numpy as np
from jax.experimental import pallas as pl
from jax.experimental.pallas import tpu as pltpu


def ema_kernel(xg_ref, xcol_ref, w1_ref, w3_ref, bias_ref, pool_ref, exp_ref,
               sblk_ref, o_ref, *, hw, cg):
    f32 = jnp.float32
    hi = jax.lax.Precision.HIGHEST

    gx = xg_ref[...].astype(f32)                       # (R, hw) lane-dense
    sblk = sblk_ref[...]                               # (R, R) block-of-ones

    b1 = bias_ref[:, 0:1]                              # (R, 1) each
    b3 = bias_ref[:, 1:2]
    gnw = bias_ref[:, 2:3]
    gnb = bias_ref[:, 3:4]

    # --- directional average pools (pool_h | pool_w) as one MXU matmul ------
    cat = jnp.dot(gx, pool_ref[...], precision=hi,
                  preferred_element_type=f32)          # (R, h+w)

    # --- per-slab 1x1 conv (block-diagonal weight) + bias, sigmoid ----------
    sig = jax.nn.sigmoid(
        jnp.dot(w1_ref[...], cat, preferred_element_type=f32) + b1)  # (R, h+w)

    # --- broadcast a_h over w and a_w over h back to the flat hw layout -----
    ahw = jnp.dot(sig, exp_ref[...], precision=hi,
                  preferred_element_type=f32)          # (R, 2*hw)
    t = gx * ahw[:, :hw] * ahw[:, hw:]                 # gated tensor

    # --- GroupNorm(cg, cg) == per-(slab, channel) norm over space -----------
    mu = jnp.mean(t, axis=1, keepdims=True)
    var = jnp.mean((t - mu) ** 2, axis=1, keepdims=True)
    x1 = (t - mu) * jax.lax.rsqrt(var + 1e-5) * gnw + gnb

    # --- 3x3 conv (pad=1) as a single K=9*cg matmul over im2col rows --------
    x2 = jnp.dot(w3_ref[...], xcol_ref[...].astype(f32),
                 preferred_element_type=f32) + b3      # (R, hw)

    # --- global avg pool + per-slab softmax over the cg channels ------------
    m1 = jnp.mean(x1, axis=1, keepdims=True)           # (R, 1)
    m2 = jnp.mean(x2, axis=1, keepdims=True)
    # shift by the per-slab mean (softmax is shift-invariant; denominator >= 1)
    s1 = jnp.dot(sblk, m1, precision=hi, preferred_element_type=f32) * (1.0 / cg)
    s2 = jnp.dot(sblk, m2, precision=hi, preferred_element_type=f32) * (1.0 / cg)
    e1 = jnp.exp(m1 - s1)
    e2 = jnp.exp(m2 - s2)
    d1 = jnp.dot(sblk, e1, precision=hi, preferred_element_type=f32)
    d2 = jnp.dot(sblk, e2, precision=hi, preferred_element_type=f32)
    u1 = e1 / d1                                       # softmax(mean(x1)) per row
    u2 = e2 / d2                                       # softmax(mean(x2)) per row

    # --- cross attention + within-slab broadcast of weights in one matmul ---
    wts = jnp.dot(sblk, u1 * x2 + u2 * x1, precision=hi,
                  preferred_element_type=f32)          # (R, hw), equal within slab
    o_ref[...] = (gx * jax.nn.sigmoid(wts)).astype(o_ref.dtype)


def _pick_bb(bg, cg, target=8):
    """Largest slab count per grid step keeping sublane (8) alignment."""
    for bb in range(min(bg, target), 0, -1):
        if bg % bb == 0 and (bb * cg) % 8 == 0:
            return bb
    return bg


def ema_pallas(x, params, groups):
    b, c, h, w = x.shape
    cg = c // groups
    bg = b * groups
    hw = h * w
    w1, b1, w3, b3, gnw, gnb = params
    f32 = jnp.float32

    bb = _pick_bb(bg, cg)
    grid_n = bg // bb
    R = bb * cg                      # activation rows per grid step
    R9 = bb * 9 * cg                 # im2col rows per grid step

    # activations, lane-dense: row = (batch*groups + slab)*cg + channel
    xg = x.reshape(bg * cg, hw)

    # im2col of the 3x3 / pad=1 conv, built once in plain JAX (cheap vs HBM BW)
    x4 = x.reshape(bg, cg, h, w)
    xpad = jnp.pad(x4, ((0, 0), (0, 0), (1, 1), (1, 1)))
    xcol = jnp.stack([xpad[:, :, di:di + h, dj:dj + w]
                      for di in range(3) for dj in range(3)],
                     axis=1).reshape(bg * 9 * cg, hw)   # rows: slab, tap, chan

    # parameters replicated block-diagonally over the bb slabs of one block
    eye = jnp.eye(bb, dtype=f32)
    w1_all = jnp.kron(eye, w1.astype(f32))                                # (R, R)
    w3p = jnp.transpose(w3.astype(f32), (0, 2, 3, 1)).reshape(cg, 9 * cg)
    w3_all = jnp.kron(eye, w3p)                                           # (R, R9)
    sblk = jnp.kron(eye, jnp.ones((cg, cg), f32))                         # (R, R)
    bias_pack = jnp.tile(jnp.stack([b1, b3, gnw, gnb], axis=1).astype(f32),
                         (bb, 1))                                         # (R, 4)

    # constant pooling / broadcast matrices (exact 0, 1, 1/h, 1/w entries)
    ii = np.arange(hw) // w
    jj = np.arange(hw) % w
    pool = np.zeros((hw, h + w), np.float32)
    pool[np.arange(hw), ii] = 1.0 / w           # width mean  -> x_h
    pool[np.arange(hw), h + jj] = 1.0 / h       # height mean -> x_w
    expand = np.zeros((h + w, 2 * hw), np.float32)
    expand[ii, np.arange(hw)] = 1.0             # a_h broadcast over w
    expand[h + jj, hw + np.arange(hw)] = 1.0    # a_w broadcast over h

    kernel = functools.partial(ema_kernel, hw=hw, cg=cg)

    out = pl.pallas_call(
        kernel,
        out_shape=jax.ShapeDtypeStruct((bg * cg, hw), x.dtype),
        grid=(grid_n,),
        in_specs=[
            pl.BlockSpec((R, hw), lambda g: (g, 0)),           # activations
            pl.BlockSpec((R9, hw), lambda g: (g, 0)),          # im2col rows
            pl.BlockSpec((R, R), lambda g: (0, 0)),            # conv1x1 block-diag
            pl.BlockSpec((R, R9), lambda g: (0, 0)),           # conv3x3 block-diag
            pl.BlockSpec((R, 4), lambda g: (0, 0)),            # b1|b3|gn_w|gn_b
            pl.BlockSpec((hw, h + w), lambda g: (0, 0)),       # pooling matrix
            pl.BlockSpec((h + w, 2 * hw), lambda g: (0, 0)),   # broadcast matrix
            pl.BlockSpec((R, R), lambda g: (0, 0)),            # block-of-ones
        ],
        out_specs=pl.BlockSpec((R, hw), lambda g: (g, 0)),
        compiler_params=pltpu.CompilerParams(
            dimension_semantics=("parallel",)),
    )(xg, xcol, w1_all, w3_all, bias_pack,
      jnp.asarray(pool), jnp.asarray(expand), sblk)

    return out.reshape(b, c, h, w)


def ema_ref(x, params, groups):
    """Pure-JAX reference mirroring the PyTorch forward."""
    b, c, h, w = x.shape
    cg = c // groups
    w1, b1, w3, b3, gnw, gnb = params
    gx = x.reshape(b * groups, cg, h, w)
    x_h = jnp.mean(gx, axis=3, keepdims=True)                     # (bg,cg,h,1)
    x_w = jnp.mean(gx, axis=2, keepdims=True)                     # (bg,cg,1,w)
    cat = jnp.concatenate([x_h, jnp.transpose(x_w, (0, 1, 3, 2))], axis=2)
    hw_ = jnp.einsum('oc,bcpq->bopq', w1, cat) + b1[None, :, None, None]
    a_h = jax.nn.sigmoid(hw_[:, :, :h, :])
    a_w = jax.nn.sigmoid(jnp.transpose(hw_[:, :, h:, :], (0, 1, 3, 2)))
    t = gx * a_h * a_w
    mu = jnp.mean(t, axis=(2, 3), keepdims=True)
    var = jnp.mean((t - mu) ** 2, axis=(2, 3), keepdims=True)
    x1 = ((t - mu) / jnp.sqrt(var + 1e-5)) * gnw[None, :, None, None] \
         + gnb[None, :, None, None]
    x2 = jax.lax.conv_general_dilated(
        gx, w3, window_strides=(1, 1), padding='SAME',
        dimension_numbers=('NCHW', 'OIHW', 'NCHW')) + b3[None, :, None, None]
    x11 = jax.nn.softmax(jnp.mean(x1, axis=(2, 3)), axis=-1)      # (bg, cg)
    x21 = jax.nn.softmax(jnp.mean(x2, axis=(2, 3)), axis=-1)
    x1f = x1.reshape(b * groups, cg, h * w)
    x2f = x2.reshape(b * groups, cg, h * w)
    wts = jnp.einsum('bc,bcp->bp', x11, x2f) + jnp.einsum('bc,bcp->bp', x21, x1f)
    wts = jax.nn.sigmoid(wts).reshape(b * groups, 1, h, w)
    return (gx * wts).reshape(b, c, h, w)


if __name__ == "__main__":
    b, c, h, w = 2, 32, 16, 16
    factor = 8
    cg = c // factor

    key = jax.random.PRNGKey(0)
    kx, k1, k2, k3, k4, k5, k6 = jax.random.split(key, 7)

    x = jax.random.normal(kx, (b, c, h, w), jnp.float32)

    # deterministic synthetic parameters (shapes per nn.Module __init__)
    w1 = jax.random.normal(k1, (cg, cg), jnp.float32) * 0.2          # conv1x1 weight
    b1 = jax.random.normal(k2, (cg,), jnp.float32) * 0.05            # conv1x1 bias
    w3 = jax.random.normal(k3, (cg, cg, 3, 3), jnp.float32) * 0.1    # conv3x3 weight
    b3 = jax.random.normal(k4, (cg,), jnp.float32) * 0.05            # conv3x3 bias
    gnw = 1.0 + jax.random.normal(k5, (cg,), jnp.float32) * 0.05     # GroupNorm weight
    gnb = jax.random.normal(k6, (cg,), jnp.float32) * 0.05           # GroupNorm bias
    params = (w1, b1, w3, b3, gnw, gnb)

    ema_fn = jax.jit(functools.partial(ema_pallas, groups=factor))
    out = jax.block_until_ready(ema_fn(x, params))

    ref = jax.block_until_ready(ema_ref(x, params, factor))
    np.testing.assert_allclose(np.asarray(out), np.asarray(ref),
                               rtol=2e-3, atol=2e-3)

    print("KERNEL_OK")
</pallas_src>

<mosaic_0001>
module attributes {stable_mosaic.version = 11 : i64} {
  func.func @ema_kernel(%arg0: i32, %arg1: memref<32x256xf32, #tpu.memory_space<vmem>>, %arg2: memref<288x256xf32, #tpu.memory_space<vmem>>, %arg3: memref<32x32xf32, #tpu.memory_space<vmem>>, %arg4: memref<32x288xf32, #tpu.memory_space<vmem>>, %arg5: memref<32x4xf32, #tpu.memory_space<vmem>>, %arg6: memref<256x32xf32, #tpu.memory_space<vmem>>, %arg7: memref<32x512xf32, #tpu.memory_space<vmem>>, %arg8: memref<32x32xf32, #tpu.memory_space<vmem>>, %arg9: memref<32x256xf32, #tpu.memory_space<vmem>>) attributes {dimension_semantics = [#tpu.dimension_semantics<parallel>], iteration_bounds = array<i64: 2>, scalar_prefetch = 0 : i64, scratch_operands = 0 : i64, tpu.core_type = #tpu.core_type<tc>, window_params = [{transform_indices = @transform_0, window_bounds = array<i64: 32, 256>}, {transform_indices = @transform_1, window_bounds = array<i64: 288, 256>}, {pipeline_mode = #tpu.pipeline_mode<synchronous>, transform_indices = @transform_2, window_bounds = array<i64: 32, 32>}, {pipeline_mode = #tpu.pipeline_mode<synchronous>, transform_indices = @transform_3, window_bounds = array<i64: 32, 288>}, {pipeline_mode = #tpu.pipeline_mode<synchronous>, transform_indices = @transform_4, window_bounds = array<i64: 32, 4>}, {pipeline_mode = #tpu.pipeline_mode<synchronous>, transform_indices = @transform_5, window_bounds = array<i64: 256, 32>}, {pipeline_mode = #tpu.pipeline_mode<synchronous>, transform_indices = @transform_6, window_bounds = array<i64: 32, 512>}, {pipeline_mode = #tpu.pipeline_mode<synchronous>, transform_indices = @transform_7, window_bounds = array<i64: 32, 32>}, {transform_indices = @transform_8, window_bounds = array<i64: 32, 256>}]} {
    %c0 = arith.constant 0 : index
    %c0_0 = arith.constant 0 : index
    %0 = vector.load %arg1[%c0, %c0_0] : memref<32x256xf32, #tpu.memory_space<vmem>>, vector<32x256xf32>
    %c0_1 = arith.constant 0 : index
    %c0_2 = arith.constant 0 : index
    %1 = vector.load %arg8[%c0_1, %c0_2] : memref<32x32xf32, #tpu.memory_space<vmem>>, vector<32x32xf32>
    %c0_3 = arith.constant 0 : index
    %c0_4 = arith.constant 0 : index
    %2 = vector.load %arg5[%c0_3, %c0_4] : memref<32x4xf32, #tpu.memory_space<vmem>>, vector<32x1xf32>
    %c0_5 = arith.constant 0 : index
    %c1 = arith.constant 1 : index
    %3 = vector.load %arg5[%c0_5, %c1] : memref<32x4xf32, #tpu.memory_space<vmem>>, vector<32x1xf32>
    %c0_6 = arith.constant 0 : index
    %c2 = arith.constant 2 : index
    %4 = vector.load %arg5[%c0_6, %c2] : memref<32x4xf32, #tpu.memory_space<vmem>>, vector<32x1xf32>
    %c0_7 = arith.constant 0 : index
    %c3 = arith.constant 3 : index
    %5 = vector.load %arg5[%c0_7, %c3] : memref<32x4xf32, #tpu.memory_space<vmem>>, vector<32x1xf32>
    %c0_8 = arith.constant 0 : index
    %c0_9 = arith.constant 0 : index
    %6 = vector.load %arg6[%c0_8, %c0_9] : memref<256x32xf32, #tpu.memory_space<vmem>>, vector<256x32xf32>
    %cst = arith.constant dense<0.000000e+00> : vector<32x32xf32>
    %7 = tpu.matmul %0, %6, %cst {dimension_numbers = #tpu.dot_dimension_numbers<[1], [0], [0], [1], [0, 0, 1, 1], [], []>, precision = #tpu.contract_precision<fp32>} : vector<32x256xf32>, vector<256x32xf32>, vector<32x32xf32> -> vector<32x32xf32>
    %c0_10 = arith.constant 0 : index
    %c0_11 = arith.constant 0 : index
    %8 = vector.load %arg3[%c0_10, %c0_11] : memref<32x32xf32, #tpu.memory_space<vmem>>, vector<32x32xf32>
    %cst_12 = arith.constant dense<0.000000e+00> : vector<32x32xf32>
    %9 = tpu.matmul %8, %7, %cst_12 {dimension_numbers = #tpu.dot_dimension_numbers<[1], [0], [0], [1], [0, 0, 1, 1], [], []>} : vector<32x32xf32>, vector<32x32xf32>, vector<32x32xf32> -> vector<32x32xf32>
    %10 = vector.broadcast %2 : vector<32x1xf32> to vector<32x32xf32>
    %11 = arith.addf %9, %10 : vector<32x32xf32>
    %12 = arith.negf %11 : vector<32x32xf32>
    %13 = math.exp %12 : vector<32x32xf32>
    %cst_13 = arith.constant 1.000000e+00 : f32
    %14 = vector.broadcast %cst_13 : f32 to vector<32x32xf32>
    %15 = arith.addf %14, %13 : vector<32x32xf32>
    %16 = arith.divf %14, %15 : vector<32x32xf32>
    %c0_14 = arith.constant 0 : index
    %c0_15 = arith.constant 0 : index
    %17 = vector.load %arg7[%c0_14, %c0_15] : memref<32x512xf32, #tpu.memory_space<vmem>>, vector<32x512xf32>
    %cst_16 = arith.constant dense<0.000000e+00> : vector<32x512xf32>
    %18 = tpu.matmul %16, %17, %cst_16 {dimension_numbers = #tpu.dot_dimension_numbers<[1], [0], [0], [1], [0, 0, 1, 1], [], []>, precision = #tpu.contract_precision<fp32>} : vector<32x32xf32>, vector<32x512xf32>, vector<32x512xf32> -> vector<32x512xf32>
    %19 = vector.extract_strided_slice %18 {offsets = [0, 0], sizes = [32, 256], strides = [1, 1]} : vector<32x512xf32> to vector<32x256xf32>
    %20 = arith.mulf %0, %19 : vector<32x256xf32>
    %21 = vector.extract_strided_slice %18 {offsets = [0, 256], sizes = [32, 256], strides = [1, 1]} : vector<32x512xf32> to vector<32x256xf32>
    %22 = arith.mulf %20, %21 : vector<32x256xf32>
    %cst_17 = arith.constant dense<0.000000e+00> : vector<32xf32>
    %23 = vector.multi_reduction <add>, %22, %cst_17 [1] : vector<32x256xf32> to vector<32xf32>
    %24 = vector.shape_cast %23 : vector<32xf32> to vector<32x1xf32>
    %cst_18 = arith.constant 2.560000e+02 : f32
    %25 = vector.broadcast %cst_18 : f32 to vector<32x1xf32>
    %26 = arith.divf %24, %25 : vector<32x1xf32>
    %27 = vector.broadcast %26 : vector<32x1xf32> to vector<32x256xf32>
    %28 = arith.subf %22, %27 : vector<32x256xf32>
    %29 = arith.mulf %28, %28 : vector<32x256xf32>
    %cst_19 = arith.constant dense<0.000000e+00> : vector<32xf32>
    %30 = vector.multi_reduction <add>, %29, %cst_19 [1] : vector<32x256xf32> to vector<32xf32>
    %31 = vector.shape_cast %30 : vector<32xf32> to vector<32x1xf32>
    %cst_20 = arith.constant 2.560000e+02 : f32
    %32 = vector.broadcast %cst_20 : f32 to vector<32x1xf32>
    %33 = arith.divf %31, %32 : vector<32x1xf32>
    %34 = vector.broadcast %26 : vector<32x1xf32> to vector<32x256xf32>
    %35 = arith.subf %22, %34 : vector<32x256xf32>
    %cst_21 = arith.constant 9.99999974E-6 : f32
    %36 = vector.broadcast %cst_21 : f32 to vector<32x1xf32>
    %37 = arith.addf %33, %36 : vector<32x1xf32>
    %38 = math.rsqrt %37 : vector<32x1xf32>
    %39 = vector.broadcast %38 : vector<32x1xf32> to vector<32x256xf32>
    %40 = arith.mulf %35, %39 : vector<32x256xf32>
    %41 = vector.broadcast %4 : vector<32x1xf32> to vector<32x256xf32>
    %42 = arith.mulf %40, %41 : vector<32x256xf32>
    %43 = vector.broadcast %5 : vector<32x1xf32> to vector<32x256xf32>
    %44 = arith.addf %42, %43 : vector<32x256xf32>
    %c0_22 = arith.constant 0 : index
    %c0_23 = arith.constant 0 : index
    %45 = vector.load %arg4[%c0_22, %c0_23] : memref<32x288xf32, #tpu.memory_space<vmem>>, vector<32x288xf32>
    %c0_24 = arith.constant 0 : index
    %c0_25 = arith.constant 0 : index
    %46 = vector.load %arg2[%c0_24, %c0_25] : memref<288x256xf32, #tpu.memory_space<vmem>>, vector<288x256xf32>
    %cst_26 = arith.constant dense<0.000000e+00> : vector<32x256xf32>
    %47 = tpu.matmul %45, %46, %cst_26 {dimension_numbers = #tpu.dot_dimension_numbers<[1], [0], [0], [1], [0, 0, 1, 1], [], []>} : vector<32x288xf32>, vector<288x256xf32>, vector<32x256xf32> -> vector<32x256xf32>
    %48 = vector.broadcast %3 : vector<32x1xf32> to vector<32x256xf32>
    %49 = arith.addf %47, %48 : vector<32x256xf32>
    %cst_27 = arith.constant dense<0.000000e+00> : vector<32xf32>
    %50 = vector.multi_reduction <add>, %44, %cst_27 [1] : vector<32x256xf32> to vector<32xf32>
    %51 = vector.shape_cast %50 : vector<32xf32> to vector<32x1xf32>
    %cst_28 = arith.constant 2.560000e+02 : f32
    %52 = vector.broadcast %cst_28 : f32 to vector<32x1xf32>
    %53 = arith.divf %51, %52 : vector<32x1xf32>
    %cst_29 = arith.constant dense<0.000000e+00> : vector<32xf32>
    %54 = vector.multi_reduction <add>, %49, %cst_29 [1] : vector<32x256xf32> to vector<32xf32>
    %55 = vector.shape_cast %54 : vector<32xf32> to vector<32x1xf32>
    %cst_30 = arith.constant 2.560000e+02 : f32
    %56 = vector.broadcast %cst_30 : f32 to vector<32x1xf32>
    %57 = arith.divf %55, %56 : vector<32x1xf32>
    %cst_31 = arith.constant dense<0.000000e+00> : vector<32x1xf32>
    %58 = tpu.matmul %1, %53, %cst_31 {dimension_numbers = #tpu.dot_dimension_numbers<[1], [0], [0], [1], [0, 0, 1, 1], [], []>, precision = #tpu.contract_precision<fp32>} : vector<32x32xf32>, vector<32x1xf32>, vector<32x1xf32> -> vector<32x1xf32>
    %cst_32 = arith.constant 2.500000e-01 : f32
    %59 = vector.broadcast %cst_32 : f32 to vector<32x1xf32>
    %60 = arith.mulf %58, %59 : vector<32x1xf32>
    %cst_33 = arith.constant dense<0.000000e+00> : vector<32x1xf32>
    %61 = tpu.matmul %1, %57, %cst_33 {dimension_numbers = #tpu.dot_dimension_numbers<[1], [0], [0], [1], [0, 0, 1, 1], [], []>, precision = #tpu.contract_precision<fp32>} : vector<32x32xf32>, vector<32x1xf32>, vector<32x1xf32> -> vector<32x1xf32>
    %cst_34 = arith.constant 2.500000e-01 : f32
    %62 = vector.broadcast %cst_34 : f32 to vector<32x1xf32>
    %63 = arith.mulf %61, %62 : vector<32x1xf32>
    %64 = arith.subf %53, %60 : vector<32x1xf32>
    %65 = math.exp %64 : vector<32x1xf32>
    %66 = arith.subf %57, %63 : vector<32x1xf32>
    %67 = math.exp %66 : vector<32x1xf32>
    %cst_35 = arith.constant dense<0.000000e+00> : vector<32x1xf32>
    %68 = tpu.matmul %1, %65, %cst_35 {dimension_numbers = #tpu.dot_dimension_numbers<[1], [0], [0], [1], [0, 0, 1, 1], [], []>, precision = #tpu.contract_precision<fp32>} : vector<32x32xf32>, vector<32x1xf32>, vector<32x1xf32> -> vector<32x1xf32>
    %cst_36 = arith.constant dense<0.000000e+00> : vector<32x1xf32>
    %69 = tpu.matmul %1, %67, %cst_36 {dimension_numbers = #tpu.dot_dimension_numbers<[1], [0], [0], [1], [0, 0, 1, 1], [], []>, precision = #tpu.contract_precision<fp32>} : vector<32x32xf32>, vector<32x1xf32>, vector<32x1xf32> -> vector<32x1xf32>
    %70 = arith.divf %65, %68 : vector<32x1xf32>
    %71 = arith.divf %67, %69 : vector<32x1xf32>
    %72 = vector.broadcast %70 : vector<32x1xf32> to vector<32x256xf32>
    %73 = arith.mulf %72, %49 : vector<32x256xf32>
    %74 = vector.broadcast %71 : vector<32x1xf32> to vector<32x256xf32>
    %75 = arith.mulf %74, %44 : vector<32x256xf32>
    %76 = arith.addf %73, %75 : vector<32x256xf32>
    %cst_37 = arith.constant dense<0.000000e+00> : vector<32x256xf32>
    %77 = tpu.matmul %1, %76, %cst_37 {dimension_numbers = #tpu.dot_dimension_numbers<[1], [0], [0], [1], [0, 0, 1, 1], [], []>, precision = #tpu.contract_precision<fp32>} : vector<32x32xf32>, vector<32x256xf32>, vector<32x256xf32> -> vector<32x256xf32>
    %78 = arith.negf %77 : vector<32x256xf32>
    %79 = math.exp %78 : vector<32x256xf32>
    %cst_38 = arith.constant 1.000000e+00 : f32
    %80 = vector.broadcast %cst_38 : f32 to vector<32x256xf32>
    %81 = arith.addf %80, %79 : vector<32x256xf32>
    %82 = arith.divf %80, %81 : vector<32x256xf32>
    %83 = arith.mulf %0, %82 : vector<32x256xf32>
    %c0_39 = arith.constant 0 : index
    %c0_40 = arith.constant 0 : index
    %84 = vector.load %arg9[%c0_39, %c0_40] : memref<32x256xf32, #tpu.memory_space<vmem>>, vector<32x256xf32>
    tpu.vector_store %arg9[%c0_39, %c0_40], %83 {strides = array<i32>} : memref<32x256xf32, #tpu.memory_space<vmem>>, vector<32x256xf32>,
    return
  }
  func.func @transform_0(%arg0: i32) -> (i32, i32) {
    %c0_i32 = arith.constant 0 : i32
    %c0_i32_0 = arith.constant 0 : i32
    return %arg0, %c0_i32 : i32, i32
  }
  func.func @transform_1(%arg0: i32) -> (i32, i32) {
    %c0_i32 = arith.constant 0 : i32
    %c0_i32_0 = arith.constant 0 : i32
    return %arg0, %c0_i32 : i32, i32
  }
  func.func @transform_2(%arg0: i32) -> (i32, i32) {
    %c0_i32 = arith.constant 0 : i32
    %c0_i32_0 = arith.constant 0 : i32
    %c0_i32_1 = arith.constant 0 : i32
    return %c0_i32, %c0_i32_0 : i32, i32
  }
  func.func @transform_3(%arg0: i32) -> (i32, i32) {
    %c0_i32 = arith.constant 0 : i32
    %c0_i32_0 = arith.constant 0 : i32
    %c0_i32_1 = arith.constant 0 : i32
    return %c0_i32, %c0_i32_0 : i32, i32
  }
  func.func @transform_4(%arg0: i32) -> (i32, i32) {
    %c0_i32 = arith.constant 0 : i32
    %c0_i32_0 = arith.constant 0 : i32
    %c0_i32_1 = arith.constant 0 : i32
    return %c0_i32, %c0_i32_0 : i32, i32
  }
  func.func @transform_5(%arg0: i32) -> (i32, i32) {
    %c0_i32 = arith.constant 0 : i32
    %c0_i32_0 = arith.constant 0 : i32
    %c0_i32_1 = arith.constant 0 : i32
    return %c0_i32, %c0_i32_0 : i32, i32
  }
  func.func @transform_6(%arg0: i32) -> (i32, i32) {
    %c0_i32 = arith.constant 0 : i32
    %c0_i32_0 = arith.constant 0 : i32
    %c0_i32_1 = arith.constant 0 : i32
    return %c0_i32, %c0_i32_0 : i32, i32
  }
  func.func @transform_7(%arg0: i32) -> (i32, i32) {
    %c0_i32 = arith.constant 0 : i32
    %c0_i32_0 = arith.constant 0 : i32
    %c0_i32_1 = arith.constant 0 : i32
    return %c0_i32, %c0_i32_0 : i32, i32
  }
  func.func @transform_8(%arg0: i32) -> (i32, i32) {
    %c0_i32 = arith.constant 0 : i32
    %c0_i32_0 = arith.constant 0 : i32
    return %arg0, %c0_i32 : i32, i32
  }
}

</mosaic_0001>

<bundles_post_ra>
// kernel: mul.35
= control target key start
LH: loop header
LB: loop body
LE: loop exit
PB: predicated region body
PF: predicated region fallthrough
CT: control target
= control target key end

     0   :  { %s100_s0 = inlined_call_operand.vmem [shape: f32[32,32], index: 0, kind: input, shape index: {}]   ;;  %s101_s1 = inlined_call_operand.vmem [shape: f32[32,32], index: 1, kind: input, shape index: {}]   ;;  %s102_s2 = inlined_call_operand.vmem [shape: f32[32,32], index: 2, kind: output, shape index: {}]  }
   0x1   :  { %v3_v0 = vld [vmem:[%s100_s0] sm:$0xff]  ;;  %v40_v2 = vld [vmem:[%s100_s0 + $0x8] sm:$0xff]  ;;  %v43_v5 = vld [vmem:[%s100_s0 + $0x10] sm:$0xff] }
   0x2   :  { %v4_v1 = vld [vmem:[%s101_s1] sm:$0xff]  ;;  %v41_v4 = vld [vmem:[%s101_s1 + $0x8] sm:$0xff]  ;;  %v44_v6 = vld [vmem:[%s101_s1 + $0x10] sm:$0xff] }
   0x3   :  { %v7_v3 = vmul.f32 %v4_v1, %v3_v0  ;;  %v16_v7 = vmul.f32 %v41_v4, %v40_v2  ;;  %v26_v8 = vmul.f32 %v44_v6, %v43_v5  ;;  %v46_v9 = vld [vmem:[%s100_s0 + $0x18] sm:$0xff] }
   0x4   :  { %v47_v10 = vld [vmem:[%s101_s1 + $0x18] sm:$0xff] }
   0x5   :  { %9 = vst [vmem:[%s102_s2] sm:$0xff] %v7_v3  ;;  %v36_v11 = vmul.f32 %v47_v10, %v46_v9  ;;  %42 = vst [vmem:[%s102_s2 + $0x8] sm:$0xff] %v16_v7 }
   0x6   :  { %45 = vst [vmem:[%s102_s2 + $0x10] sm:$0xff] %v26_v8 }
   0x7   :  { %48 = vst [vmem:[%s102_s2 + $0x18] sm:$0xff] %v36_v11 }

// kernel: mul.18
= control target key start
LH: loop header
LB: loop body
LE: loop exit
PB: predicated region body
PF: predicated region fallthrough
CT: control target
= control target key end

     0   :  { %s147_s30 = smov 24   ;;  %vm61_vm0 = vcmask 31744   ;;  %s148_s2 = smov 28   ;;  %vm67_vm1 = vcmask 294144   ;;  %vm73_vm2 = vcmask 261344   ;;  %vm79_vm3 = vcmask 228544   ;;  %s203_s0 = inlined_call_operand.vmem [shape: f32[4,3,3,4], index: 0, kind: input, shape index: {}]   ;;  %s204_s1 = inlined_call_operand.vmem [shape: f32[4,36], index: 1, kind: output, shape index: {}]  }
   0x1   :  { %v127_v0 = vld [vmem:[%s203_s0 + $0x2c] sm:$0xf]  ;;  %v130_v1 = vld [vmem:[%s203_s0 + $0x20] sm:$0xf]  ;;  %v133_v2 = vld [vmem:[%s203_s0 + $0x14] sm:$0xf] }
   0x2   :  { %8 = vst [vmem:[#allocation1 + $0x58] sm:$0xf] %v127_v0  ;;  %23 = vst [vmem:[#allocation1 + $0x40] sm:$0xf] %v130_v1  ;;  %v136_v3 = vld [vmem:[%s203_s0 + $0x8] sm:$0xf] }
   0x3   :  { %38 = vst [vmem:[#allocation1 + $0x28] sm:$0xf] %v133_v2  ;;  %v128_v4 = vld [vmem:[%s203_s0 + $0x28] sm:$0xf]  ;;  %53 = vst [vmem:[#allocation1 + $0x10] sm:$0xf] %v136_v3 }
   0x4   :  { %13 = vst [vmem:[#allocation1 + $0x50] sm:$0xf] %v128_v4  ;;  %v131_v5 = vld [vmem:[%s203_s0 + $0x1c] sm:$0xf]  ;;  %v134_v6 = vld [vmem:[%s203_s0 + $0x10] sm:$0xf] }
   0x5   :  { %28 = vst [vmem:[#allocation1 + $0x38] sm:$0xf] %v131_v5  ;;  %43 = vst [vmem:[#allocation1 + $0x20] sm:$0xf] %v134_v6  ;;  %v137_v7 = vld [vmem:[%s203_s0 + $0x4] sm:$0xf] }
   0x6   :  { %v129_v8 = vld [vmem:[%s203_s0 + $0x24] sm:$0xf]  ;;  %57 = vst [vmem:[#allocation1 + $0x8] sm:$0xf] %v137_v7  ;;  %v132_v9 = vld [vmem:[%s203_s0 + $0x18] sm:$0xf] }
   0x7   :  { %18 = vst [vmem:[#allocation1 + $0x48] sm:$0xf] %v129_v8  ;;  %v135_v10 = vld [vmem:[%s203_s0 + $0xc] sm:$0xf]  ;;  %v58_v11 = vld [vmem:[%s203_s0] sm:$0xf] }
   0x8   :  { %33 = vst [vmem:[#allocation1 + $0x30] sm:$0xf] %v132_v9  ;;  %48 = vst [vmem:[#allocation1 + $0x18] sm:$0xf] %v135_v10  ;;  %s146_s0 = smov 32   ;;  %s149_s3 = smov 20  }
   0x9   :  { %59 = vst [vmem:[#allocation1] sm:$0xf] %v58_v11  ;;  %s150_s4 = smov 16   ;;  %s151_s5 = smov 12   ;;  %vm85_vm4 = vcmask 195744   ;;  %vm91_vm5 = vcmask 162944  }
   0xa   :  { %v64_v12 = vld [vmem:[#allocation1 + $0x12] ss:$24 sm:$0xf]   ;;  %v76_v13 = vld [vmem:[#allocation1 + $0x10] ss:$24 sm:$0xf]  }
   0xb   :  { %65 = vrot.lane.b32.xlu0 %v64_v12, %s146_s0  ;;  %77 = vrot.lane.b32.xlu1 %v76_v13, %s147_s30  ;;  %v70_v14 = vld [vmem:[#allocation1 + $0x11] ss:$24 sm:$0xf]   ;;  %s152_s6 = smov 8   ;;  %s153_s7 = smov 4   ;;  %vm97_vm6 = vcmask 130144  }
   0xc   :  { %vm103_vm7 = vcmask 97344   ;;  %vm109_vm8 = vcmask 64544  }
   0xd   :  { %v82_v15 = vld [vmem:[#allocation1 + $0xa] ss:$24 sm:$0xf]   ;;  %v88_v17 = vld [vmem:[#allocation1 + $0x9] ss:$24 sm:$0xf]  }
   0xe   :  { %v94_v18 = vld [vmem:[#allocation1 + $0x8] ss:$24 sm:$0xf]  }
   0xf   :  { %71 = vrot.lane.b32.xlu0 %v70_v14, %s148_s2  ;;  %83 = vrot.lane.b32.xlu1 %v82_v15, %s149_s3 }
  0x10   :  { %v60_v16 = vld [vmem:[#allocation1] ss:$24 sm:$0xf]   ;;  %v100_v19 = vld [vmem:[#allocation1 + $0x2] ss:$24 sm:$0xf]  }
  0x11   :  { %62 = vst.msk [vmem:[#allocation0] sm:$0xf] %vm61_vm0, %v60_v16   ;;  %v106_v20 = vld [vmem:[#allocation1 + $0x1] ss:$24 sm:$0xf]  }
  0x13   :  { %89 = vrot.lane.b32.xlu0 %v88_v17, %s150_s4  ;;  %95 = vrot.lane.b32.xlu1 %v94_v18, %s151_s5 }
  0x17   :  { %101 = vrot.lane.b32.xlu0 %v100_v19, %s152_s6  ;;  %107 = vrot.lane.b32.xlu1 %v106_v20, %s153_s7 }
  0x7d   :  { %v66_v21 = vpop.permute.xlu0 %65   ;;  %v78_v22 = vpop.permute.xlu1 %77  }
  0x7e   :  { %68 = vst.msk [vmem:[#allocation0] sm:$0xf] %vm67_vm1, %v66_v21  }
  0x81   :  { %v72_v23 = vpop.permute.xlu0 %71   ;;  %v84_v24 = vpop.permute.xlu1 %83  }
  0x82   :  { %74 = vst.msk [vmem:[#allocation0] sm:$0xf] %vm73_vm2, %v72_v23  }
  0x83   :  { %80 = vst.msk [vmem:[#allocation0] sm:$0xf] %vm79_vm3, %v78_v22  }
  0x84   :  { %86 = vst.msk [vmem:[#allocation0] sm:$0xf] %vm85_vm4, %v84_v24  }
  0x85   :  { %v90_v25 = vpop.permute.xlu0 %89   ;;  %v96_v26 = vpop.permute.xlu1 %95  }
  0x86   :  { %92 = vst.msk [vmem:[#allocation0] sm:$0xf] %vm91_vm5, %v90_v25  }
  0x87   :  { %98 = vst.msk [vmem:[#allocation0] sm:$0xf] %vm97_vm6, %v96_v26  }
  0x89   :  { %v102_v27 = vpop.permute.xlu0 %101   ;;  %v108_v28 = vpop.permute.xlu1 %107  }
  0x8a   :  { %104 = vst.msk [vmem:[#allocation0] sm:$0xf] %vm103_vm7, %v102_v27  }
  0x8b   :  { %110 = vst.msk [vmem:[#allocation0] sm:$0xf] %vm109_vm8, %v108_v28  }
  0x92   :  { %v114_v29 = vld [vmem:[#allocation0] sm:$0xf] }
  0x93   :  { %116 = vst [vmem:[%s204_s1] sm:$0xf] %v114_v29 }

// kernel: ema_pallas.1
= control target key start
LH: loop header
LB: loop body
LE: loop exit
PB: predicated region body
PF: predicated region fallthrough
CT: control target
= control target key end

     0   :  { %s8696_s27 = smov 0   ;;  %s10489_s0 = inlined_call_operand.vmem [shape: f32[64,256], index: 0, kind: input, shape index: {}]   ;;  %s10490_s1 = inlined_call_operand.vmem [shape: f32[576,256], index: 1, kind: input, shape index: {}]   ;;  %s10491_s2 = inlined_call_operand.vmem [shape: f32[32,32], index: 2, kind: input, shape index: {}]   ;;  %s10492_s3 = inlined_call_operand.vmem [shape: f32[32,288], index: 3, kind: input, shape index: {}]   ;;  %s10493_s4 = inlined_call_operand.vmem [shape: f32[32,4], index: 4, kind: input, shape index: {}]   ;;  %s10494_s5 = inlined_call_operand.vmem [shape: f32[256,32], index: 5, kind: input, shape index: {}]   ;;  %s10495_s6 = inlined_call_operand.vmem [shape: f32[32,512], index: 6, kind: input, shape index: {}]   ;;  %s10496_s7 = inlined_call_operand.vmem [shape: f32[32,32], index: 7, kind: input, shape index: {}]   ;;  %s10497_s8 = inlined_call_operand.vmem [shape: f32[64,256], index: 8, kind: output, shape index: {}]  }
   0x1 LB: > { %s6826_s28 = sadd.s32 4294967295, %s8644_s27   ;;  %p6830_p0 = scmp.ge.s32.totalorder %s8644_s27, 1  ;;  %s8644_s27 = sphi %s8696_s27, %s18_s27  }
   0x2   : > { %p276_p1 = scmp.lt.s32.totalorder %s8644_s27, 3 }
   0x4   : > { %p277_p2 = pnand %p6830_p0, %p276_p1 }
   0x6   : > { %280 = sbr.rel (%p277_p2) target bundleno = 2495 (0x9bf), region = 52 }
   0xd   : > { %v371_v0 = vld [vmem:[%s10494_s5 + $0x80] sm:$0xff]  ;;  %v372_v1 = vld [vmem:[%s10494_s5 + $0x88] sm:$0xff]  ;;  %s8715_s13 = sshll.u32 %s6826_s28, 2  ;;  %v373_v7 = vld [vmem:[%s10494_s5 + $0x90] sm:$0xff]  ;;  %vm1441_vm0 = vcmask 261120   ;;  %s325_s16 = smul.u32 36, %s6826_s28 }
   0xe   : > { %v355_v2 = vld [vmem:[%s10494_s5] sm:$0xff]  ;;  %v436_v3 = vand.u32 4294901760, %v371_v0  ;;  %v439_v4 = vand.u32 4294901760, %v372_v1  ;;  %v356_v5 = vld [vmem:[%s10494_s5 + $0x8] sm:$0xff]  ;;  %v374_v8 = vld [vmem:[%s10494_s5 + $0x98] sm:$0xff]  ;;  %v442_v10 = vand.u32 4294901760, %v373_v7 }
   0xf   : > { %v388_v6 = vand.u32 4294901760, %v355_v2  ;;  %v391_v9 = vand.u32 4294901760, %v356_v5  ;;  %v445_v11 = vand.u32 4294901760, %v374_v8  ;;  %v357_v12 = vld [vmem:[%s10494_s5 + $0x10] sm:$0xff]  ;;  %v358_v13 = vld [vmem:[%s10494_s5 + $0x18] sm:$0xff]  ;;  %v375_v14 = vld [vmem:[%s10494_s5 + $0xa0] sm:$0xff] }
  0x10   : > { %v8735_v15 = vpack.c.bf16 %v439_v4, %v436_v3  ;;  %v8737_v16 = vsub.f32 %v371_v0, %v436_v3  ;;  %v8739_v17 = vsub.f32 %v372_v1, %v439_v4  ;;  %v376_v18 = vld [vmem:[%s10494_s5 + $0xa8] sm:$0xff]  ;;  %v359_v19 = vld [vmem:[%s10494_s5 + $0x20] sm:$0xff]  ;;  %p319_p3 = scmp.lt.s32.totalorder %s8715_s13, 7  ;;  %v377_v25 = vld [vmem:[%s10494_s5 + $0xb0] sm:$0xff]  ;;  %v8763_v26 = vsub.f32 %v373_v7, %v442_v10  ;;  %p326_p4 = scmp.lt.s32.totalorder %s325_s16, 71 }
  0x11   : > { %v360_v20 = vld [vmem:[%s10494_s5 + $0x28] sm:$0xff]  ;;  %v8751_v21 = vpack.c.bf16 %v391_v9, %v388_v6  ;;  %v8753_v22 = vsub.f32 %v355_v2, %v388_v6  ;;  %v8755_v23 = vsub.f32 %v356_v5, %v391_v9  ;;  %v8757_v24 = vpack.c.bf16 %v445_v11, %v442_v10  ;;  %v378_v34 = vld [vmem:[%s10494_s5 + $0xb8] sm:$0xff]  ;;  %v361_v35 = vld [vmem:[%s10494_s5 + $0x30] sm:$0xff] }
  0x12   : > { %10550 = vst [vmem:[#allocation2_spill] sm:$0xff] %v8737_v16  ;;  %10551 = vst [vmem:[#allocation3_spill] sm:$0xff] %v8739_v17  ;;  %7679 = vmatprep.subr.bf16.mxu0 %v8735_v15  ;;  %v394_v27 = vand.u32 4294901760, %v357_v12  ;;  %v397_v28 = vand.u32 4294901760, %v358_v13  ;;  %v448_v29 = vand.u32 4294901760, %v375_v14  ;;  %7775 = vmatprep.subr.bf16.mxu1 %v8735_v15  ;;  %v8767_v30 = vsub.f32 %v374_v8, %v445_v11  ;;  %v362_v36 = vld [vmem:[%s10494_s5 + $0x38] sm:$0xff] }
  0x13   : > { %10552 = vst [vmem:[#allocation4_spill] sm:$0xff] %v8753_v22  ;;  %10553 = vst [vmem:[#allocation5_spill] sm:$0xff] %v8755_v23  ;;  %7681 = vmatpush3.bf16.msra.mxu0 %v8751_v21  ;;  %v451_v31 = vand.u32 4294901760, %v376_v18  ;;  %v400_v32 = vand.u32 4294901760, %v359_v19  ;;  %v403_v33 = vand.u32 4294901760, %v360_v20  ;;  %7777 = vmatpush3.bf16.msra.mxu1 %v8751_v21  ;;  %v454_v40 = vand.u32 4294901760, %v377_v25 }
  0x14   : > { %7683 = vmatprep.subr.bf16.mxu0 %v8757_v24  ;;  %v8780_v37 = vpack.c.bf16 %v397_v28, %v394_v27  ;;  %v8782_v38 = vsub.f32 %v357_v12, %v394_v27  ;;  %v8784_v39 = vsub.f32 %v358_v13, %v397_v28  ;;  %v379_v41 = vld [vmem:[%s10494_s5 + $0xc0] sm:$0xff]  ;;  %v380_v42 = vld [vmem:[%s10494_s5 + $0xc8] sm:$0xff]  ;;  %s10628_s13 = smov (!%p319_p3, %s8715_s13), 7  ;;  %v8802_v45 = vsub.f32 %v375_v14, %v448_v29  ;;  %v381_v57 = vld [vmem:[%s10494_s5 + $0xd0] sm:$0xff]  ;;  %s10630_s16 = smov (!%p326_p4, %s325_s16), 71 }
  0x15   : > { %v363_v43 = vld [vmem:[%s10494_s5 + $0x40] sm:$0xff]  ;;  %v8800_v44 = vpack.c.bf16 %v451_v31, %v448_v29  ;;  %v8804_v46 = vsub.f32 %v376_v18, %v451_v31  ;;  %v8806_v47 = vpack.c.bf16 %v403_v33, %v400_v32  ;;  %v364_v48 = vld [vmem:[%s10494_s5 + $0x48] sm:$0xff]  ;;  %7779 = vmatprep.subr.bf16.mxu1 %v8757_v24  ;;  %v8812_v49 = vsub.f32 %v359_v19, %v400_v32  ;;  %v382_v58 = vld [vmem:[%s10494_s5 + $0xd8] sm:$0xff]  ;;  %s6861_s20 = sshll.u32 %s10628_s13, 4  ;;  %s6862_s19 = sshll.u32 %s10630_s16, 4 }
  0x16   : > { %v8814_v50 = vsub.f32 %v360_v20, %v403_v33  ;;  %v457_v51 = vand.u32 4294901760, %v378_v34  ;;  %v406_v52 = vand.u32 4294901760, %v361_v35  ;;  %v409_v53 = vand.u32 4294901760, %v362_v36  ;;  %v365_v63 = vld [vmem:[%s10494_s5 + $0x50] sm:$0xff]  ;;  %v366_v0 = vld [vmem:[%s10494_s5 + $0x58] sm:$0xff]  ;;  %v383_v1 = vld [vmem:[%s10494_s5 + $0xe0] sm:$0xff]  ;;  %s8873_s9 = scalar_lea.vmem %s10489_s0, %s6861_s20  ;;  %s9752_s23 = scalar_lea.vmem %s10490_s1, %s6862_s19 }
  0x17   : > { %7685 = vmatpush3.bf16.msra.mxu0 %v8780_v37  ;;  %v460_v54 = vand.u32 4294901760, %v379_v41  ;;  %v463_v55 = vand.u32 4294901760, %v380_v42  ;;  %v412_v56 = vand.u32 4294901760, %v363_v43  ;;  %7781 = vmatpush3.bf16.msra.mxu1 %v8780_v37  ;;  %v8827_v60 = vsub.f32 %v377_v25, %v454_v40  ;;  %v384_v6 = vld [vmem:[%s10494_s5 + $0xe8] sm:$0xff]  ;;  %v367_v7 = vld [vmem:[%s10494_s5 + $0x60] sm:$0xff]  ;;  %v385_v29 = vld [vmem:[%s10494_s5 + $0xf0] sm:$0xff]  ;;  %s10468_s29 = scalar_lea.vmem %s10497_s8, %s6861_s20 }
  0x18   : > { %10554 = vst [vmem:[#allocation6_spill] sm:$0xff] %v8814_v50  ;;  %7687 = vmatprep.subr.bf16.mxu0 %v8800_v44  ;;  %v8825_v59 = vpack.c.bf16 %v457_v51, %v454_v40  ;;  %v8829_v61 = vsub.f32 %v378_v34, %v457_v51  ;;  %v415_v62 = vand.u32 4294901760, %v364_v48  ;;  %7783 = vmatprep.subr.bf16.mxu1 %v8800_v44  ;;  %v368_v8 = vld [vmem:[%s10494_s5 + $0x68] sm:$0xff]  ;;  %v466_v13 = vand.u32 4294901760, %v381_v57  ;;  %v370_v40 = vld [vmem:[%s10494_s5 + $0x78] sm:$0xff] }
  0x19   : > { %10555 = vst [vmem:[#allocation7_spill] sm:$0xff] %v8827_v60  ;;  %v8842_v2 = vpack.c.bf16 %v409_v53, %v406_v52  ;;  %v8844_v3 = vsub.f32 %v361_v35, %v406_v52  ;;  %v8846_v4 = vsub.f32 %v362_v36, %v409_v53  ;;  %v8848_v5 = vpack.c.bf16 %v463_v55, %v460_v54  ;;  %v386_v35 = vld [vmem:[%s10494_s5 + $0xf8] sm:$0xff]  ;;  %v369_v36 = vld [vmem:[%s10494_s5 + $0x70] sm:$0xff]  ;;  %v340_v51 = vld [vmem:[%s8873_s9 + $0x8] sm:$0xff] }
  0x1a   : > { %v8859_v9 = vsub.f32 %v379_v41, %v460_v54  ;;  %v8861_v10 = vsub.f32 %v380_v42, %v463_v55  ;;  %v8863_v11 = vpack.c.bf16 %v415_v62, %v412_v56  ;;  %v8865_v12 = vsub.f32 %v363_v43, %v412_v56  ;;  %v339_v52 = vld [vmem:[%s8873_s9] sm:$0xff] }
  0x1b   : > { %7689 = vmatpush3.bf16.msra.mxu0 %v8806_v47  ;;  %v469_v14 = vand.u32 4294901760, %v382_v58  ;;  %v418_v18 = vand.u32 4294901760, %v365_v63  ;;  %v421_v19 = vand.u32 4294901760, %v366_v0  ;;  %7785 = vmatpush3.bf16.msra.mxu1 %v8806_v47  ;;  %v472_v20 = vand.u32 4294901760, %v383_v1 }
  0x1c   : > { %7691 = vmatprep.subr.bf16.mxu0 %v8825_v59  ;;  %v475_v25 = vand.u32 4294901760, %v384_v6  ;;  %v424_v27 = vand.u32 4294901760, %v367_v7  ;;  %v427_v28 = vand.u32 4294901760, %v368_v8  ;;  %7787 = vmatprep.subr.bf16.mxu1 %v8825_v59  ;;  %v8881_v31 = vsub.f32 %v364_v48, %v415_v62 }
  0x1d   : > { %v8883_v32 = vpack.c.bf16 %v469_v14, %v466_v13  ;;  %v8885_v33 = vsub.f32 %v381_v57, %v466_v13  ;;  %v8887_v34 = vsub.f32 %v382_v58, %v469_v14  ;;  %v8898_v41 = vpack.c.bf16 %v421_v19, %v418_v18 }
  0x1e   : > { %v8900_v42 = vsub.f32 %v365_v63, %v418_v18  ;;  %v8902_v43 = vsub.f32 %v366_v0, %v421_v19  ;;  %v8904_v48 = vpack.c.bf16 %v475_v25, %v472_v20  ;;  %v8909_v53 = vsub.f32 %v383_v1, %v472_v20 }
  0x1f   : > { %10556 = vst [vmem:[#allocation8_spill] sm:$0xff] %v8883_v32  ;;  %7693 = vmatpush3.bf16.msra.mxu0 %v8842_v2  ;;  %v8911_v54 = vsub.f32 %v384_v6, %v475_v25  ;;  %v8913_v55 = vpack.c.bf16 %v427_v28, %v424_v27  ;;  %v8915_v56 = vsub.f32 %v367_v7, %v424_v27  ;;  %v478_v57 = vand.u32 4294901760, %v385_v29 }
  0x20   : > { %10557 = vst [vmem:[#allocation9_spill] sm:$0xff] %v8904_v48  ;;  %7695 = vmatprep.subr.bf16.mxu0 %v8848_v5  ;;  %v481_v58 = vand.u32 4294901760, %v386_v35  ;;  %v430_v62 = vand.u32 4294901760, %v369_v36  ;;  %v433_v63 = vand.u32 4294901760, %v370_v40  ;;  %7789 = vmatpush3.bf16.msra.mxu1 %v8842_v2  ;;  %v8919_v0 = vand.u32 4294901760, %v340_v51 }
  0x21   : > { %10558 = vst [vmem:[#allocation10_spill] sm:$0xff] %v8913_v55  ;;  %v8921_v13 = vand.u32 4294901760, %v339_v52  ;;  %v10498_v1 = vand.u32 4294901760, %v8737_v16  ;;  %7791 = vmatprep.subr.bf16.mxu1 %v8848_v5  ;;  %v8926_v7 = vsub.f32 %v368_v8, %v427_v28  ;;  %v8930_v18 = vsub.f32 %v385_v29, %v478_v57 }
  0x22   : > { %10559 = vst [vmem:[#allocation11_spill] sm:$0xff] %v8919_v0  ;;  %v8928_v14 = vpack.c.bf16 %v481_v58, %v478_v57  ;;  %v8932_v19 = vsub.f32 %v386_v35, %v481_v58  ;;  %v8935_v20 = vpack.c.bf16 %v433_v63, %v430_v62  ;;  %v8937_v25 = vsub.f32 %v369_v36, %v430_v62 }
  0x23   : > { %10560 = vst [vmem:[#allocation12_spill] sm:$0xff] %v8921_v13  ;;  %7697 = vmatpush3.bf16.msra.mxu0 %v8863_v11  ;;  %v8940_v27 = vsub.f32 %v340_v51, %v8919_v0  ;;  %v8943_v6 = vsub.f32 %v339_v52, %v8921_v13  ;;  %v660_v8 = vsub.f32 %v8737_v16, %v10498_v1  ;;  %v10563_v28 = vand.u32 4294901760, %v8739_v17 }
  0x24   : > { %10561 = vst [vmem:[#allocation13_spill] sm:$0xff] %v8928_v14  ;;  %7699 = vmatprep.subr.bf16.mxu0 %v8883_v32  ;;  %v10503_v35 = vand.u32 4294901760, %v8753_v22  ;;  %v10506_v36 = vand.u32 4294901760, %v8755_v23  ;;  %7793 = vmatpush3.bf16.msra.mxu1 %v8863_v11 }
  0x25   : > { %10562 = vst [vmem:[#allocation14_spill] sm:$0xff] %v8940_v27  ;;  %v667_v29 = vsub.f32 %v8739_v17, %v10563_v28  ;;  %v485_v51 = vand.u32 4294901760, %v8940_v27  ;;  %7795 = vmatprep.subr.bf16.mxu1 %v8883_v32  ;;  %v661_v62 = vand.u32 4294901760, %v660_v8  ;;  %v10564_v57 = vand.u32 4294901760, %v8943_v6 }
  0x26   : > { %v548_v28 = vsub.f32 %v8753_v22, %v10503_v35  ;;  %v555_v13 = vsub.f32 %v8755_v23, %v10506_v36  ;;  %v10565_v17 = vand.u32 4294901760, %v8763_v26  ;;  %v8978_v22 = vsub.f32 %v370_v40, %v433_v63 }
  0x27   : > { %v668_v1 = vand.u32 4294901760, %v667_v29  ;;  %7701 = vmatpush3.bf16.msra.mxu0 %v8898_v41  ;;  %v486_v52 = vsub.f32 %v8940_v27, %v485_v51  ;;  %v492_v58 = vsub.f32 %v8943_v6, %v10564_v57  ;;  %v10566_v29 = vand.u32 4294901760, %v8767_v30  ;;  %1061 = vmatprep.mubr.f32.mxu1 %v485_v51 }
  0x28   : > { %v674_v8 = vsub.f32 %v8763_v26, %v10565_v17  ;;  %7703 = vmatprep.subr.bf16.mxu0 %v8904_v48  ;;  %v549_v36 = vand.u32 4294901760, %v548_v28  ;;  %v556_v23 = vand.u32 4294901760, %v555_v13  ;;  %v10519_v27 = vand.u32 4294901760, %v8782_v38  ;;  %7797 = vmatpush3.bf16.msra.mxu1 %v8898_v41 }
  0x29   : > { %v681_v35 = vsub.f32 %v8767_v30, %v10566_v29  ;;  %v487_v16 = vand.u32 4294901760, %v486_v52  ;;  %v493_v57 = vand.u32 4294901760, %v492_v58  ;;  %v7710_v0 = vpack.c.bf16 %v668_v1, %v661_v62  ;;  %7799 = vmatprep.subr.bf16.mxu1 %v8904_v48  ;;  %v342_v48 = vld [vmem:[%s8873_s9 + $0x18] sm:$0xff] }
  0x2a   : > { %v675_v32 = vand.u32 4294901760, %v674_v8  ;;  %v562_v29 = vsub.f32 %v8782_v38, %v10519_v27  ;;  %v10516_v40 = vand.u32 4294901760, %v8784_v39  ;;  %v10515_v63 = vand.u32 4294901760, %v8802_v45 }
  0x2b   : > { %v682_v17 = vand.u32 4294901760, %v681_v35  ;;  %7705 = vmatpush3.bf16.msra.mxu0 %v8913_v55  ;;  %488 = vmatprep.mubr.f32.mxu0 %v487_v16  ;;  %v7712_v13 = vpack.c.bf16 %v556_v23, %v549_v36  ;;  %v10517_v52 = vand.u32 4294901760, %v8804_v46  ;;  %v10518_v1 = vand.u32 4294901760, %v8812_v49 }
  0x2c   : > { %v10521_v58 = vand.u32 4294901760, %v8814_v50  ;;  %7707 = vmatprep.subr.bf16.mxu0 %v8928_v14  ;;  %v563_v35 = vand.u32 4294901760, %v562_v29  ;;  %v569_v51 = vsub.f32 %v8784_v39, %v10516_v40  ;;  %v688_v62 = vsub.f32 %v8802_v45, %v10515_v63  ;;  %7801 = vmatpush3.bf16.msra.mxu1 %v8913_v55 }
  0x2d   : > { %v10523_v16 = vand.u32 4294901760, %v8827_v60  ;;  %v695_v23 = vsub.f32 %v8804_v46, %v10517_v52  ;;  %v576_v36 = vsub.f32 %v8812_v49, %v10518_v1  ;;  %v10538_v8 = vand.u32 4294901760, %v8829_v61  ;;  %7803 = vmatprep.subr.bf16.mxu1 %v8928_v14 }
  0x2e   : > { %v583_v28 = vsub.f32 %v8814_v50, %v10521_v58  ;;  %v570_v29 = vand.u32 4294901760, %v569_v51  ;;  %v689_v63 = vand.u32 4294901760, %v688_v62  ;;  %v10536_v52 = vand.u32 4294901760, %v8844_v3  ;;  %v341_v50 = vld [vmem:[%s8873_s9 + $0x10] sm:$0xff] }
  0x2f   : > { %v702_v40 = vsub.f32 %v8827_v60, %v10523_v16  ;;  %7709 = vmatpush3.bf16.msra.mxu0 %v8935_v20  ;;  %v696_v1 = vand.u32 4294901760, %v695_v23  ;;  %v577_v27 = vand.u32 4294901760, %v576_v36  ;;  %v709_v58 = vsub.f32 %v8829_v61, %v10538_v8  ;;  %v346_v8 = vld [vmem:[%s8873_s9 + $0x38] sm:$0xff] }
  0x30   : > { %v584_v55 = vand.u32 4294901760, %v583_v28  ;;  %7711 = vmatprep.subr.bf16.mxu0 %v7710_v0  ;;  %v7714_v14 = vpack.c.bf16 %v682_v17, %v675_v32  ;;  %v7716_v51 = vpack.c.bf16 %v570_v29, %v563_v35  ;;  %v590_v62 = vsub.f32 %v8844_v3, %v10536_v52  ;;  %7805 = vmatpush3.bf16.msra.mxu1 %v8935_v20 }
  0x31   : > { %v10533_v16 = vand.u32 4294901760, %v8846_v4  ;;  %v7718_v60 = vpack.c.bf16 %v696_v1, %v689_v63  ;;  %v703_v23 = vand.u32 4294901760, %v702_v40  ;;  %v710_v36 = vand.u32 4294901760, %v709_v58  ;;  %7839 = vmatprep.subr.bf16.mxu1 %v8735_v15 }
  0x32   : > { %v10531_v28 = vand.u32 4294901760, %v8859_v9  ;;  %494 = vmatmul.mubr.f32.vlgmr.msra.gmra.mrb[0].mxu0 %v493_v57  ;;  %v591_v32 = vand.u32 4294901760, %v590_v62  ;;  %v10530_v17 = vand.u32 4294901760, %v8861_v10  ;;  %v10529_v35 = vand.u32 4294901760, %v8865_v12 }
  0x33   : > { %v597_v0 = vsub.f32 %v8846_v4, %v10533_v16  ;;  %7713 = vmatpush3.bf16.msra.mxu0 %v7712_v13  ;;  %v7720_v29 = vpack.c.bf16 %v584_v55, %v577_v27  ;;  %v10532_v63 = vand.u32 4294901760, %v8881_v31  ;;  %v9038_v1 = vand.u32 4294901760, %v342_v48  ;;  %v344_v16 = vld [vmem:[%s8873_s9 + $0x28] sm:$0xff] }
  0x34   : > { %v716_v40 = vsub.f32 %v8859_v9, %v10531_v28  ;;  %v10567_v15 = vand.u32 4294901760, %v8943_v6  ;;  %7715 = vmatprep.subr.bf16.mxu0 %v7714_v14  ;;  %v723_v58 = vsub.f32 %v8861_v10, %v10530_v17  ;;  %v604_v55 = vsub.f32 %v8865_v12, %v10529_v35 }
  0x35   : > { %v598_v57 = vand.u32 4294901760, %v597_v0  ;;  %v9048_v27 = vand.u32 4294901760, %v341_v50  ;;  %v611_v62 = vsub.f32 %v8881_v31, %v10532_v63  ;;  %v9055_v14 = vsub.f32 %v342_v48, %v9038_v1 }
  0x36   : > { %1065 = vmatmul.mubr.f32.vlgmr.msra.gmra.mrb[0].mxu1 %v10567_v15  ;;  %v717_v13 = vand.u32 4294901760, %v716_v40  ;;  %v10535_v0 = vand.u32 4294901760, %v8885_v33  ;;  %v7722_v15 = vpack.c.bf16 %v710_v36, %v703_v23  ;;  %v724_v17 = vand.u32 4294901760, %v723_v58 }
  0x37   : > { %7841 = vmatpush3.bf16.msra.mxu1 %v8751_v21  ;;  %v7724_v35 = vpack.c.bf16 %v598_v57, %v591_v32  ;;  %v9060_v28 = vsub.f32 %v341_v50, %v9048_v27  ;;  %7717 = vmatpush3.bf16.msra.mxu0 %v7716_v51  ;;  %v605_v21 = vand.u32 4294901760, %v604_v55  ;;  %v500_v40 = vand.u32 4294901760, %v9055_v14  ;;  %v343_v32 = vld [vmem:[%s8873_s9 + $0x20] sm:$0xff] }
  0x38   : > { %7843 = vmatprep.subr.bf16.mxu1 %v8757_v24  ;;  %v730_v48 = vsub.f32 %v8885_v33, %v10535_v0  ;;  %v10534_v63 = vand.u32 4294901760, %v8887_v34  ;;  %7719 = vmatprep.subr.bf16.mxu0 %v7718_v60  ;;  %v612_v24 = vand.u32 4294901760, %v611_v62  ;;  %v10537_v36 = vand.u32 4294901760, %v8900_v42 }
  0x39   : > { %v506_v23 = vand.u32 4294901760, %v9060_v28  ;;  %v10541_v50 = vand.u32 4294901760, %v8902_v43  ;;  %v7726_v51 = vpack.c.bf16 %v724_v17, %v717_v13  ;;  %v501_v57 = vsub.f32 %v9055_v14, %v500_v40  ;;  %1072 = vmatprep.mubr.f32.mxu1 %v500_v40 }
  0x3a   : > { %v731_v58 = vand.u32 4294901760, %v730_v48  ;;  %v737_v55 = vsub.f32 %v8887_v34, %v10534_v63  ;;  %v618_v62 = vsub.f32 %v8900_v42, %v10537_v36  ;;  %v9085_v17 = vand.u32 4294901760, %v344_v16 }
  0x3b   : > { %7845 = vmatpush3.bf16.msra.mxu1 %v8780_v37  ;;  %v507_v60 = vsub.f32 %v9060_v28, %v506_v23  ;;  %v625_v37 = vsub.f32 %v8902_v43, %v10541_v50  ;;  %7721 = vmatpush3.bf16.msra.mxu0 %v7720_v29  ;;  %v502_v13 = vand.u32 4294901760, %v501_v57  ;;  %v9087_v48 = vand.u32 4294901760, %v343_v32 }
  0x3c   : > { %7847 = vmatprep.subr.bf16.mxu1 %v8800_v44  ;;  %1076 = vmatmul.mubr.f32.gmra.mrb[2].mxu1 %v506_v23  ;;  %v738_v40 = vand.u32 4294901760, %v737_v55  ;;  %v10540_v44 = vand.u32 4294901760, %v8909_v53  ;;  %v7728_v63 = vpack.c.bf16 %v612_v24, %v605_v21  ;;  %v619_v52 = vand.u32 4294901760, %v618_v62  ;;  %v345_v21 = vld [vmem:[%s8873_s9 + $0x30] sm:$0xff] }
  0x3d   : > { %7723 = vmatprep.subr.bf16.mxu0 %v7722_v15  ;;  %v508_v0 = vand.u32 4294901760, %v507_v60  ;;  %v9091_v36 = vsub.f32 %v344_v16, %v9085_v17  ;;  %503 = vmatprep.mubr.f32.mxu0 %v502_v13  ;;  %v626_v23 = vand.u32 4294901760, %v625_v37  ;;  %v9096_v29 = vsub.f32 %v343_v32, %v9087_v48 }
  0x3e   : > { %v744_v57 = vsub.f32 %v8909_v53, %v10540_v44  ;;  %v10539_v15 = vand.u32 4294901760, %v8911_v54  ;;  %v7730_v16 = vpack.c.bf16 %v738_v40, %v731_v58  ;;  %v10543_v55 = vand.u32 4294901760, %v8926_v7 }
  0x3f   : > { %7849 = vmatpush3.bf16.msra.mxu1 %v8806_v47  ;;  %10568 = vst [vmem:[#allocation15_spill] sm:$0xff] %v9096_v29  ;;  %509 = vmatmul.mubr.f32.gmra.mrb[2].mxu0 %v508_v0  ;;  %v515_v24 = vand.u32 4294901760, %v9091_v36  ;;  %v10542_v47 = vand.u32 4294901760, %v8915_v56  ;;  %v521_v32 = vand.u32 4294901760, %v9096_v29  ;;  %v9111_v37 = vand.u32 4294901760, %v346_v8 }
  0x40   : > { %7851 = vmatprep.subr.bf16.mxu1 %v8825_v59  ;;  %7725 = vmatpush3.bf16.msra.mxu0 %v7724_v35  ;;  %v745_v60 = vand.u32 4294901760, %v744_v57  ;;  %v751_v62 = vsub.f32 %v8911_v54, %v10539_v15  ;;  %v639_v35 = vsub.f32 %v8926_v7, %v10543_v55  ;;  %v9120_v58 = vand.u32 4294901760, %v345_v21 }
  0x41   : > { %7727 = vmatprep.subr.bf16.mxu0 %v7726_v51  ;;  %v516_v59 = vsub.f32 %v9091_v36, %v515_v24  ;;  %v632_v0 = vsub.f32 %v8915_v56, %v10542_v47  ;;  %1083 = vmatprep.mubr.f32.mxu1 %v515_v24  ;;  %v522_v13 = vsub.f32 %v9096_v29, %v521_v32  ;;  %v10545_v51 = vand.u32 4294901760, %v8930_v18 }
  0x42   : > { %v752_v40 = vand.u32 4294901760, %v751_v62  ;;  %v9124_v57 = vsub.f32 %v346_v8, %v9111_v37  ;;  %1087 = vmatmul.mubr.f32.gmra.mrb[4].mxu1 %v521_v32  ;;  %v7732_v15 = vpack.c.bf16 %v626_v23, %v619_v52  ;;  %v9128_v47 = vsub.f32 %v345_v21, %v9120_v58 }
  0x43   : > { %v517_v44 = vand.u32 4294901760, %v516_v59  ;;  %v633_v50 = vand.u32 4294901760, %v632_v0  ;;  %7853 = vmatpush3.bf16.msra.mxu1 %v8842_v2  ;;  %v523_v55 = vand.u32 4294901760, %v522_v13  ;;  %v640_v24 = vand.u32 4294901760, %v639_v35 }
  0x44   : > { %10569 = vst [vmem:[#allocation16_spill] sm:$0xff] %v9128_v47  ;;  %7729 = vmatpush3.bf16.msra.mxu0 %v7728_v63  ;;  %v530_v29 = vand.u32 4294901760, %v9124_v57  ;;  %v758_v8 = vsub.f32 %v8930_v18, %v10545_v51  ;;  %7855 = vmatprep.subr.bf16.mxu1 %v8848_v5  ;;  %v7734_v52 = vpack.c.bf16 %v752_v40, %v745_v60  ;;  %v536_v23 = vand.u32 4294901760, %v9128_v47 }
  0x45   : > { %7731 = vmatprep.subr.bf16.mxu0 %v7730_v16  ;;  %518 = vmatprep.mubr.f32.mxu0 %v517_v44  ;;  %v764_v21 = vand.u32 4294901760, %v8932_v19  ;;  %v645_v2 = vand.u32 4294901760, %v8937_v25  ;;  %v652_v32 = vand.u32 4294901760, %v8978_v22  ;;  %v7736_v16 = vpack.c.bf16 %v640_v24, %v633_v50  ;;  %v10572_v50 = vld [vmem:[#allocation2_spill] sm:$0xff]  ;;  %v10573_v24 = vld [vmem:[#allocation3_spill] sm:$0xff] }
  0x46   : > { %524 = vmatmul.mubr.f32.gmra.mrb[4].mxu0 %v523_v55  ;;  %v531_v63 = vsub.f32 %v9124_v57, %v530_v29  ;;  %1094 = vmatprep.mubr.f32.mxu1 %v530_v29  ;;  %v537_v62 = vsub.f32 %v9128_v47, %v536_v23  ;;  %v759_v59 = vand.u32 4294901760, %v758_v8  ;;  %v10570_v29 = vld [vmem:[#allocation8_spill] sm:$0xff]  ;;  %v10571_v8 = vld [vmem:[#allocation11_spill] sm:$0xff]  ;;  %v10601_v47 = vand.u32 4294901760, %v8885_v33 }
  0x47   : > { %v765_v5 = vsub.f32 %v8932_v19, %v764_v21  ;;  %v646_v44 = vsub.f32 %v8937_v25, %v645_v2  ;;  %1098 = vmatmul.mubr.f32.gmra.mrb[6].mxu1 %v536_v23  ;;  %v653_v0 = vsub.f32 %v8978_v22, %v652_v32  ;;  %v10575_v23 = vld [vmem:[#allocation5_spill] sm:$0xff] }
  0x48   : > { %7733 = vmatpush3.bf16.msra.mxu0 %v7732_v15  ;;  %v532_v60 = vand.u32 4294901760, %v531_v63  ;;  %7857 = vmatpush3.bf16.msra.mxu1 %v8863_v11  ;;  %v538_v55 = vand.u32 4294901760, %v537_v62  ;;  %v7742_v11 = vpack.c.bf16 %v10573_v24, %v10572_v50  ;;  %v10576_v62 = vand.u32 4294901760, %v10572_v50 }
  0x49   : > { %7735 = vmatprep.subr.bf16.mxu0 %v7734_v52  ;;  %v766_v35 = vand.u32 4294901760, %v765_v5  ;;  %v647_v13 = vand.u32 4294901760, %v646_v44  ;;  %7859 = vmatprep.subr.bf16.mxu1 %v10570_v29  ;;  %v654_v40 = vand.u32 4294901760, %v653_v0  ;;  %v10574_v52 = vld [vmem:[#allocation4_spill] sm:$0xff]  ;;  %v10577_v5 = vand.u32 4294901760, %v10573_v24 }
  0x4a   : > { %533 = vmatprep.mubr.f32.mxu0 %v532_v60  ;;  %1389 = vmatprep.mubr.f32.mxu1 %v10571_v8  ;;  %v7744_v63 = vpack.c.bf16 %v10575_v23, %v10574_v52  ;;  %v10578_v60 = vand.u32 4294901760, %v10574_v52  ;;  %v10581_v0 = vand.u32 4294901760, %v8767_v30  ;;  %v10585_v50 = vand.u32 4294901760, %v8804_v46 }
  0x4b   : > { %539 = vmatmul.mubr.f32.gmra.mrb[6].mxu0 %v538_v55  ;;  %v7738_v51 = vpack.c.bf16 %v766_v35, %v759_v59  ;;  %v7740_v15 = vpack.c.bf16 %v654_v40, %v647_v13  ;;  %v9157_v44 = vpack.c.bf16 %v10577_v5, %v10576_v62  ;;  %v10579_v59 = vand.u32 4294901760, %v10575_v23  ;;  %v10587_v23 = vld [vmem:[#allocation6_spill] sm:$0xff] }
  0x4c   : > { %7737 = vmatpush3.bf16.msra.mxu0 %v7736_v16  ;;  %769 = vmatprep.mubr.f32.mxu0 %v10571_v8  ;;  %v10582_v35 = vand.u32 4294901760, %v8782_v38  ;;  %v10583_v13 = vand.u32 4294901760, %v8784_v39  ;;  %v10584_v40 = vand.u32 4294901760, %v8802_v45  ;;  %v10586_v52 = vand.u32 4294901760, %v8812_v49 }
  0x4d   : > { %7739 = vmatprep.subr.bf16.mxu0 %v7738_v51  ;;  %v9163_v16 = vpack.c.bf16 %v10579_v59, %v10578_v60  ;;  %v10580_v51 = vand.u32 4294901760, %v8763_v26  ;;  %7861 = vmatpush3.bf16.msra.mxu1 %v8898_v41  ;;  %v10588_v62 = vand.u32 4294901760, %v10587_v23  ;;  %v10589_v60 = vld [vmem:[#allocation7_spill] sm:$0xff]  ;;  %v10595_v41 = vand.u32 4294901760, %v8859_v9 }
  0x4e   : > { %v9175_v29 = vpack.c.bf16 %v10583_v13, %v10582_v35  ;;  %v9181_v24 = vpack.c.bf16 %v10585_v50, %v10584_v40  ;;  %v10590_v59 = vand.u32 4294901760, %v10589_v60  ;;  %v10592_v35 = vand.u32 4294901760, %v8844_v3 }
  0x4f   : > { %v9169_v55 = vpack.c.bf16 %v10581_v0, %v10580_v51  ;;  %v9188_v5 = vpack.c.bf16 %v10588_v62, %v10586_v52  ;;  %v10591_v51 = vand.u32 4294901760, %v8829_v61  ;;  %v10593_v13 = vand.u32 4294901760, %v8846_v4  ;;  %v10598_v52 = vld [vmem:[#allocation9_spill] sm:$0xff] }
  0x50   : > { %v10596_v50 = vand.u32 4294901760, %v8861_v10  ;;  %7863 = vmatprep.subr.bf16.mxu1 %v10598_v52  ;;  %7741 = vmatpush3.bf16.msra.mxu0 %v7740_v15  ;;  %v10599_v62 = vand.u32 4294901760, %v8865_v12  ;;  %v10607_v15 = vand.u32 4294901760, %v8909_v53  ;;  %v10608_v52 = vand.u32 4294901760, %v8911_v54 }
  0x51   : > { %v9194_v0 = vpack.c.bf16 %v10591_v51, %v10590_v59  ;;  %v9200_v40 = vpack.c.bf16 %v10593_v13, %v10592_v35  ;;  %v10600_v59 = vand.u32 4294901760, %v8881_v31  ;;  %v10602_v35 = vand.u32 4294901760, %v8887_v34  ;;  %7743 = vmatprep.subr.bf16.mxu0 %v7742_v11  ;;  %v10614_v11 = vld [vmem:[#allocation13_spill] sm:$0xff] }
  0x52   : > { %v9206_v8 = vpack.c.bf16 %v10596_v50, %v10595_v41  ;;  %v10605_v41 = vand.u32 4294901760, %v8902_v43 }
  0x53   : > { %10594 = vst [vmem:[#allocation8_spill] sm:$0xff] %v9200_v40  ;;  %v9213_v51 = vpack.c.bf16 %v10600_v59, %v10599_v62  ;;  %v9219_v13 = vpack.c.bf16 %v10602_v35, %v10601_v47  ;;  %v10604_v40 = vand.u32 4294901760, %v8900_v42  ;;  %v7746_v62 = vpack.c.bf16 %v8767_v30, %v8763_v26 }
  0x54   : > { %10597 = vst [vmem:[#allocation2_spill] sm:$0xff] %v9206_v8  ;;  %v9231_v8 = vpack.c.bf16 %v10608_v52, %v10607_v15  ;;  %v10609_v59 = vand.u32 4294901760, %v8915_v56  ;;  %v10610_v47 = vand.u32 4294901760, %v8926_v7  ;;  %v10613_v15 = vld [vmem:[#allocation12_spill] sm:$0xff]  ;;  %v7748_v26 = vpack.c.bf16 %v8784_v39, %v8782_v38 }
  0x55   : > { %10603 = vst [vmem:[#allocation3_spill] sm:$0xff] %v9219_v13  ;;  %v9225_v50 = vpack.c.bf16 %v10605_v41, %v10604_v40  ;;  %v10611_v13 = vand.u32 4294901760, %v8930_v18  ;;  %v9245_v41 = vpack.c.bf16 %v652_v32, %v645_v2  ;;  %771 = vmatmul.mubr.f32.vlgmr.msra.gmra.mrb[8].mxu0 %v10613_v15  ;;  %v7750_v30 = vpack.c.bf16 %v8804_v46, %v8802_v45  ;;  %v10615_v46 = vld [vmem:[#allocation14_spill] sm:$0xff] }
  0x56   : > { %v9239_v35 = vpack.c.bf16 %v10610_v47, %v10609_v59  ;;  %7745 = vmatpush3.bf16.msra.mxu0 %v7744_v63  ;;  %776 = vmatprep.mubr.f32.mxu0 %v9038_v1  ;;  %v7754_v2 = vpack.c.bf16 %v8829_v61, %v10589_v60  ;;  %v7756_v38 = vpack.c.bf16 %v8846_v4, %v8844_v3 }
  0x57   : > { %10606 = vst [vmem:[#allocation4_spill] sm:$0xff] %v9225_v50  ;;  %v9243_v40 = vpack.c.bf16 %v764_v21, %v10611_v13  ;;  %v10612_v50 = vld [vmem:[#allocation10_spill] sm:$0xff]  ;;  %7747 = vmatprep.subr.bf16.mxu0 %v7746_v62  ;;  %v7752_v21 = vpack.c.bf16 %v10587_v23, %v8812_v49  ;;  %v7758_v39 = vpack.c.bf16 %v8861_v10, %v8859_v9 }
  0x58   : > { %7865 = vmatpush3.bf16.msra.mxu1 %v10612_v50  ;;  %v7760_v45 = vpack.c.bf16 %v8881_v31, %v8865_v12  ;;  %v7762_v49 = vpack.c.bf16 %v8887_v34, %v8885_v33  ;;  %v7764_v61 = vpack.c.bf16 %v8902_v43, %v8900_v42  ;;  %v7766_v3 = vpack.c.bf16 %v8911_v54, %v8909_v53  ;;  %v10617_v12 = vld [vmem:[#allocation16_spill] sm:$0xff]  ;;  %v10619_v33 = vld [vmem:[#allocation11_spill] sm:$0xff]  ;;  %v1417_v53 = vld [vmem:[%s10491_s2] sm:$0xff] }
  0x59   : > { %7867 = vmatprep.subr.bf16.mxu1 %v10614_v11  ;;  %778 = vmatmul.mubr.f32.gmra.mrb[10].mxu0 %v9048_v27  ;;  %v7768_v4 = vpack.c.bf16 %v8926_v7, %v8915_v56  ;;  %v7770_v9 = vpack.c.bf16 %v8932_v19, %v8930_v18  ;;  %v7772_v10 = vpack.c.bf16 %v8978_v22, %v8937_v25  ;;  %v10616_v22 = vld [vmem:[#allocation15_spill] sm:$0xff]  ;;  %v351_v54 = vld [vmem:[%s10493_s4] sm:$0xff]  ;;  %v353_v56 = vld [vmem:[%s10493_s4 + $0x10] sm:$0xff] }
  0x5a   : > { %7749 = vmatpush3.bf16.msra.mxu0 %v7748_v26  ;;  %783 = vmatprep.mubr.f32.mxu0 %v9085_v17  ;;  %v10618_v31 = vld [vmem:[#allocation8_spill] sm:$0xff]  ;;  %v354_v25 = vld [vmem:[%s10493_s4 + $0x18] sm:$0xff] }
  0x5b   : > { %7751 = vmatprep.subr.bf16.mxu0 %v7750_v30  ;;  %v10620_v34 = vld [vmem:[#allocation2_spill] sm:$0xff] }
  0x5c   : > { %7869 = vmatpush3.bf16.msra.mxu1 %v8935_v20  ;;  %v10621_v42 = vld [vmem:[#allocation3_spill] sm:$0xff] }
  0x5d   : > { %785 = vmatmul.mubr.f32.gmra.mrb[12].mxu0 %v9087_v48  ;;  %v352_v20 = vld [vmem:[%s10493_s4 + $0x8] sm:$0xff] }
  0x5e   : > { %7753 = vmatpush3.bf16.msra.mxu0 %v7752_v21  ;;  %790 = vmatprep.mubr.f32.mxu0 %v9111_v37  ;;  %v10622_v43 = vld [vmem:[#allocation4_spill] sm:$0xff] }
  0x5f   : > { %1391 = vmatmul.mubr.f32.vlgmr.msra.gmra.mrb[8].mxu1 %v10613_v15  ;;  %7755 = vmatprep.subr.bf16.mxu0 %v7754_v2 }
  0x60   : > { %1396 = vmatprep.mubr.f32.mxu1 %v9038_v1 }
  0x61   : > { %792 = vmatmul.mubr.f32.gmra.mrb[14].mxu0 %v9120_v58 }
  0x62   : > { %7757 = vmatpush3.bf16.msra.mxu0 %v7756_v38  ;;  %927 = vmatprep.mubr.f32.mxu0 %v10615_v46 }
  0x63   : > { %1398 = vmatmul.mubr.f32.gmra.mrb[10].mxu1 %v9048_v27  ;;  %7759 = vmatprep.subr.bf16.mxu0 %v7758_v39 }
  0x64   : > { %1403 = vmatprep.mubr.f32.mxu1 %v9085_v17 }
  0x66   : > { %7761 = vmatpush3.bf16.msra.mxu0 %v7760_v45 }
  0x67   : > { %1405 = vmatmul.mubr.f32.gmra.mrb[12].mxu1 %v9087_v48  ;;  %7763 = vmatprep.subr.bf16.mxu0 %v7762_v49 }
  0x68   : > { %1410 = vmatprep.mubr.f32.mxu1 %v9111_v37 }
  0x6a   : > { %7765 = vmatpush3.bf16.msra.mxu0 %v7764_v61 }
  0x6b   : > { %1412 = vmatmul.mubr.f32.gmra.mrb[14].mxu1 %v9120_v58  ;;  %7767 = vmatprep.subr.bf16.mxu0 %v7766_v3 }
  0x6e   : > { %7769 = vmatpush3.bf16.msra.mxu0 %v7768_v4 }
  0x6f   : > { %7771 = vmatprep.subr.bf16.mxu0 %v7770_v9 }
  0x72   : > { %7773 = vmatpush3.bf16.msra.mxu0 %v7772_v10 }
  0x73   : > { %7807 = vmatprep.subr.bf16.mxu0 %v9157_v44 }
  0x75   : > { %930 = vmatmul.mubr.f32.vlgmr.msra.gmra.mrb[16].mxu0 %v8943_v6  ;;  %v10548_v6 = vmov 0  }
  0x76   : > { %7809 = vmatpush3.bf16.msra.mxu0 %v9163_v16  ;;  %936 = vmatprep.mubr.f32.mxu0 %v9055_v14 }
  0x77   : > { %7811 = vmatprep.subr.bf16.mxu0 %v9169_v55  ;;  %8519 = vset.pattern.permute.xlu0 %v10548_v6 }
  0x78   : > { %8520 = vset.pattern.permute.xlu1 %v10548_v6  ;;  %1423 = vperm.xlu0 %8519, %v351_v54  }
  0x79   : > { %939 = vmatmul.mubr.f32.gmra.mrb[18].mxu0 %v9060_v28  ;;  %1433 = vperm.xlu1 %8520, %v353_v56  }
  0x7a   : > { %7813 = vmatpush3.bf16.msra.mxu0 %v9175_v29  ;;  %945 = vmatprep.mubr.f32.mxu0 %v9091_v36 }
  0x7b   : > { %7815 = vmatprep.subr.bf16.mxu0 %v9181_v24 }
  0x7c   : > { %1428 = vperm.xlu0 %8519, %v352_v20  }
  0x7d   : > { %948 = vmatmul.mubr.f32.gmra.mrb[20].mxu0 %v10616_v22  ;;  %1438 = vperm.xlu1 %8520, %v354_v25  }
  0x7e   : > { %7817 = vmatpush3.bf16.msra.mxu0 %v9188_v5  ;;  %954 = vmatprep.mubr.f32.mxu0 %v9124_v57 }
  0x7f   : > { %7819 = vmatprep.subr.bf16.mxu0 %v9194_v0 }
  0x81   : > { %957 = vmatmul.mubr.f32.gmra.mrb[22].mxu0 %v10617_v12 }
  0x82   : > { %7821 = vmatpush3.bf16.msra.mxu0 %v10618_v31  ;;  %1264 = vmatprep.mubr.f32.mxu0 %v10619_v33 }
  0x83   : > { %7823 = vmatprep.subr.bf16.mxu0 %v10620_v34 }
  0x86   : > { %7825 = vmatpush3.bf16.msra.mxu0 %v9213_v51 }
  0x87   : > { %7827 = vmatprep.subr.bf16.mxu0 %v10621_v42 }
  0x8a   : > { %7829 = vmatpush3.bf16.msra.mxu0 %v10622_v43 }
  0x8b   : > { %7831 = vmatprep.subr.bf16.mxu0 %v9231_v8 }
  0x8e   : > { %7833 = vmatpush3.bf16.msra.mxu0 %v9239_v35 }
  0x8f   : > { %7835 = vmatprep.subr.bf16.mxu0 %v9243_v40 }
  0x92   : > { %7837 = vmatpush3.bf16.msra.mxu0 %v9245_v41 }
  0x95   : > { %1266 = vmatmul.mubr.f32.vlgmr.msra.gmra.mrb[24].mxu0 %v10613_v15 }
  0x96   : > { %1271 = vmatprep.mubr.f32.mxu0 %v9038_v1 }
  0x99   : > { %1273 = vmatmul.mubr.f32.gmra.mrb[26].mxu0 %v9048_v27 }
  0x9a   : > { %1278 = vmatprep.mubr.f32.mxu0 %v9085_v17 }
  0x9d   : > { %1280 = vmatmul.mubr.f32.gmra.mrb[28].mxu0 %v9087_v48 }
  0x9e   : > { %1285 = vmatprep.mubr.f32.mxu0 %v9111_v37 }
  0xa1   : > { %1287 = vmatmul.mubr.f32.gmra.mrb[30].mxu0 %v9120_v58 }
  0xa2   : > { %7336 = vmatprep.mubr.msk.f32.mxu0 %vm1441_vm0, %v1417_v53 }
 0x105   : > { %v6896_v7 = vpop.f32.mrb[0].mxu0 }
 0x106   : > { %v6897_v18 = vpop.f32.mrb[1].mxu0 }
 0x107   : > { %v6898_v28 = vadd.f32 %v6897_v18, %v6896_v7 }
 0x109   : > { %v7028_v19 = vpop.f32.mrb[0].mxu1 }
 0x10a   : > { %v7029_v1 = vpop.f32.mrb[1].mxu1 }
 0x10b   : > { %v7030_v27 = vadd.f32 %v7029_v1, %v7028_v19 }
 0x10f   : > { %v7031_v14 = vpop.f32.mrb[2].mxu1 }
 0x110   : > { %v7032_v36 = vpop.f32.mrb[3].mxu1 }
 0x111   : > { %v7033_v17 = vadd.f32 %v7032_v36, %v7031_v14 }
 0x112   : > { %v6899_v48 = vpop.f32.mrb[2].mxu0 }
 0x113   : > { %v6900_v37 = vpop.f32.mrb[3].mxu0 }
 0x114   : > { %v6901_v58 = vadd.f32 %v6900_v37, %v6899_v48 }
 0x115   : > { %v7034_v57 = vpop.f32.mrb[4].mxu1 }
 0x116   : > { %v7035_v32 = vpop.f32.mrb[5].mxu1 }
 0x117   : > { %v7036_v8 = vadd.f32 %v7035_v32, %v7034_v57 }
 0x119   : > { %v6902_v63 = vpop.f32.mrb[4].mxu0 }
 0x11a   : > { %v6903_v44 = vpop.f32.mrb[5].mxu0  ;;  %v7037_v16 = vpop.f32.mrb[6].mxu1 }
 0x11b   : > { %v6904_v55 = vadd.f32 %v6903_v44, %v6902_v63  ;;  %v7038_v29 = vpop.f32.mrb[7].mxu1 }
 0x11c   : > { %v7039_v24 = vadd.f32 %v7038_v29, %v7037_v16 }
 0x11e   : > { %v6905_v23 = vpop.f32.mrb[6].mxu0 }
 0x11f   : > { %v6906_v5 = vpop.f32.mrb[7].mxu0 }
 0x120   : > { %v6907_v60 = vadd.f32 %v6906_v5, %v6905_v23 }
 0x128   : > { %v6940_v0 = vpop.f32.mrb[8].mxu0 }
 0x129   : > { %v6941_v51 = vpop.f32.mrb[9].mxu0 }
 0x12a   : > { %v6942_v13 = vadd.f32 %v6941_v51, %v6940_v0 }
 0x12c   : > { %v773_v50 = vadd.f32 %v6942_v13, %v6898_v28  ;;  %v6943_v52 = vpop.f32.mrb[10].mxu0 }
 0x12d   : > { %v6944_v62 = vpop.f32.mrb[11].mxu0 }
 0x12e   : > { %v6945_v59 = vadd.f32 %v6944_v62, %v6943_v52 }
 0x130   : > { %v780_v40 = vadd.f32 %v6945_v59, %v6901_v58  ;;  %v6946_v41 = vpop.f32.mrb[12].mxu0 }
 0x131   : > { %v6947_v11 = vpop.f32.mrb[13].mxu0 }
 0x132   : > { %v7116_v47 = vpop.f32.mrb[8].mxu1  ;;  %v6948_v26 = vadd.f32 %v6947_v11, %v6946_v41  ;;  %v1564_v41 = vld [vmem:[%s10495_s6 + $0x8] sm:$0xff]  ;;  %v1566_v11 = vld [vmem:[%s10495_s6 + $0x18] sm:$0xff] }
 0x133   : > { %v7117_v35 = vpop.f32.mrb[9].mxu1 }
 0x134   : > { %v7118_v15 = vadd.f32 %v7117_v35, %v7116_v47  ;;  %v787_v2 = vadd.f32 %v6948_v26, %v6904_v55  ;;  %v6949_v38 = vpop.f32.mrb[14].mxu0  ;;  %v1418_v47 = vld [vmem:[%s10491_s2 + $0x8] sm:$0xff]  ;;  %v1419_v35 = vld [vmem:[%s10491_s2 + $0x10] sm:$0xff]  ;;  %v1591_v26 = vand.u32 4294901760, %v1564_v41 }
 0x135   : > { %v6950_v45 = vpop.f32.mrb[15].mxu0 }
 0x136   : > { %v7119_v30 = vpop.f32.mrb[10].mxu1  ;;  %v6951_v46 = vadd.f32 %v6950_v45, %v6949_v38  ;;  %v1570_v38 = vld [vmem:[%s10495_s6 + $0x38] sm:$0xff] }
 0x137   : > { %v7120_v21 = vpop.f32.mrb[11].mxu1 }
 0x138   : > { %v7121_v39 = vadd.f32 %v7120_v21, %v7119_v30  ;;  %v794_v3 = vadd.f32 %v6951_v46, %v6907_v60  ;;  %v1563_v21 = vld [vmem:[%s10495_s6] sm:$0xff] }
 0x139   : > { %v1593_v45 = vand.u32 4294901760, %v1563_v21 }
 0x13a   : > { %v7122_v49 = vpop.f32.mrb[12].mxu1 }
 0x13b   : > { %v7123_v61 = vpop.f32.mrb[13].mxu1 }
 0x13c   : > { %v7124_v4 = vadd.f32 %v7123_v61, %v7122_v49  ;;  %v2285_v49 = vand.u32 4294901760, %v1570_v38  ;;  %v1565_v61 = vld [vmem:[%s10495_s6 + $0x10] sm:$0xff] }
 0x13e   : > { %v7125_v9 = vpop.f32.mrb[14].mxu1 }
 0x13f   : > { %v7126_v10 = vpop.f32.mrb[15].mxu1 }
 0x140   : > { %v7127_v22 = vadd.f32 %v7126_v10, %v7125_v9  ;;  %v2283_v9 = vand.u32 4294901760, %v1565_v61 }
 0x148   : > { %v6984_v12 = vpop.f32.mrb[16].mxu0 }
 0x149   : > { %v6985_v31 = vpop.f32.mrb[17].mxu0 }
 0x14a   : > { %v6986_v33 = vadd.f32 %v6985_v31, %v6984_v12  ;;  %v1572_v31 = vld [vmem:[%s10495_s6 + $0x48] sm:$0xff] }
 0x14c   : > { %v932_v34 = vadd.f32 %v6986_v33, %v773_v50  ;;  %v6987_v42 = vpop.f32.mrb[18].mxu0  ;;  %v1576_v33 = vld [vmem:[%s10495_s6 + $0x68] sm:$0xff] }
 0x14d   : > { %v6988_v43 = vpop.f32.mrb[19].mxu0 }
 0x14e   : > { %v1067_v53 = vadd.f32 %v7030_v27, %v932_v34  ;;  %v6989_v54 = vadd.f32 %v6988_v43, %v6987_v42  ;;  %v1574_v34 = vld [vmem:[%s10495_s6 + $0x58] sm:$0xff]  ;;  %v9392_v42 = vsub.f32 %v1564_v41, %v1591_v26 }
 0x150   : > { %v941_v56 = vadd.f32 %v6989_v54, %v780_v40  ;;  %v6990_v7 = vpop.f32.mrb[20].mxu0  ;;  %v1420_v40 = vld [vmem:[%s10491_s2 + $0x18] sm:$0xff] }
 0x151   : > { %v6991_v18 = vpop.f32.mrb[21].mxu0 }
 0x152   : > { %v1078_v19 = vadd.f32 %v7033_v17, %v941_v56  ;;  %v6992_v20 = vadd.f32 %v6991_v18, %v6990_v7  ;;  %v1578_v56 = vld [vmem:[%s10495_s6 + $0x78] sm:$0xff]  ;;  %v1571_v7 = vld [vmem:[%s10495_s6 + $0x40] sm:$0xff] }
 0x153   : > { %v1575_v18 = vld [vmem:[%s10495_s6 + $0x60] sm:$0xff] }
 0x154   : > { %v950_v25 = vadd.f32 %v6992_v20, %v787_v2  ;;  %v6993_v28 = vpop.f32.mrb[22].mxu0  ;;  %v1567_v2 = vld [vmem:[%s10495_s6 + $0x20] sm:$0xff]  ;;  %v9413_v20 = vsub.f32 %v1570_v38, %v2285_v49 }
 0x155   : > { %v6994_v1 = vpop.f32.mrb[23].mxu0  ;;  %v1597_v46 = vand.u32 4294901760, %v1567_v2 }
 0x156   : > { %v1089_v14 = vadd.f32 %v7036_v8, %v950_v25  ;;  %v6995_v36 = vadd.f32 %v6994_v1, %v6993_v28  ;;  %v1599_v28 = vand.u32 4294901760, %v1572_v31  ;;  %v1573_v1 = vld [vmem:[%s10495_s6 + $0x50] sm:$0xff] }
 0x157   : > { %v9398_v54 = vsub.f32 %v1567_v2, %v1597_v46 }
 0x158   : > { %v959_v48 = vadd.f32 %v6995_v36, %v794_v3  ;;  %v1569_v3 = vld [vmem:[%s10495_s6 + $0x30] sm:$0xff] }
 0x159   : > { %v2287_v10 = vand.u32 4294901760, %v1569_v3 }
 0x15a   : > { %v1100_v37 = vadd.f32 %v7039_v24, %v959_v48  ;;  %v1603_v48 = vand.u32 4294901760, %v1576_v33 }
 0x15b   : > { %v9415_v25 = vpack.c.bf16 %v2287_v10, %v2283_v9  ;;  %v9422_v36 = vsub.f32 %v1569_v3, %v2287_v10 }
 0x168   : > { %v7072_v58 = vpop.f32.mrb[24].mxu0 }
 0x169   : > { %v7073_v57 = vpop.f32.mrb[25].mxu0 }
 0x16a   : > { %v7074_v32 = vadd.f32 %v7073_v57, %v7072_v58  ;;  %v9425_v58 = vsub.f32 %v1572_v31, %v1599_v28  ;;  %v2293_v57 = vand.u32 4294901760, %v1578_v56 }
 0x16c   : > { %v1268_v63 = vadd.f32 %v7074_v32, %v1067_v53  ;;  %v7075_v44 = vpop.f32.mrb[26].mxu0  ;;  %v9396_v53 = vsub.f32 %v1563_v21, %v1593_v45  ;;  %v1601_v32 = vand.u32 4294901760, %v1571_v7 }
 0x16d   : > { %v7076_v16 = vpop.f32.mrb[27].mxu0 }
 0x16e   : > { %v1393_v27 = vadd.f32 %v7118_v15, %v1268_v63  ;;  %v7077_v55 = vadd.f32 %v7076_v16, %v7075_v44  ;;  %v1568_v15 = vld [vmem:[%s10495_s6 + $0x28] sm:$0xff]  ;;  %v1605_v63 = vand.u32 4294901760, %v1575_v18  ;;  %v1577_v44 = vld [vmem:[%s10495_s6 + $0x70] sm:$0xff]  ;;  %v9430_v16 = vpack.c.bf16 %v1603_v48, %v1599_v28 }
 0x16f   : > { %v1595_v30 = vand.u32 4294901760, %v1568_v15 }
 0x170   : > { %v1275_v29 = vadd.f32 %v7077_v55, %v1078_v19  ;;  %v7078_v23 = vpop.f32.mrb[28].mxu0 }
 0x171   : > { %v7079_v5 = vpop.f32.mrb[29].mxu0  ;;  %v9394_v43 = vsub.f32 %v1568_v15, %v1595_v30 }
 0x172   : > { %v1400_v17 = vadd.f32 %v7121_v39, %v1275_v29  ;;  %v7080_v60 = vadd.f32 %v7079_v5, %v7078_v23  ;;  %v2281_v39 = vand.u32 4294901760, %v1566_v11  ;;  %v2291_v29 = vand.u32 4294901760, %v1573_v1 }
 0x173   : > { %v9438_v5 = vsub.f32 %v1578_v56, %v2293_v57  ;;  %v1734_v56 = vand.u32 4294901760, %v9425_v58 }
 0x174   : > { %v1282_v0 = vadd.f32 %v7080_v60, %v1089_v14  ;;  %v7081_v51 = vpop.f32.mrb[30].mxu0  ;;  %v7870_v13 = vpack.c.bf16 %v1400_v17, %v1393_v27  ;;  %v9380_v12 = vpack.c.bf16 %v2285_v49, %v2281_v39  ;;  %v9411_v19 = vsub.f32 %v1566_v11, %v2281_v39 }
 0x175   : > { %v7082_v8 = vpop.f32.mrb[31].mxu0  ;;  %v9420_v14 = vsub.f32 %v1565_v61, %v2283_v9  ;;  %v9432_v27 = vsub.f32 %v1576_v33, %v1603_v48  ;;  %v9440_v17 = vpack.c.bf16 %v1605_v63, %v1601_v32  ;;  %v9442_v60 = vsub.f32 %v1571_v7, %v1601_v32 }
 0x176   : > { %v1407_v50 = vadd.f32 %v7124_v4, %v1282_v0  ;;  %v7083_v52 = vadd.f32 %v7082_v8, %v7081_v51  ;;  %7871 = vmatprep.subr.bf16.mxu0 %v7870_v13  ;;  %v9376_v4 = vpack.c.bf16 %v1595_v30, %v1591_v26  ;;  %v9445_v0 = vsub.f32 %v1575_v18, %v1605_v63 }
 0x177   : > { %7873 = vmatpush3.bf16.msra.mxu0 %v7870_v13  ;;  %v2295_v51 = vand.u32 4294901760, %v1577_v44  ;;  %v9447_v13 = vsub.f32 %v1573_v1, %v2291_v29  ;;  %v2406_v11 = vand.u32 4294901760, %v9420_v14  ;;  %v2418_v26 = vand.u32 4294901760, %v9422_v36 }
 0x178   : > { %v1289_v24 = vadd.f32 %v7083_v52, %v1100_v37  ;;  %7879 = vmatprep.subr.bf16.mxu1 %v9376_v4  ;;  %v2289_v37 = vand.u32 4294901760, %v1574_v34  ;;  %v8647_v52 = vmov 0.0   ;;  %v1746_v28 = vand.u32 4294901760, %v9432_v27 }
 0x179   : > { %v9451_v8 = vpack.c.bf16 %v2295_v51, %v2291_v29  ;;  %1663 = vmatprep.mubr.f32.mxu1 %v8647_v52  ;;  %v2419_v49 = vsub.f32 %v9422_v36, %v2418_v26  ;;  %v1740_v32 = vand.u32 4294901760, %v9442_v60  ;;  %v1752_v29 = vand.u32 4294901760, %v9445_v0 }
 0x17a   : > { %v1414_v62 = vadd.f32 %v7127_v22, %v1289_v24  ;;  %v9378_v22 = vpack.c.bf16 %v1597_v46, %v1593_v45  ;;  %v9434_v55 = vsub.f32 %v1574_v34, %v2289_v37  ;;  %v9436_v23 = vpack.c.bf16 %v2293_v57, %v2289_v37 }
 0x17b   : > { %v1710_v24 = vand.u32 4294901760, %v9392_v42  ;;  %v2407_v46 = vsub.f32 %v9420_v14, %v2406_v11  ;;  %v2420_v34 = vand.u32 4294901760, %v2419_v49  ;;  %v1735_v37 = vsub.f32 %v9425_v58, %v1734_v56 }
 0x17c   : > { %v7874_v59 = vpack.c.bf16 %v1414_v62, %v1407_v50  ;;  %7881 = vmatpush1.bf16.msra.mxu1 %v9378_v22  ;;  %v9453_v50 = vsub.f32 %v1577_v44, %v2295_v51  ;;  %v1722_v62 = vand.u32 4294901760, %v9394_v43  ;;  %v2424_v1 = vand.u32 4294901760, %v9434_v55 }
 0x17d   : > { %7883 = vmatprep.subr.bf16.mxu1 %v9430_v16  ;;  %v1711_v41 = vsub.f32 %v9392_v42, %v1710_v24  ;;  %v2408_v33 = vand.u32 4294901760, %v2407_v46  ;;  %v2436_v57 = vand.u32 4294901760, %v9438_v5  ;;  %v1747_v63 = vsub.f32 %v9432_v27, %v1746_v28 }
 0x17e   : > { %7875 = vmatprep.subr.bf16.mxu0 %v7874_v59  ;;  %v1723_v15 = vsub.f32 %v9394_v43, %v1722_v62  ;;  %v2425_v44 = vsub.f32 %v9434_v55, %v2424_v1  ;;  %v2430_v51 = vand.u32 4294901760, %v9447_v13 }
 0x17f   : > { %7877 = vmatpush3.bf16.msra.mxu0 %v7874_v59  ;;  %v1716_v59 = vand.u32 4294901760, %v9396_v53  ;;  %v1712_v39 = vand.u32 4294901760, %v1711_v41  ;;  %v9491_v48 = vpack.c.bf16 %v2420_v34, %v2408_v33  ;;  %v1736_v41 = vand.u32 4294901760, %v1735_v37 }
 0x180   : > { %7927 = vmatprep.subr.bf16.mxu0 %v9380_v12  ;;  %7885 = vmatpush1.bf16.msra.mxu1 %v9440_v17  ;;  %v1724_v45 = vand.u32 4294901760, %v1723_v15  ;;  %v2437_v15 = vsub.f32 %v9438_v5, %v2436_v57  ;;  %v7894_v37 = vpack.c.bf16 %v9394_v43, %v9392_v42  ;;  %v10623_v42 = vpack.c.bf16 %v9438_v5, %v9434_v55  ;;  %v3118_v55 = vld [vmem:[%s9752_s23 + $0x30] sm:$0xff]  ;;  %v3123_v5 = vld [vmem:[%s9752_s23 + $0x58] sm:$0xff] }
 0x181   : > { %v1717_v30 = vsub.f32 %v9396_v53, %v1716_v59  ;;  %v10624_v43 = vpack.c.bf16 %v9445_v0, %v9442_v60 }
 0x182   : > { %7337 = vmatmul.mubr.msk.f32.vlgmr.msra.gmra.mrb[32].mxu0 %vm1441_vm0, %v1418_v47  ;;  %v1728_v47 = vand.u32 4294901760, %v9398_v54  ;;  %v7886_v31 = vpack.c.bf16 %v1724_v45, %v1712_v39  ;;  %v1753_v39 = vsub.f32 %v9445_v0, %v1752_v29  ;;  %v2431_v45 = vsub.f32 %v9447_v13, %v2430_v51  ;;  %v3120_v0 = vld [vmem:[%s9752_s23 + $0x40] sm:$0xff] }
 0x183   : > { %7339 = vmatprep.mubr.msk.f32.mxu0 %vm1441_vm0, %v1419_v35  ;;  %7929 = vmatpush1.bf16.msra.mxu0 %v9415_v25  ;;  %v2400_v35 = vand.u32 4294901760, %v9411_v19  ;;  %v1718_v61 = vand.u32 4294901760, %v1717_v30  ;;  %v1741_v30 = vsub.f32 %v9442_v60, %v1740_v32  ;;  %v2438_v46 = vand.u32 4294901760, %v2437_v15 }
 0x184   : > { %7931 = vmatprep.subr.bf16.mxu0 %v9436_v23  ;;  %v1729_v21 = vsub.f32 %v9398_v54, %v1728_v47  ;;  %7887 = vmatprep.subr.bf16.mxu1 %v7886_v31  ;;  %v7898_v15 = vpack.c.bf16 %v9432_v27, %v9425_v58  ;;  %v3116_v27 = vld [vmem:[%s9752_s23 + $0x20] sm:$0xff] }
 0x185   : > { %v2401_v2 = vsub.f32 %v9411_v19, %v2400_v35  ;;  %v1742_v49 = vand.u32 4294901760, %v1741_v30 }
 0x186   : > { %7340 = vmatmul.mubr.msk.f32.gmra.mrb[34].mxu0 %vm1441_vm0, %v1420_v40  ;;  %v2412_v40 = vand.u32 4294901760, %v9413_v20  ;;  %v1730_v3 = vand.u32 4294901760, %v1729_v21  ;;  %v2442_v21 = vand.u32 4294901760, %v9453_v50 }
 0x187   : > { %2353 = vmatprep.mubr.f32.mxu0 %v8647_v52  ;;  %7933 = vmatpush1.bf16.msra.mxu0 %v9451_v8  ;;  %v2402_v9 = vand.u32 4294901760, %v2401_v2  ;;  %v1748_v2 = vand.u32 4294901760, %v1747_v63  ;;  %v7896_v63 = vpack.c.bf16 %v9398_v54, %v9396_v53  ;;  %v10625_v53 = vpack.c.bf16 %v9453_v50, %v9447_v13  ;;  %v3115_v54 = vld [vmem:[%s9752_s23 + $0x18] sm:$0xff]  ;;  %v3122_v13 = vld [vmem:[%s9752_s23 + $0x50] sm:$0xff] }
 0x188   : > { %v2413_v38 = vsub.f32 %v9413_v20, %v2412_v40  ;;  %v9487_v7 = vpack.c.bf16 %v1730_v3, %v1718_v61  ;;  %v2443_v61 = vsub.f32 %v9453_v50, %v2442_v21  ;;  %v3127_v50 = vld [vmem:[%s9752_s23 + $0x78] sm:$0xff] }
 0x189   : > { %v9506_v3 = vpack.c.bf16 %v1748_v2, %v1736_v41  ;;  %v7944_v41 = vpack.c.bf16 %v9422_v36, %v9420_v14  ;;  %v3117_v14 = vld [vmem:[%s9752_s23 + $0x28] sm:$0xff]  ;;  %v3119_v36 = vld [vmem:[%s9752_s23 + $0x38] sm:$0xff] }
 0x18a   : > { %v2414_v10 = vand.u32 4294901760, %v2413_v38  ;;  %v2426_v38 = vand.u32 4294901760, %v2425_v44  ;;  %v2444_v33 = vand.u32 4294901760, %v2443_v61  ;;  %v7942_v44 = vpack.c.bf16 %v9413_v20, %v9411_v19  ;;  %v3112_v19 = vld [vmem:[%s9752_s23] sm:$0xff] }
 0x18b   : > { %v9550_v61 = vpack.c.bf16 %v1746_v28, %v1734_v56 }
 0x18c   : > { %v7934_v18 = vpack.c.bf16 %v2414_v10, %v2402_v9  ;;  %v1754_v9 = vand.u32 4294901760, %v1753_v39  ;;  %v2432_v10 = vand.u32 4294901760, %v2431_v45  ;;  %v9508_v31 = vpack.c.bf16 %v2438_v46, %v2426_v38 }
 0x18d   : > { %v9534_v39 = vpack.c.bf16 %v1722_v62, %v1710_v24  ;;  %v9540_v45 = vpack.c.bf16 %v1728_v47, %v1716_v59  ;;  %v9546_v46 = vpack.c.bf16 %v2412_v40, %v2400_v35  ;;  %v9554_v24 = vpack.c.bf16 %v1752_v29, %v1740_v32 }
 0x18e   : > { %7935 = vmatprep.subr.bf16.mxu0 %v7934_v18  ;;  %v9510_v34 = vpack.c.bf16 %v1754_v9, %v1742_v49  ;;  %v9512_v18 = vpack.c.bf16 %v2444_v33, %v2432_v10  ;;  %v9548_v49 = vpack.c.bf16 %v2418_v26, %v2406_v11  ;;  %v9552_v9 = vpack.c.bf16 %v2436_v57, %v2424_v1  ;;  %v1424_v10 = vpop.permute.xlu0 %1423  ;;  %v1434_v33 = vpop.permute.xlu1 %1433 }
 0x18f   : > { %v9556_v62 = vpack.c.bf16 %v2442_v21, %v2430_v51 }
 0x192   : > { %v1429_v59 = vpop.permute.xlu0 %1428  ;;  %v1439_v30 = vpop.permute.xlu1 %1438 }
 0x255   : > { %v7338_v47 = vpop.f32.mrb[32].mxu0 }
 0x256   : > { %v1526_v6 = vadd.f32 %v7338_v47, %v1429_v59  ;;  %v1520_v38 = vpop.f32.mrb[33].mxu0 }
 0x257   : > { %v1521_v2 = vadd.f32 %v1520_v38, %v1424_v10 }
 0x258   : > { %v6844_v35 = vmul.f32 -1.442695, %v1526_v6 }
 0x259   : > { %v6843_v40 = vmul.f32 -1.442695, %v1521_v2  ;;  %v7341_v11 = vpop.f32.mrb[34].mxu0 }
 0x25a   : > { %8530 = vpow2.f32 %v6844_v35  ;;  %v1536_v26 = vadd.f32 %v7341_v11, %v1439_v30  ;;  %v1530_v56 = vpop.f32.mrb[35].mxu0 }
 0x25b   : > { %8532 = vpow2.f32 %v6843_v40  ;;  %v1531_v28 = vadd.f32 %v1530_v56, %v1434_v33 }
 0x25c   : > { %v6846_v1 = vmul.f32 -1.442695, %v1536_v26 }
 0x25d   : > { %v6845_v57 = vmul.f32 -1.442695, %v1531_v28 }
 0x25e   : > { %8534 = vpow2.f32 %v6846_v1 }
 0x25f   : > { %8536 = vpow2.f32 %v6845_v57 }
 0x264   : > { %v8531_v32 = vpop.eup %8530 }
 0x265   : > { %v8533_v29 = vpop.eup %8532  ;;  %v1552_v51 = vadd.f32 1.0, %v8531_v32 }
 0x266   : > { %v1551_v21 = vadd.f32 1.0, %v8533_v29 }
 0x267   : > { %8538 = vrcp.f32 %v1552_v51 }
 0x268   : > { %v8535_v59 = vpop.eup %8534  ;;  %8540 = vrcp.f32 %v1551_v21 }
 0x269   : > { %v8537_v38 = vpop.eup %8536  ;;  %v1554_v6 = vadd.f32 1.0, %v8535_v59 }
 0x26a   : > { %v1553_v2 = vadd.f32 1.0, %v8537_v38 }
 0x26b   : > { %8542 = vrcp.f32 %v1554_v6 }
 0x26c   : > { %8544 = vrcp.f32 %v1553_v2 }
 0x271   : > { %v8539_v30 = vpop.eup %8538 }
 0x272   : > { %v8541_v10 = vpop.eup %8540  ;;  %v1583_v33 = vsel %vm1441_vm0, %v8539_v30, 0 }
 0x273   : > { %v1580_v47 = vsel %vm1441_vm0, %v8541_v10, 0  ;;  %v9560_v35 = vand.u32 4294901760, %v1583_v33 }
 0x274   : > { %v9562_v40 = vand.u32 4294901760, %v1580_v47 }
 0x275   : > { %v8543_v11 = vpop.eup %8542  ;;  %v9565_v26 = vsub.f32 %v1583_v33, %v9560_v35 }
 0x276   : > { %v8545_v56 = vpop.eup %8544  ;;  %v9568_v28 = vsub.f32 %v1580_v47, %v9562_v40  ;;  %v1589_v1 = vsel %vm1441_vm0, %v8543_v11, 0 }
 0x277   : > { %v1586_v57 = vsel %vm1441_vm0, %v8545_v56, 0  ;;  %v9576_v29 = vand.u32 4294901760, %v9565_v26  ;;  %v9580_v21 = vand.u32 4294901760, %v1589_v1 }
 0x278   : > { %v9573_v32 = vand.u32 4294901760, %v9568_v28  ;;  %v9578_v51 = vand.u32 4294901760, %v1586_v57 }
 0x279   : > { %v1678_v2 = vsub.f32 %v9565_v26, %v9576_v29  ;;  %v9593_v10 = vsub.f32 %v1589_v1, %v9580_v21  ;;  %v3138_v1 = vld [vmem:[%s9752_s23 + $0xd0] sm:$0xff] }
 0x27a   : > { %v1667_v59 = vsub.f32 %v9568_v28, %v9573_v32  ;;  %v9585_v38 = vsub.f32 %v1586_v57, %v9578_v51  ;;  %v3141_v57 = vld [vmem:[%s9752_s23 + $0xe8] sm:$0xff] }
 0x27b   : > { %v1679_v33 = vand.u32 4294901760, %v1678_v2  ;;  %v9602_v11 = vand.u32 4294901760, %v9593_v10 }
 0x27c   : > { %v1668_v6 = vand.u32 4294901760, %v1667_v59  ;;  %v9590_v30 = vand.u32 4294901760, %v9585_v38  ;;  %v3142_v59 = vld [vmem:[%s9752_s23 + $0xf0] sm:$0xff] }
 0x27e   : > { %1669 = vmatmul.mubr.f32.vlgmr.msra.gmra.mrb[16].mxu1 %v1668_v6  ;;  %2359 = vmatmul.mubr.f32.vlgmr.msra.gmra.mrb[36].mxu0 %v1668_v6  ;;  %v1689_v47 = vsub.f32 %v9585_v38, %v9590_v30  ;;  %v3147_v6 = vld [vmem:[%s9752_s23 + $0x118] sm:$0xff] }
 0x27f   : > { %1674 = vmatprep.mubr.f32.mxu1 %v8647_v52  ;;  %2364 = vmatprep.mubr.f32.mxu0 %v8647_v52 }
 0x280   : > { %7889 = vmatpush1.bf16.msra.mxu1 %v9487_v7  ;;  %7937 = vmatpush1.bf16.msra.mxu0 %v9491_v48  ;;  %v1690_v56 = vand.u32 4294901760, %v1689_v47  ;;  %v1700_v7 = vsub.f32 %v9593_v10, %v9602_v11  ;;  %v3149_v47 = vld [vmem:[%s9752_s23 + $0x128] sm:$0xff] }
 0x281   : > { %7891 = vmatprep.subr.bf16.mxu1 %v9506_v3  ;;  %7939 = vmatprep.subr.bf16.mxu0 %v9508_v31  ;;  %v7984_v3 = vpack.c.bf16 %v3122_v13, %v3120_v0  ;;  %v3165_v0 = vld [vmem:[%s9752_s23 + $0x1a8] sm:$0xff]  ;;  %v3167_v13 = vld [vmem:[%s9752_s23 + $0x1b8] sm:$0xff] }
 0x282   : > { %1680 = vmatmul.mubr.f32.gmra.mrb[18].mxu1 %v1679_v33  ;;  %2370 = vmatmul.mubr.f32.gmra.mrb[38].mxu0 %v1679_v33  ;;  %v1701_v48 = vand.u32 4294901760, %v1700_v7  ;;  %v3146_v33 = vld [vmem:[%s9752_s23 + $0x110] sm:$0xff] }
 0x283   : > { %1685 = vmatprep.mubr.f32.mxu1 %v8647_v52  ;;  %2375 = vmatprep.mubr.f32.mxu0 %v8647_v52 }
 0x284   : > { %7893 = vmatpush1.bf16.msra.mxu1 %v9510_v34  ;;  %7941 = vmatpush1.bf16.msra.mxu0 %v9512_v18  ;;  %v3124_v34 = vld [vmem:[%s9752_s23 + $0x60] sm:$0xff]  ;;  %v3126_v18 = vld [vmem:[%s9752_s23 + $0x70] sm:$0xff] }
 0x285   : > { %7895 = vmatprep.subr.bf16.mxu1 %v7894_v37  ;;  %7943 = vmatprep.subr.bf16.mxu0 %v7942_v44  ;;  %v3129_v37 = vld [vmem:[%s9752_s23 + $0x88] sm:$0xff]  ;;  %v7988_v44 = vpack.c.bf16 %v3126_v18, %v3124_v34  ;;  %v3171_v18 = vld [vmem:[%s9752_s23 + $0x1d8] sm:$0xff] }
 0x286   : > { %1691 = vmatmul.mubr.f32.gmra.mrb[20].mxu1 %v1690_v56  ;;  %2381 = vmatmul.mubr.f32.gmra.mrb[40].mxu0 %v1690_v56  ;;  %v3169_v34 = vld [vmem:[%s9752_s23 + $0x1c8] sm:$0xff] }
 0x287   : > { %1696 = vmatprep.mubr.f32.mxu1 %v8647_v52  ;;  %2386 = vmatprep.mubr.f32.mxu0 %v8647_v52 }
 0x28a   : > { %1702 = vmatmul.mubr.f32.gmra.mrb[22].mxu1 %v1701_v48  ;;  %2392 = vmatmul.mubr.f32.gmra.mrb[42].mxu0 %v1701_v48  ;;  %v3148_v48 = vld [vmem:[%s9752_s23 + $0x120] sm:$0xff] }
 0x28b   : > { %1812 = vmatprep.mubr.f32.mxu1 %v8647_v52  ;;  %2502 = vmatprep.mubr.f32.mxu0 %v8647_v52 }
 0x28e   : > { %1814 = vmatmul.mubr.f32.vlgmr.msra.gmra.mrb[16].mxu1 %v9562_v40  ;;  %2504 = vmatmul.mubr.f32.vlgmr.msra.gmra.mrb[36].mxu0 %v9562_v40 }
 0x28f   : > { %1819 = vmatprep.mubr.f32.mxu1 %v8647_v52  ;;  %2509 = vmatprep.mubr.f32.mxu0 %v8647_v52 }
 0x290   : > { %7897 = vmatpush1.bf16.msra.mxu1 %v7896_v63  ;;  %7945 = vmatpush1.bf16.msra.mxu0 %v7944_v41  ;;  %v3131_v63 = vld [vmem:[%s9752_s23 + $0x98] sm:$0xff] }
 0x291   : > { %7899 = vmatprep.subr.bf16.mxu1 %v7898_v15  ;;  %7947 = vmatprep.subr.bf16.mxu0 %v10623_v42  ;;  %v7990_v41 = vpack.c.bf16 %v3131_v63, %v3129_v37  ;;  %v3128_v15 = vld [vmem:[%s9752_s23 + $0x80] sm:$0xff]  ;;  %v3150_v42 = vld [vmem:[%s9752_s23 + $0x130] sm:$0xff]  ;;  %v8030_v63 = vpack.c.bf16 %v3171_v18, %v3169_v34  ;;  %v8623_v18 = vld [vmem:[%s8873_s9 + $0x28] sm:$0xff] }
 0x292   : > { %1821 = vmatmul.mubr.f32.gmra.mrb[18].mxu1 %v9560_v35  ;;  %2511 = vmatmul.mubr.f32.gmra.mrb[38].mxu0 %v9560_v35 }
 0x293   : > { %1826 = vmatprep.mubr.f32.mxu1 %v8647_v52  ;;  %2516 = vmatprep.mubr.f32.mxu0 %v8647_v52 }
 0x294   : > { %7901 = vmatpush1.bf16.msra.mxu1 %v10624_v43  ;;  %7949 = vmatpush1.bf16.msra.mxu0 %v10625_v53  ;;  %v3153_v43 = vld [vmem:[%s9752_s23 + $0x148] sm:$0xff]  ;;  %v3155_v53 = vld [vmem:[%s9752_s23 + $0x158] sm:$0xff] }
 0x295   : > { %7903 = vmatprep.subr.bf16.mxu1 %v9376_v4  ;;  %7951 = vmatprep.subr.bf16.mxu0 %v9380_v12 }
 0x296   : > { %1828 = vmatmul.mubr.f32.gmra.mrb[20].mxu1 %v9578_v51  ;;  %2518 = vmatmul.mubr.f32.gmra.mrb[40].mxu0 %v9578_v51 }
 0x297   : > { %1833 = vmatprep.mubr.f32.mxu1 %v8647_v52  ;;  %2523 = vmatprep.mubr.f32.mxu0 %v8647_v52 }
 0x29a   : > { %1835 = vmatmul.mubr.f32.gmra.mrb[22].mxu1 %v9580_v21  ;;  %2525 = vmatmul.mubr.f32.gmra.mrb[42].mxu0 %v9580_v21 }
 0x29b   : > { %1921 = vmatprep.mubr.f32.mxu1 %v8647_v52  ;;  %2611 = vmatprep.mubr.f32.mxu0 %v8647_v52 }
 0x29e   : > { %1924 = vmatmul.mubr.f32.vlgmr.msra.gmra.mrb[16].mxu1 %v9568_v28  ;;  %2614 = vmatmul.mubr.f32.vlgmr.msra.gmra.mrb[36].mxu0 %v9568_v28  ;;  %v3136_v28 = vld [vmem:[%s9752_s23 + $0xc0] sm:$0xff] }
 0x29f   : > { %1929 = vmatprep.mubr.f32.mxu1 %v8647_v52  ;;  %2619 = vmatprep.mubr.f32.mxu0 %v8647_v52 }
 0x2a0   : > { %7905 = vmatpush1.bf16.msra.mxu1 %v9378_v22  ;;  %7953 = vmatpush1.bf16.msra.mxu0 %v9415_v25 }
 0x2a1   : > { %7907 = vmatprep.subr.bf16.mxu1 %v9430_v16  ;;  %7955 = vmatprep.subr.bf16.mxu0 %v9436_v23 }
 0x2a2   : > { %1932 = vmatmul.mubr.f32.gmra.mrb[18].mxu1 %v9565_v26  ;;  %2622 = vmatmul.mubr.f32.gmra.mrb[38].mxu0 %v9565_v26 }
 0x2a3   : > { %1937 = vmatprep.mubr.f32.mxu1 %v8647_v52  ;;  %2627 = vmatprep.mubr.f32.mxu0 %v8647_v52 }
 0x2a4   : > { %7909 = vmatpush1.bf16.msra.mxu1 %v9440_v17  ;;  %7957 = vmatpush1.bf16.msra.mxu0 %v9451_v8 }
 0x2a5   : > { %7911 = vmatprep.subr.bf16.mxu1 %v9534_v39  ;;  %7959 = vmatprep.subr.bf16.mxu0 %v9546_v46  ;;  %v3130_v39 = vld [vmem:[%s9752_s23 + $0x90] sm:$0xff]  ;;  %v3135_v46 = vld [vmem:[%s9752_s23 + $0xb8] sm:$0xff] }
 0x2a6   : > { %1940 = vmatmul.mubr.f32.gmra.mrb[20].mxu1 %v9585_v38  ;;  %2630 = vmatmul.mubr.f32.gmra.mrb[40].mxu0 %v9585_v38  ;;  %v3145_v38 = vld [vmem:[%s9752_s23 + $0x108] sm:$0xff] }
 0x2a7   : > { %1945 = vmatprep.mubr.f32.mxu1 %v8647_v52  ;;  %2635 = vmatprep.mubr.f32.mxu0 %v8647_v52 }
 0x2aa   : > { %1948 = vmatmul.mubr.f32.gmra.mrb[22].mxu1 %v9593_v10  ;;  %2638 = vmatmul.mubr.f32.gmra.mrb[42].mxu0 %v9593_v10  ;;  %v3144_v10 = vld [vmem:[%s9752_s23 + $0x100] sm:$0xff] }
 0x2ab   : > { %2026 = vmatprep.mubr.f32.mxu1 %v8647_v52  ;;  %2716 = vmatprep.mubr.f32.mxu0 %v8647_v52  ;;  %v8008_v56 = vpack.c.bf16 %v3146_v33, %v3144_v10  ;;  %v3110_v10 = vld [vmem:[%s10492_s3 + $0x50] sm:$0xff]  ;;  %v3109_v33 = vld [vmem:[%s10492_s3 + $0x48] sm:$0xff] }
 0x2ae   : > { %2030 = vmatmul.mubr.f32.vlgmr.msra.gmra.mrb[16].mxu1 %v9573_v32  ;;  %2720 = vmatmul.mubr.f32.vlgmr.msra.gmra.mrb[36].mxu0 %v9573_v32  ;;  %v3143_v32 = vld [vmem:[%s9752_s23 + $0xf8] sm:$0xff] }
 0x2af   : > { %2035 = vmatprep.mubr.f32.mxu1 %v8647_v52  ;;  %2725 = vmatprep.mubr.f32.mxu0 %v8647_v52 }
 0x2b0   : > { %7913 = vmatpush1.bf16.msra.mxu1 %v9540_v45  ;;  %7961 = vmatpush1.bf16.msra.mxu0 %v9548_v49  ;;  %v3133_v45 = vld [vmem:[%s9752_s23 + $0xa8] sm:$0xff]  ;;  %v7992_v49 = vpack.c.bf16 %v3130_v39, %v3128_v15  ;;  %v3175_v39 = vld [vmem:[%s9752_s23 + $0x1f8] sm:$0xff] }
 0x2b1   : > { %7915 = vmatprep.subr.bf16.mxu1 %v9550_v61  ;;  %7963 = vmatprep.subr.bf16.mxu0 %v9552_v9  ;;  %v7994_v61 = vpack.c.bf16 %v3135_v46, %v3133_v45  ;;  %v3132_v9 = vld [vmem:[%s9752_s23 + $0xa0] sm:$0xff]  ;;  %v3173_v15 = vld [vmem:[%s9752_s23 + $0x1e8] sm:$0xff] }
 0x2b2   : > { %2039 = vmatmul.mubr.f32.gmra.mrb[18].mxu1 %v9576_v29  ;;  %2729 = vmatmul.mubr.f32.gmra.mrb[38].mxu0 %v9576_v29  ;;  %v8000_v29 = vpack.c.bf16 %v3138_v1, %v3136_v28  ;;  %v8034_v46 = vpack.c.bf16 %v3175_v39, %v3173_v15  ;;  %v3181_v28 = vld [vmem:[%s9752_s23 + $0x228] sm:$0xff]  ;;  %v3183_v1 = vld [vmem:[%s9752_s23 + $0x238] sm:$0xff] }
 0x2b3   : > { %2044 = vmatprep.mubr.f32.mxu1 %v8647_v52  ;;  %2734 = vmatprep.mubr.f32.mxu0 %v8647_v52 }
 0x2b4   : > { %7917 = vmatpush1.bf16.msra.mxu1 %v9554_v24  ;;  %7965 = vmatpush1.bf16.msra.mxu0 %v9556_v62  ;;  %v3134_v24 = vld [vmem:[%s9752_s23 + $0xb0] sm:$0xff]  ;;  %v3137_v62 = vld [vmem:[%s9752_s23 + $0xc8] sm:$0xff] }
 0x2b5   : > { %7919 = vmatprep.subr.bf16.mxu1 %v9376_v4  ;;  %7967 = vmatprep.subr.bf16.mxu0 %v9380_v12  ;;  %v3101_v4 = vld [vmem:[%s10492_s3 + $0x8] sm:$0xff] }
 0x2b6   : > { %2048 = vmatmul.mubr.f32.gmra.mrb[20].mxu1 %v9590_v30  ;;  %2738 = vmatmul.mubr.f32.gmra.mrb[40].mxu0 %v9590_v30  ;;  %v3113_v12 = vld [vmem:[%s9752_s23 + $0x8] sm:$0xff]  ;;  %v8006_v30 = vpack.c.bf16 %v3147_v6, %v3145_v38  ;;  %v3103_v38 = vld [vmem:[%s10492_s3 + $0x18] sm:$0xff] }
 0x2b7   : > { %2053 = vmatprep.mubr.f32.mxu1 %v8647_v52  ;;  %2743 = vmatprep.mubr.f32.mxu0 %v8647_v52  ;;  %v7974_v20 = vpack.c.bf16 %v3115_v54, %v3113_v12  ;;  %v8014_v12 = vpack.c.bf16 %v3155_v53, %v3153_v43  ;;  %v3152_v54 = vld [vmem:[%s9752_s23 + $0x140] sm:$0xff] }
 0x2b8   : > { %v8618_v43 = vld [vmem:[%s8873_s9] sm:$0xff] }
 0x2ba   : > { %2057 = vmatmul.mubr.f32.gmra.mrb[22].mxu1 %v9602_v11  ;;  %2747 = vmatmul.mubr.f32.gmra.mrb[42].mxu0 %v9602_v11  ;;  %v3151_v11 = vld [vmem:[%s9752_s23 + $0x138] sm:$0xff] }
 0x2bb   : > { %2151 = vmatprep.mubr.f32.mxu1 %v8647_v52  ;;  %2841 = vmatprep.mubr.f32.mxu0 %v8647_v52  ;;  %v8010_v7 = vpack.c.bf16 %v3151_v11, %v3149_v47  ;;  %v3102_v47 = vld [vmem:[%s10492_s3 + $0x10] sm:$0xff]  ;;  %v3105_v11 = vld [vmem:[%s10492_s3 + $0x28] sm:$0xff] }
 0x2be   : > { %2153 = vmatmul.mubr.f32.vlgmr.msra.gmra.mrb[16].mxu1 %v9562_v40  ;;  %2843 = vmatmul.mubr.f32.vlgmr.msra.gmra.mrb[36].mxu0 %v9562_v40 }
 0x2bf   : > { %2158 = vmatprep.mubr.f32.mxu1 %v8647_v52  ;;  %2848 = vmatprep.mubr.f32.mxu0 %v8647_v52 }
 0x2c0   : > { %7921 = vmatpush1.bf16.msra.mxu1 %v9378_v22  ;;  %7969 = vmatpush1.bf16.msra.mxu0 %v9415_v25  ;;  %v8648_v22 = vmov 2   ;;  %v3114_v25 = vld [vmem:[%s9752_s23 + $0x10] sm:$0xff] }
 0x2c1   : > { %7923 = vmatprep.subr.bf16.mxu1 %v9430_v16  ;;  %7971 = vmatprep.subr.bf16.mxu0 %v9436_v23  ;;  %v7976_v58 = vpack.c.bf16 %v3114_v25, %v3112_v19  ;;  %v7978_v16 = vpack.c.bf16 %v3119_v36, %v3117_v14  ;;  %v3121_v23 = vld [vmem:[%s9752_s23 + $0x48] sm:$0xff]  ;;  %v3154_v19 = vld [vmem:[%s9752_s23 + $0x150] sm:$0xff]  ;;  %v3159_v25 = vld [vmem:[%s9752_s23 + $0x178] sm:$0xff] }
 0x2c2   : > { %2160 = vmatmul.mubr.f32.gmra.mrb[18].mxu1 %v9560_v35  ;;  %2850 = vmatmul.mubr.f32.gmra.mrb[38].mxu0 %v9560_v35  ;;  %v7982_v60 = vpack.c.bf16 %v3123_v5, %v3121_v23  ;;  %v8016_v14 = vpack.c.bf16 %v3154_v19, %v3152_v54  ;;  %v8619_v54 = vld [vmem:[%s8873_s9 + $0x8] sm:$0xff] }
 0x2c3   : > { %2165 = vmatprep.mubr.f32.mxu1 %v8647_v52  ;;  %2855 = vmatprep.mubr.f32.mxu0 %v8647_v52 }
 0x2c4   : > { %7925 = vmatpush1.bf16.msra.mxu1 %v9440_v17  ;;  %7973 = vmatpush1.bf16.msra.mxu0 %v9451_v8  ;;  %v7980_v17 = vpack.c.bf16 %v3118_v55, %v3116_v27  ;;  %v3125_v8 = vld [vmem:[%s9752_s23 + $0x68] sm:$0xff]  ;;  %v3163_v55 = vld [vmem:[%s9752_s23 + $0x198] sm:$0xff] }
 0x2c5   : > { %8521 = vset.pattern.permute.xlu1 %v8648_v22  ;;  %8522 = vset.pattern.permute.xlu0 %v8648_v22  ;;  %v7986_v31 = vpack.c.bf16 %v3127_v50, %v3125_v8  ;;  %v3161_v27 = vld [vmem:[%s9752_s23 + $0x188] sm:$0xff]  ;;  %v8026_v50 = vpack.c.bf16 %v3167_v13, %v3165_v0 }
 0x2c6   : > { %2167 = vmatmul.mubr.f32.gmra.mrb[20].mxu1 %v9578_v51  ;;  %2857 = vmatmul.mubr.f32.gmra.mrb[40].mxu0 %v9578_v51  ;;  %v8022_v5 = vpack.c.bf16 %v3163_v55, %v3161_v27 }
 0x2c7   : > { %2172 = vmatprep.mubr.f32.mxu1 %v8647_v52  ;;  %2862 = vmatprep.mubr.f32.mxu0 %v8647_v52 }
 0x2c8   : > { %7975 = vmatprep.subr.bf16.mxu1 %v7974_v20  ;;  %v3157_v20 = vld [vmem:[%s9752_s23 + $0x168] sm:$0xff] }
 0x2c9   : > { %v8018_v36 = vpack.c.bf16 %v3159_v25, %v3157_v20 }
 0x2ca   : > { %2174 = vmatmul.mubr.f32.gmra.mrb[22].mxu1 %v9580_v21  ;;  %2864 = vmatmul.mubr.f32.gmra.mrb[42].mxu0 %v9580_v21 }
 0x2cb   : > { %2252 = vmatprep.mubr.f32.mxu1 %v8647_v52  ;;  %2942 = vmatprep.mubr.f32.mxu0 %v8647_v52 }
 0x2ce   : > { %2254 = vmatmul.mubr.f32.vlgmr.msra.gmra.mrb[16].mxu1 %v9562_v40  ;;  %2944 = vmatmul.mubr.f32.vlgmr.msra.gmra.mrb[36].mxu0 %v9562_v40  ;;  %v7996_v40 = vpack.c.bf16 %v3134_v24, %v3132_v9  ;;  %v3177_v9 = vld [vmem:[%s9752_s23 + $0x208] sm:$0xff]  ;;  %v3179_v24 = vld [vmem:[%s9752_s23 + $0x218] sm:$0xff] }
 0x2cf   : > { %2259 = vmatprep.mubr.f32.mxu1 %v8647_v52  ;;  %2949 = vmatprep.mubr.f32.mxu0 %v8647_v52 }
 0x2d0   : > { %7977 = vmatpush1.bf16.msra.mxu1 %v7976_v58  ;;  %v3156_v58 = vld [vmem:[%s9752_s23 + $0x160] sm:$0xff] }
 0x2d1   : > { %7979 = vmatprep.subr.bf16.mxu1 %v7978_v16  ;;  %v3158_v16 = vld [vmem:[%s9752_s23 + $0x170] sm:$0xff] }
 0x2d2   : > { %2261 = vmatmul.mubr.f32.gmra.mrb[18].mxu1 %v9560_v35  ;;  %2951 = vmatmul.mubr.f32.gmra.mrb[38].mxu0 %v9560_v35  ;;  %v3139_v35 = vld [vmem:[%s9752_s23 + $0xd8] sm:$0xff]  ;;  %v8020_v23 = vpack.c.bf16 %v3158_v16, %v3156_v58  ;;  %v8620_v58 = vld [vmem:[%s8873_s9 + $0x10] sm:$0xff] }
 0x2d3   : > { %2266 = vmatprep.mubr.f32.mxu1 %v8647_v52  ;;  %2956 = vmatprep.mubr.f32.mxu0 %v8647_v52  ;;  %v7998_v26 = vpack.c.bf16 %v3139_v35, %v3137_v62  ;;  %v8038_v35 = vpack.c.bf16 %v3179_v24, %v3177_v9  ;;  %v8625_v9 = vld [vmem:[%s8873_s9 + $0x38] sm:$0xff] }
 0x2d4   : > { %7981 = vmatpush1.bf16.msra.mxu1 %v7980_v17  ;;  %v3160_v17 = vld [vmem:[%s9752_s23 + $0x180] sm:$0xff] }
 0x2d5   : > { %7983 = vmatprep.subr.bf16.mxu1 %v7982_v60  ;;  %v3162_v60 = vld [vmem:[%s9752_s23 + $0x190] sm:$0xff] }
 0x2d6   : > { %2268 = vmatmul.mubr.f32.gmra.mrb[20].mxu1 %v9578_v51  ;;  %2958 = vmatmul.mubr.f32.gmra.mrb[40].mxu0 %v9578_v51  ;;  %v8002_v51 = vpack.c.bf16 %v3143_v32, %v3141_v57  ;;  %v8024_v8 = vpack.c.bf16 %v3162_v60, %v3160_v17  ;;  %v3100_v57 = vld [vmem:[%s10492_s3] sm:$0xff] }
 0x2d7   : > { %2273 = vmatprep.mubr.f32.mxu1 %v8647_v52  ;;  %2963 = vmatprep.mubr.f32.mxu0 %v8647_v52 }
 0x2d8   : > { %7985 = vmatpush1.bf16.msra.mxu1 %v7984_v3  ;;  %v3164_v3 = vld [vmem:[%s9752_s23 + $0x1a0] sm:$0xff] }
 0x2d9   : > { %7987 = vmatprep.subr.bf16.mxu1 %v7986_v31  ;;  %v3166_v31 = vld [vmem:[%s9752_s23 + $0x1b0] sm:$0xff] }
 0x2da   : > { %2275 = vmatmul.mubr.f32.gmra.mrb[22].mxu1 %v9580_v21  ;;  %2965 = vmatmul.mubr.f32.gmra.mrb[42].mxu0 %v9580_v21  ;;  %v3140_v21 = vld [vmem:[%s9752_s23 + $0xe0] sm:$0xff]  ;;  %v8028_v37 = vpack.c.bf16 %v3166_v31, %v3164_v3 }
 0x2db   : > { %3276 = vmatprep.mubr.f32.mxu1 %v3101_v4  ;;  %v8004_v2 = vpack.c.bf16 %v3142_v59, %v3140_v21  ;;  %v8012_v4 = vpack.c.bf16 %v3150_v42, %v3148_v48  ;;  %v3180_v21 = vld [vmem:[%s9752_s23 + $0x220] sm:$0xff]  ;;  %v3182_v59 = vld [vmem:[%s9752_s23 + $0x230] sm:$0xff] }
 0x2dc   : > { %7989 = vmatpush1.bf16.msra.mxu1 %v7988_v44  ;;  %v3168_v44 = vld [vmem:[%s9752_s23 + $0x1c0] sm:$0xff]  ;;  %v8044_v6 = vpack.c.bf16 %v3182_v59, %v3180_v21 }
 0x2dd   : > { %7991 = vmatprep.subr.bf16.mxu1 %v7990_v41  ;;  %v3170_v41 = vld [vmem:[%s9752_s23 + $0x1d0] sm:$0xff] }
 0x2de   : > { %v8032_v45 = vpack.c.bf16 %v3170_v41, %v3168_v44 }
 0x2e0   : > { %7993 = vmatpush1.bf16.msra.mxu1 %v7992_v49  ;;  %v3172_v49 = vld [vmem:[%s9752_s23 + $0x1e0] sm:$0xff] }
 0x2e1   : > { %7995 = vmatprep.subr.bf16.mxu1 %v7994_v61  ;;  %v3174_v61 = vld [vmem:[%s9752_s23 + $0x1f0] sm:$0xff] }
 0x2e2   : > { %v8036_v62 = vpack.c.bf16 %v3174_v61, %v3172_v49 }
 0x2e4   : > { %7997 = vmatpush1.bf16.msra.mxu1 %v7996_v40  ;;  %v3176_v40 = vld [vmem:[%s9752_s23 + $0x200] sm:$0xff] }
 0x2e5   : > { %7999 = vmatprep.subr.bf16.mxu1 %v7998_v26  ;;  %v3178_v26 = vld [vmem:[%s9752_s23 + $0x210] sm:$0xff] }
 0x2e6   : > { %v8040_v32 = vpack.c.bf16 %v3178_v26, %v3176_v40 }
 0x2e8   : > { %8001 = vmatpush1.bf16.msra.mxu1 %v8000_v29  ;;  %v3104_v29 = vld [vmem:[%s10492_s3 + $0x20] sm:$0xff] }
 0x2e9   : > { %8003 = vmatprep.subr.bf16.mxu1 %v8002_v51  ;;  %v8042_v51 = vpack.c.bf16 %v3183_v1, %v3181_v28  ;;  %v8626_v28 = vld [vmem:[%s10493_s4] sm:$0xff]  ;;  %v8649_v1 = vmov 3  }
 0x2ec   : > { %8005 = vmatpush1.bf16.msra.mxu1 %v8004_v2  ;;  %v3107_v2 = vld [vmem:[%s10492_s3 + $0x38] sm:$0xff] }
 0x2ed   : > { %8007 = vmatprep.subr.bf16.mxu1 %v8006_v30  ;;  %v3106_v30 = vld [vmem:[%s10492_s3 + $0x30] sm:$0xff] }
 0x2f0   : > { %8009 = vmatpush1.bf16.msra.mxu1 %v8008_v56  ;;  %v3108_v56 = vld [vmem:[%s10492_s3 + $0x40] sm:$0xff] }
 0x2f1   : > { %8011 = vmatprep.subr.bf16.mxu1 %v8010_v7  ;;  %v3111_v7 = vld [vmem:[%s10492_s3 + $0x58] sm:$0xff] }
 0x2f4   : > { %8013 = vmatpush1.bf16.msra.mxu1 %v8012_v4 }
 0x2f5   : > { %8015 = vmatprep.subr.bf16.mxu1 %v8014_v12 }
 0x2f8   : > { %8017 = vmatpush1.bf16.msra.mxu1 %v8016_v14 }
 0x2f9   : > { %8019 = vmatprep.subr.bf16.mxu1 %v8018_v36 }
 0x2fc   : > { %8021 = vmatpush1.bf16.msra.mxu1 %v8020_v23  ;;  %v8621_v23 = vld [vmem:[%s8873_s9 + $0x18] sm:$0xff] }
 0x2fd   : > { %8023 = vmatprep.subr.bf16.mxu1 %v8022_v5 }
 0x300   : > { %8025 = vmatpush1.bf16.msra.mxu1 %v8024_v8 }
 0x301   : > { %8027 = vmatprep.subr.bf16.mxu1 %v8026_v50  ;;  %v8622_v50 = vld [vmem:[%s8873_s9 + $0x20] sm:$0xff] }
 0x304   : > { %8029 = vmatpush1.bf16.msra.mxu1 %v8028_v37 }
 0x305   : > { %8031 = vmatprep.subr.bf16.mxu1 %v8030_v63 }
 0x308   : > { %8033 = vmatpush1.bf16.msra.mxu1 %v8032_v45  ;;  %v8624_v45 = vld [vmem:[%s8873_s9 + $0x30] sm:$0xff] }
 0x309   : > { %8035 = vmatprep.subr.bf16.mxu1 %v8034_v46 }
 0x30c   : > { %8037 = vmatpush1.bf16.msra.mxu1 %v8036_v62 }
 0x30d   : > { %8039 = vmatprep.subr.bf16.mxu1 %v8038_v35 }
 0x30f   : > { %3277 = vmatmul.mubr.f32.vlgmr.msra.gmra.mrb[24].mxu1 %v3100_v57 }
 0x310   : > { %3282 = vmatprep.mubr.f32.mxu1 %v3104_v29  ;;  %8041 = vmatpush1.bf16.msra.mxu1 %v8040_v32 }
 0x311   : > { %8043 = vmatprep.subr.bf16.mxu1 %v8042_v51 }
 0x313   : > { %3283 = vmatmul.mubr.f32.gmra.mrb[26].mxu1 %v3103_v38 }
 0x314   : > { %3288 = vmatprep.mubr.f32.mxu1 %v3107_v2  ;;  %8045 = vmatpush1.bf16.msra.mxu1 %v8044_v6 }
 0x317   : > { %3289 = vmatmul.mubr.f32.gmra.mrb[28].mxu1 %v3106_v30 }
 0x318   : > { %3294 = vmatprep.mubr.f32.mxu1 %v3110_v10 }
 0x31b   : > { %3295 = vmatmul.mubr.f32.gmra.mrb[30].mxu1 %v3109_v33 }
 0x31c   : > { %3365 = vmatprep.mubr.f32.mxu1 %v8647_v52 }
 0x31f   : > { %6847 = vmatmul.mubr.msk.f32.vlgmr.msra.gmra.mrb[24].mxu1 %vm1441_vm0, %v3102_v47 }
 0x320   : > { %3371 = vmatprep.mubr.f32.mxu1 %v8647_v52 }
 0x323   : > { %6848 = vmatmul.mubr.msk.f32.gmra.mrb[26].mxu1 %vm1441_vm0, %v3105_v11 }
 0x324   : > { %3377 = vmatprep.mubr.f32.mxu1 %v8647_v52 }
 0x327   : > { %6849 = vmatmul.mubr.msk.f32.gmra.mrb[28].mxu1 %vm1441_vm0, %v3108_v56 }
 0x328   : > { %3383 = vmatprep.mubr.f32.mxu1 %v8647_v52 }
 0x32b   : > { %6850 = vmatmul.mubr.msk.f32.gmra.mrb[30].mxu1 %vm1441_vm0, %v3111_v7 }
 0x3a1   : > { %v2255_v48 = vpop.f32.mrb[16].mxu1  ;;  %v2945_v42 = vpop.f32.mrb[36].mxu0 }
 0x3a2   : > { %v2971_v53 = vmul.f32 %v8618_v43, %v2255_v48  ;;  %v2257_v4 = vpop.f32.mrb[17].mxu1  ;;  %v2947_v12 = vpop.f32.mrb[37].mxu0 }
 0x3a3   : > { %v2972_v19 = vmul.f32 %v8619_v54, %v2257_v4 }
 0x3a4   : > { %v2979_v20 = vmul.f32 %v2971_v53, %v2945_v42 }
 0x3a5   : > { %v2980_v25 = vmul.f32 %v2972_v19, %v2947_v12  ;;  %v2262_v14 = vpop.f32.mrb[18].mxu1  ;;  %v2952_v36 = vpop.f32.mrb[38].mxu0 }
 0x3a6   : > { %v2973_v16 = vmul.f32 %v8620_v58, %v2262_v14  ;;  %v2264_v27 = vpop.f32.mrb[19].mxu1  ;;  %v2954_v55 = vpop.f32.mrb[39].mxu0  ;;  %v8627_v58 = vld [vmem:[%s10493_s4 + $0x8] sm:$0xff] }
 0x3a7   : > { %v2974_v5 = vmul.f32 %v8621_v23, %v2264_v27  ;;  %v2987_v17 = vadd.f32 %v2980_v25, %v2979_v20  ;;  %v8629_v27 = vld [vmem:[%s10493_s4 + $0x18] sm:$0xff]  ;;  %v10626_v23 = vmov 0  }
 0x3a8   : > { %v2981_v60 = vmul.f32 %v2973_v16, %v2952_v36  ;;  %v8628_v16 = vld [vmem:[%s10493_s4 + $0x10] sm:$0xff] }
 0x3a9   : > { %v2982_v0 = vmul.f32 %v2974_v5, %v2954_v55  ;;  %v2959_v13 = vpop.f32.mrb[40].mxu0  ;;  %2988 = vadd.xlane.f32.xlu0 %v2987_v17  ;;  %v2269_v8 = vpop.f32.mrb[20].mxu1  ;;  %v8650_v55 = vmov 1  }
 0x3aa   : > { %v2975_v3 = vmul.f32 %v8622_v50, %v2269_v8  ;;  %v2271_v31 = vpop.f32.mrb[21].mxu1  ;;  %v2961_v34 = vpop.f32.mrb[41].mxu0 }
 0x3ab   : > { %v2976_v37 = vmul.f32 %v8623_v18, %v2271_v31  ;;  %v2990_v63 = vadd.f32 %v2982_v0, %v2981_v60 }
 0x3ac   : > { %v2983_v44 = vmul.f32 %v2975_v3, %v2959_v13 }
 0x3ad   : > { %v2984_v41 = vmul.f32 %v2976_v37, %v2961_v34  ;;  %v2966_v15 = vpop.f32.mrb[42].mxu0  ;;  %2991 = vadd.xlane.f32.xlu1 %v2990_v63  ;;  %v2276_v39 = vpop.f32.mrb[22].mxu1 }
 0x3ae   : > { %v2977_v46 = vmul.f32 %v8624_v45, %v2276_v39  ;;  %v2278_v49 = vpop.f32.mrb[23].mxu1  ;;  %v2968_v61 = vpop.f32.mrb[43].mxu0 }
 0x3af   : > { %v2978_v24 = vmul.f32 %v8625_v9, %v2278_v49  ;;  %v2993_v62 = vadd.f32 %v2984_v41, %v2983_v44 }
 0x3b0   : > { %v2985_v35 = vmul.f32 %v2977_v46, %v2966_v15 }
 0x3b1   : > { %v2986_v40 = vmul.f32 %v2978_v24, %v2968_v61  ;;  %2994 = vadd.xlane.f32.xlu0 %v2993_v62 }
 0x3b3   : > { %v2996_v26 = vadd.f32 %v2986_v40, %v2985_v35 }
 0x3b5   : > { %2997 = vadd.xlane.f32.xlu0 %v2996_v26 }
 0x3be   : > { %3053 = vperm.xlu1 %8521, %v8626_v28  }
 0x3c2   : > { %8523 = vset.pattern.permute.xlu1 %v8649_v1 }
 0x436   : > { %v2989_v57 = vpop.xlane.xlu0 %2988 }
 0x437   : > { %v3000_v32 = vmul.f32 0.00390625, %v2989_v57 }
 0x439   : > { %v9878_v29 = vsub.f32 %v2979_v20, %v3000_v32  ;;  %v9880_v51 = vsub.f32 %v2980_v25, %v3000_v32 }
 0x43a   : > { %v2992_v21 = vpop.xlane.xlu1 %2991 }
 0x43b   : > { %v3001_v59 = vmul.f32 0.00390625, %v2992_v21  ;;  %v3012_v38 = vmul.f32 %v9878_v29, %v9878_v29  ;;  %v3013_v6 = vmul.f32 %v9880_v51, %v9880_v51 }
 0x43d   : > { %v9886_v2 = vsub.f32 %v2981_v60, %v3001_v59  ;;  %v9888_v30 = vsub.f32 %v2982_v0, %v3001_v59  ;;  %v3020_v10 = vadd.f32 %v3013_v6, %v3012_v38 }
 0x43e   : > { %v2995_v33 = vpop.xlane.xlu0 %2994  ;;  %v3054_v3 = vpop.permute.xlu1 %3053 }
 0x43f   : > { %v3002_v47 = vmul.f32 0.00390625, %v2995_v33  ;;  %3021 = vadd.xlane.f32.xlu1 %v3020_v10  ;;  %v3014_v11 = vmul.f32 %v9886_v2, %v9886_v2  ;;  %v3015_v56 = vmul.f32 %v9888_v30, %v9888_v30 }
 0x441   : > { %v9894_v7 = vsub.f32 %v2983_v44, %v3002_v47  ;;  %v9896_v48 = vsub.f32 %v2984_v41, %v3002_v47  ;;  %v3023_v42 = vadd.f32 %v3015_v56, %v3014_v11 }
 0x442   : > { %v2998_v43 = vpop.xlane.xlu0 %2997 }
 0x443   : > { %v3003_v53 = vmul.f32 0.00390625, %v2998_v43  ;;  %3024 = vadd.xlane.f32.xlu0 %v3023_v42  ;;  %v3016_v4 = vmul.f32 %v9894_v7, %v9894_v7  ;;  %v3017_v12 = vmul.f32 %v9896_v48, %v9896_v48 }
 0x445   : > { %v9902_v54 = vsub.f32 %v2985_v35, %v3003_v53  ;;  %v9904_v19 = vsub.f32 %v2986_v40, %v3003_v53  ;;  %v3026_v20 = vadd.f32 %v3017_v12, %v3016_v4 }
 0x447   : > { %3027 = vadd.xlane.f32.xlu1 %v3026_v20  ;;  %v3018_v25 = vmul.f32 %v9902_v54, %v9902_v54  ;;  %v3019_v14 = vmul.f32 %v9904_v19, %v9904_v19 }
 0x449   : > { %v3029_v36 = vadd.f32 %v3019_v14, %v3018_v25 }
 0x44b   : > { %3030 = vadd.xlane.f32.xlu0 %v3029_v36 }
 0x458   : > { %3077 = vperm.xlu1 %8523, %v8626_v28  }
 0x45c   : > { %3081 = vperm.xlu1 %8523, %v8627_v58  }
 0x460   : > { %8524 = vset.pattern.permute.xlu1 %v8648_v22  ;;  %v9921_v22 = vpop.f32.mrb[24].mxu1 }
 0x461   : > { %3061 = vperm.xlu1 %8524, %v8628_v16   ;;  %3057 = vperm.xlu0 %8522, %v8627_v58   ;;  %v9923_v5 = vpop.f32.mrb[25].mxu1 }
 0x462   : > { %v9925_v17 = vpop.f32.mrb[26].mxu1 }
 0x463   : > { %v9927_v60 = vpop.f32.mrb[27].mxu1 }
 0x464   : > { %v9929_v0 = vpop.f32.mrb[28].mxu1 }
 0x465   : > { %3065 = vperm.xlu1 %8524, %v8629_v27   ;;  %8527 = vset.pattern.permute.xlu0 %v8650_v55  ;;  %v9931_v13 = vpop.f32.mrb[29].mxu1 }
 0x466   : > { %3193 = vperm.xlu0 %8527, %v8628_v16   ;;  %v9933_v8 = vpop.f32.mrb[30].mxu1 }
 0x467   : > { %v9935_v50 = vpop.f32.mrb[31].mxu1 }
 0x469   : > { %8525 = vset.pattern.permute.xlu1 %v8649_v1 }
 0x46a   : > { %3085 = vperm.xlu1 %8525, %v8628_v16   ;;  %8528 = vset.pattern.permute.xlu0 %v10626_v23 }
 0x46e   : > { %3089 = vperm.xlu1 %8525, %v8629_v27  }
 0x472   : > { %8526 = vset.pattern.permute.xlu1 %v8650_v55 }
 0x473   : > { %3185 = vperm.xlu1 %8526, %v8626_v28  }
 0x477   : > { %3189 = vperm.xlu1 %8526, %v8627_v58  }
 0x47b   : > { %3197 = vperm.xlu1 %8526, %v8629_v27  }
 0x47f   : > { %8529 = vset.pattern.permute.xlu1 %v10626_v23 }
 0x4cc   : > { %v3022_v31 = vpop.xlane.xlu1 %3021 }
 0x4cd   : > { %v3032_v34 = vmul.f32 0.00390625, %v3022_v31 }
 0x4cf   : > { %v3036_v18 = vadd.f32 1e-05, %v3032_v34 }
 0x4d0   : > { %v3025_v37 = vpop.xlane.xlu0 %3024 }
 0x4d1   : > { %8546 = vrsqrt.f32 %v3036_v18  ;;  %v3033_v63 = vmul.f32 0.00390625, %v3025_v37 }
 0x4d3   : > { %v3037_v44 = vadd.f32 1e-05, %v3033_v63 }
 0x4d4   : > { %v3028_v41 = vpop.xlane.xlu1 %3027 }
 0x4d5   : > { %8548 = vrsqrt.f32 %v3037_v44  ;;  %v3034_v15 = vmul.f32 0.00390625, %v3028_v41 }
 0x4d7   : > { %v3038_v39 = vadd.f32 1e-05, %v3034_v15 }
 0x4d8   : > { %v3078_v45 = vpop.permute.xlu1 %3077  ;;  %v3031_v46 = vpop.xlane.xlu0 %3030 }
 0x4d9   : > { %8550 = vrsqrt.f32 %v3038_v39  ;;  %v3035_v49 = vmul.f32 0.00390625, %v3031_v46 }
 0x4db   : > { %v8547_v61 = vpop.eup %8546  ;;  %v3039_v9 = vadd.f32 1e-05, %v3035_v49  ;;  %v348_v49 = vld [vmem:[%s10496_s7 + $0x8] sm:$0xff] }
 0x4dc   : > { %v3044_v24 = vmul.f32 %v8547_v61, %v9878_v29  ;;  %v3045_v62 = vmul.f32 %v8547_v61, %v9880_v51  ;;  %v3082_v35 = vpop.permute.xlu1 %3081 }
 0x4dd   : > { %8552 = vrsqrt.f32 %v3039_v9  ;;  %v349_v9 = vld [vmem:[%s10496_s7 + $0x10] sm:$0xff] }
 0x4de   : > { %v3068_v40 = vmul.f32 %v3054_v3, %v3044_v24  ;;  %v3069_v26 = vmul.f32 %v3054_v3, %v3045_v62  ;;  %v3426_v62 = vsel %vm1441_vm0, %v348_v49, 0 }
 0x4df   : > { %v8549_v28 = vpop.eup %8548 }
 0x4e0   : > { %v9940_v1 = vadd.f32 %v3078_v45, %v3068_v40  ;;  %v9942_v57 = vadd.f32 %v3078_v45, %v3069_v26  ;;  %v3062_v32 = vpop.permute.xlu1 %3061  ;;  %v3046_v21 = vmul.f32 %v8549_v28, %v9886_v2  ;;  %v3047_v59 = vmul.f32 %v8549_v28, %v9888_v30  ;;  %v3058_v38 = vpop.permute.xlu0 %3057  ;;  %v350_v26 = vld [vmem:[%s10496_s7 + $0x18] sm:$0xff] }
 0x4e1   : > { %v3429_v40 = vsel %vm1441_vm0, %v349_v9, 0 }
 0x4e2   : > { %v3070_v6 = vmul.f32 %v3058_v38, %v3046_v21  ;;  %v3071_v10 = vmul.f32 %v3058_v38, %v3047_v59  ;;  %v3390_v29 = vadd.f32 %v9942_v57, %v9940_v1  ;;  %v10038_v59 = vand.u32 4294901760, %v3429_v40 }
 0x4e3   : > { %v8551_v51 = vpop.eup %8550  ;;  %v3432_v38 = vsel %vm1441_vm0, %v350_v26, 0 }
 0x4e4   : > { %v3048_v33 = vmul.f32 %v8551_v51, %v9894_v7  ;;  %v3049_v47 = vmul.f32 %v8551_v51, %v9896_v48  ;;  %3391 = vadd.xlane.f32.xlu1 %v3390_v29  ;;  %v3066_v11 = vpop.permute.xlu1 %3065  ;;  %v9950_v56 = vadd.f32 %v3082_v35, %v3070_v6  ;;  %v9952_v42 = vadd.f32 %v3082_v35, %v3071_v10 }
 0x4e6   : > { %v3393_v2 = vadd.f32 %v9952_v42, %v9950_v56  ;;  %v3072_v43 = vmul.f32 %v3062_v32, %v3048_v33  ;;  %v3073_v53 = vmul.f32 %v3062_v32, %v3049_v47  ;;  %v10034_v32 = vand.u32 4294901760, %v3426_v62 }
 0x4e7   : > { %v8553_v30 = vpop.eup %8552  ;;  %v10053_v47 = vand.u32 4294901760, %v3432_v38 }
 0x4e8   : > { %v3050_v4 = vmul.f32 %v8553_v30, %v9902_v54  ;;  %v3051_v12 = vmul.f32 %v8553_v30, %v9904_v19  ;;  %3394 = vadd.xlane.f32.xlu0 %v3393_v2  ;;  %v3194_v19 = vpop.permute.xlu0 %3193  ;;  %v10046_v29 = vsub.f32 %v3426_v62, %v10034_v32  ;;  %v10056_v2 = vsub.f32 %v3429_v40, %v10038_v59 }
 0x4e9   : > { %v3086_v7 = vpop.permute.xlu1 %3085  ;;  %v9977_v31 = vadd.f32 %v9929_v0, %v3194_v19  ;;  %v9980_v34 = vadd.f32 %v9931_v13, %v3194_v19 }
 0x4ea   : > { %v9958_v20 = vadd.f32 %v3086_v7, %v3072_v43  ;;  %v9960_v48 = vadd.f32 %v3086_v7, %v3073_v53  ;;  %v3074_v25 = vmul.f32 %v3066_v11, %v3050_v4  ;;  %v3075_v14 = vmul.f32 %v3066_v11, %v3051_v12 }
 0x4eb   : > { %v10065_v4 = vand.u32 4294901760, %v10046_v29 }
 0x4ec   : > { %v3396_v36 = vadd.f32 %v9960_v48, %v9958_v20 }
 0x4ed   : > { %v3090_v58 = vpop.permute.xlu1 %3089 }
 0x4ee   : > { %v9964_v16 = vadd.f32 %v3090_v58, %v3074_v25  ;;  %v9966_v27 = vadd.f32 %v3090_v58, %v3075_v14  ;;  %3397 = vadd.xlane.f32.xlu0 %v3396_v36  ;;  %v10070_v25 = vsub.f32 %v3432_v38, %v10053_v47  ;;  %v10073_v36 = vand.u32 4294901760, %v10056_v2 }
 0x4f0   : > { %v3399_v54 = vadd.f32 %v9966_v27, %v9964_v16 }
 0x4f2   : > { %3400 = vadd.xlane.f32.xlu1 %v3399_v54  ;;  %v3186_v55 = vpop.permute.xlu1 %3185 }
 0x4f3   : > { %v9971_v23 = vadd.f32 %v9921_v22, %v3186_v55  ;;  %v9974_v3 = vadd.f32 %v9923_v5, %v3186_v55  ;;  %v3412_v22 = vadd.f32 %v9980_v34, %v9977_v31  ;;  %v3516_v55 = vsub.f32 %v10046_v29, %v10065_v4 }
 0x4f5   : > { %v3406_v18 = vadd.f32 %v9974_v3, %v9971_v23 }
 0x4f6   : > { %v3190_v37 = vpop.permute.xlu1 %3189 }
 0x4f7   : > { %v9985_v63 = vadd.f32 %v9925_v17, %v3190_v37  ;;  %v9988_v44 = vadd.f32 %v9927_v60, %v3190_v37  ;;  %3407 = vadd.xlane.f32.xlu0 %v3406_v18  ;;  %v347_v60 = vld [vmem:[%s10496_s7] sm:$0xff] }
 0x4f8   : > { %v3423_v15 = vsel %vm1441_vm0, %v347_v60, 0 }
 0x4f9   : > { %v3409_v5 = vadd.f32 %v9988_v44, %v9985_v63  ;;  %v10006_v39 = vand.u32 4294901760, %v3423_v15 }
 0x4fa   : > { %v3198_v0 = vpop.permute.xlu1 %3197 }
 0x4fb   : > { %3410 = vadd.xlane.f32.xlu1 %v3409_v5  ;;  %v9995_v13 = vadd.f32 %v9933_v8, %v3198_v0  ;;  %v9998_v41 = vadd.f32 %v9935_v50, %v3198_v0  ;;  %3413 = vadd.xlane.f32.xlu0 %v3412_v22  ;;  %v10009_v45 = vsub.f32 %v3423_v15, %v10006_v39  ;;  %v10085_v22 = vand.u32 4294901760, %v10070_v25 }
 0x4fc   : > { %v3526_v0 = vsub.f32 %v10056_v2, %v10073_v36 }
 0x4fd   : > { %v3415_v17 = vadd.f32 %v9998_v41, %v9995_v13  ;;  %v10012_v8 = vand.u32 4294901760, %v10009_v45 }
 0x4ff   : > { %3416 = vadd.xlane.f32.xlu1 %v3415_v17  ;;  %v3506_v50 = vsub.f32 %v10009_v45, %v10012_v8 }
 0x501   : > { %v10016_v46 = vand.u32 4294901760, %v3506_v50  ;;  %v10093_v50 = vand.u32 4294901760, %v3516_v55 }
 0x503   : > { %7350 = vmatprep.mubr.f32.mxu0 %v10016_v46  ;;  %7518 = vmatprep.mubr.f32.mxu1 %v10016_v46 }
 0x571   : > { %v3392_v61 = vpop.xlane.xlu1 %3391 }
 0x572   : > { %v10026_v24 = vmul.f32 0.00390625, %v3392_v61  ;;  %v3536_v61 = vsub.f32 %v10070_v25, %v10085_v22 }
 0x574   : > { %v3435_v35 = vand.u32 4294901760, %v10026_v24  ;;  %v10103_v26 = vand.u32 4294901760, %v3536_v61 }
 0x575   : > { %v3395_v28 = vpop.xlane.xlu0 %3394 }
 0x576   : > { %v10036_v21 = vmul.f32 0.00390625, %v3395_v28  ;;  %v10042_v6 = vsub.f32 %v10026_v24, %v3435_v35 }
 0x578   : > { %v3438_v10 = vand.u32 4294901760, %v10036_v21  ;;  %v3546_v43 = vand.u32 4294901760, %v10042_v6 }
 0x57a   : > { %v10048_v51 = vpack.c.bf16 %v3438_v10, %v3435_v35  ;;  %v10051_v33 = vsub.f32 %v10036_v21, %v3438_v10  ;;  %v3547_v19 = vsub.f32 %v10042_v6, %v3546_v43  ;;  %v10100_v35 = vand.u32 4294901760, %v3526_v0 }
 0x57b   : > { %v3398_v11 = vpop.xlane.xlu0 %3397 }
 0x57c   : > { %v10058_v30 = vmul.f32 0.00390625, %v3398_v11  ;;  %8047 = vmatprep.subr.bf16.mxu0 %v10048_v51  ;;  %v3553_v53 = vand.u32 4294901760, %v10051_v33  ;;  %v3548_v15 = vand.u32 4294901760, %v3547_v19  ;;  %v8062_v11 = vpack.c.bf16 %v10051_v33, %v10042_v6 }
 0x57d   : > { %8049 = vmatpush3.bf16.msra.mxu0 %v10048_v51 }
 0x57e   : > { %v3441_v12 = vand.u32 4294901760, %v10058_v30  ;;  %v3554_v7 = vsub.f32 %v10051_v33, %v3553_v53 }
 0x57f   : > { %v3401_v14 = vpop.xlane.xlu1 %3400 }
 0x580   : > { %v10076_v58 = vsub.f32 %v10058_v30, %v3441_v12  ;;  %v10078_v54 = vmul.f32 0.00390625, %v3401_v14  ;;  %v3555_v37 = vand.u32 4294901760, %v3554_v7 }
 0x582   : > { %v3444_v18 = vand.u32 4294901760, %v10078_v54  ;;  %v3560_v5 = vand.u32 4294901760, %v10076_v58  ;;  %v8054_v49 = vpack.c.bf16 %v3555_v37, %v3548_v15 }
 0x584   : > { %v10090_v17 = vpack.c.bf16 %v3444_v18, %v3441_v12  ;;  %v3566_v60 = vsub.f32 %v10078_v54, %v3444_v18  ;;  %v3561_v9 = vsub.f32 %v10076_v58, %v3560_v5  ;;  %v3408_v6 = vpop.xlane.xlu0 %3407 }
 0x585   : > { %v10120_v7 = vmul.f32 0.00390625, %v3408_v6 }
 0x586   : > { %8051 = vmatprep.subr.bf16.mxu0 %v10090_v17  ;;  %v3567_v62 = vand.u32 4294901760, %v3566_v60  ;;  %v3562_v28 = vand.u32 4294901760, %v3561_v9  ;;  %v8066_v12 = vpack.c.bf16 %v3566_v60, %v10076_v58  ;;  %v8078_v58 = vpack.c.bf16 %v3553_v53, %v3546_v43 }
 0x587   : > { %8053 = vmatpush3.bf16.msra.mxu0 %v10090_v17  ;;  %v4053_v18 = vand.u32 4294901760, %v10120_v7 }
 0x588   : > { %8055 = vmatprep.subr.bf16.mxu0 %v8054_v49  ;;  %v3568_v40 = vsub.f32 %v3566_v60, %v3567_v62  ;;  %v3411_v33 = vpop.xlane.xlu1 %3410  ;;  %v3414_v55 = vpop.xlane.xlu0 %3413  ;;  %v8082_v15 = vpack.c.bf16 %v3567_v62, %v3560_v5 }
 0x589   : > { %v10122_v14 = vmul.f32 0.00390625, %v3411_v33  ;;  %v10131_v60 = vmul.f32 0.00390625, %v3414_v55  ;;  %v10136_v43 = vsub.f32 %v10120_v7, %v4053_v18 }
 0x58a   : > { %7351 = vmatmul.mubr.f32.vlgmr.msra.gmra.mrb[44].mxu0 %v10093_v50  ;;  %v3569_v38 = vand.u32 4294901760, %v3568_v40 }
 0x58b   : > { %8057 = vmatpush3.bf16.msra.mxu0 %v8054_v49  ;;  %7353 = vmatprep.mubr.f32.mxu0 %v10100_v35  ;;  %v4056_v37 = vand.u32 4294901760, %v10122_v14  ;;  %v4059_v61 = vand.u32 4294901760, %v10131_v60  ;;  %v4164_v5 = vand.u32 4294901760, %v10136_v43 }
 0x58c   : > { %v8058_v10 = vpack.c.bf16 %v3569_v38, %v3562_v28  ;;  %v3417_v19 = vpop.xlane.xlu1 %3416 }
 0x58d   : > { %v10129_v0 = vmul.f32 0.00390625, %v3417_v19  ;;  %v10139_v53 = vsub.f32 %v10122_v14, %v4056_v37  ;;  %v4177_v62 = vsub.f32 %v10131_v60, %v4059_v61  ;;  %v4165_v28 = vsub.f32 %v10136_v43, %v4164_v5 }
 0x58e   : > { %7354 = vmatmul.mubr.f32.gmra.mrb[46].mxu0 %v10103_v26  ;;  %8059 = vmatprep.subr.bf16.mxu0 %v8058_v10  ;;  %v8094_v38 = vpack.c.bf16 %v4056_v37, %v4053_v18 }
 0x58f   : > { %8061 = vmatpush3.bf16.msra.mxu0 %v8058_v10  ;;  %7364 = vmatprep.mubr.f32.mxu0 %v10006_v39  ;;  %v4062_v49 = vand.u32 4294901760, %v10129_v0  ;;  %v4171_v40 = vand.u32 4294901760, %v10139_v53  ;;  %v4166_v6 = vand.u32 4294901760, %v4165_v28 }
 0x590   : > { %8063 = vmatprep.subr.bf16.mxu0 %v8062_v11 }
 0x591   : > { %v4184_v9 = vsub.f32 %v10129_v0, %v4062_v49  ;;  %v4172_v10 = vsub.f32 %v10139_v53, %v4171_v40 }
 0x592   : > { %7365 = vmatmul.mubr.f32.vlgmr.msra.gmra.mrb[44].mxu0 %v10034_v32 }
 0x593   : > { %8065 = vmatpush3.bf16.msra.mxu0 %v8062_v11  ;;  %7367 = vmatprep.mubr.f32.mxu0 %v10038_v59  ;;  %v4178_v11 = vand.u32 4294901760, %v4177_v62  ;;  %v4173_v33 = vand.u32 4294901760, %v4172_v10 }
 0x594   : > { %8067 = vmatprep.subr.bf16.mxu0 %v8066_v12 }
 0x595   : > { %v8102_v55 = vpack.c.bf16 %v4173_v33, %v4166_v6 }
 0x596   : > { %7368 = vmatmul.mubr.f32.gmra.mrb[46].mxu0 %v10053_v47 }
 0x597   : > { %8069 = vmatpush3.bf16.msra.mxu0 %v8066_v12  ;;  %7378 = vmatprep.mubr.f32.mxu0 %v10009_v45  ;;  %v4185_v12 = vand.u32 4294901760, %v4184_v9 }
 0x598   : > { %8071 = vmatprep.subr.bf16.mxu0 %v10048_v51 }
 0x599   : > { %v4186_v19 = vsub.f32 %v4184_v9, %v4185_v12 }
 0x59a   : > { %7379 = vmatmul.mubr.f32.vlgmr.msra.gmra.mrb[44].mxu0 %v10046_v29 }
 0x59b   : > { %8073 = vmatpush3.bf16.msra.mxu0 %v10048_v51  ;;  %7381 = vmatprep.mubr.f32.mxu0 %v10056_v2  ;;  %v4187_v37 = vand.u32 4294901760, %v4186_v19 }
 0x59c   : > { %8075 = vmatprep.subr.bf16.mxu0 %v10090_v17 }
 0x59e   : > { %7382 = vmatmul.mubr.f32.gmra.mrb[46].mxu0 %v10070_v25 }
 0x59f   : > { %8077 = vmatpush3.bf16.msra.mxu0 %v10090_v17  ;;  %7392 = vmatprep.mubr.f32.mxu0 %v10012_v8 }
 0x5a0   : > { %8079 = vmatprep.subr.bf16.mxu0 %v8078_v58 }
 0x5a2   : > { %7393 = vmatmul.mubr.f32.vlgmr.msra.gmra.mrb[44].mxu0 %v10065_v4 }
 0x5a3   : > { %8081 = vmatpush3.bf16.msra.mxu0 %v8078_v58  ;;  %7395 = vmatprep.mubr.f32.mxu0 %v10073_v36  ;;  %v4179_v58 = vsub.f32 %v4177_v62, %v4178_v11 }
 0x5a4   : > { %8083 = vmatprep.subr.bf16.mxu0 %v8082_v15 }
 0x5a5   : > { %v4180_v18 = vand.u32 4294901760, %v4179_v58 }
 0x5a6   : > { %7396 = vmatmul.mubr.f32.gmra.mrb[46].mxu0 %v10085_v22 }
 0x5a7   : > { %8085 = vmatpush3.bf16.msra.mxu0 %v8082_v15  ;;  %7406 = vmatprep.mubr.f32.mxu0 %v10006_v39  ;;  %v8110_v15 = vpack.c.bf16 %v10139_v53, %v10136_v43  ;;  %v8126_v43 = vpack.c.bf16 %v4171_v40, %v4164_v5  ;;  %v8130_v53 = vpack.c.bf16 %v4185_v12, %v4178_v11 }
 0x5a8   : > { %8087 = vmatprep.subr.bf16.mxu0 %v10048_v51 }
 0x5aa   : > { %7407 = vmatmul.mubr.f32.vlgmr.msra.gmra.mrb[44].mxu0 %v10034_v32 }
 0x5ab   : > { %8089 = vmatpush3.bf16.msra.mxu0 %v10048_v51  ;;  %7409 = vmatprep.mubr.f32.mxu0 %v10038_v59  ;;  %v8098_v51 = vpack.c.bf16 %v4062_v49, %v4059_v61  ;;  %v8114_v49 = vpack.c.bf16 %v4184_v9, %v4177_v62 }
 0x5ac   : > { %8091 = vmatprep.subr.bf16.mxu0 %v10090_v17 }
 0x5ae   : > { %7410 = vmatmul.mubr.f32.gmra.mrb[46].mxu0 %v10053_v47 }
 0x5af   : > { %8093 = vmatpush3.bf16.msra.mxu0 %v10090_v17  ;;  %7420 = vmatprep.mubr.f32.mxu0 %v10006_v39  ;;  %v8106_v17 = vpack.c.bf16 %v4187_v37, %v4180_v18 }
 0x5b0   : > { %8095 = vmatprep.subr.bf16.mxu0 %v8094_v38 }
 0x5b2   : > { %7421 = vmatmul.mubr.f32.vlgmr.msra.gmra.mrb[44].mxu0 %v10034_v32 }
 0x5b3   : > { %8097 = vmatpush3.bf16.msra.mxu0 %v8094_v38  ;;  %7423 = vmatprep.mubr.f32.mxu0 %v10038_v59 }
 0x5b4   : > { %8099 = vmatprep.subr.bf16.mxu0 %v8098_v51 }
 0x5b6   : > { %7424 = vmatmul.mubr.f32.gmra.mrb[46].mxu0 %v10053_v47 }
 0x5b7   : > { %8101 = vmatpush3.bf16.msra.mxu0 %v8098_v51  ;;  %7434 = vmatprep.mubr.f32.mxu0 %v10016_v46 }
 0x5b8   : > { %8103 = vmatprep.subr.bf16.mxu0 %v8102_v55 }
 0x5ba   : > { %7435 = vmatmul.mubr.f32.vlgmr.msra.gmra.mrb[48].mxu0 %v10093_v50 }
 0x5bb   : > { %8105 = vmatpush3.bf16.msra.mxu0 %v8102_v55  ;;  %7437 = vmatprep.mubr.f32.mxu0 %v10100_v35 }
 0x5bc   : > { %8107 = vmatprep.subr.bf16.mxu0 %v8106_v17 }
 0x5be   : > { %7438 = vmatmul.mubr.f32.gmra.mrb[50].mxu0 %v10103_v26 }
 0x5bf   : > { %8109 = vmatpush3.bf16.msra.mxu0 %v8106_v17  ;;  %7448 = vmatprep.mubr.f32.mxu0 %v10006_v39 }
 0x5c0   : > { %8111 = vmatprep.subr.bf16.mxu0 %v8110_v15 }
 0x5c2   : > { %7449 = vmatmul.mubr.f32.vlgmr.msra.gmra.mrb[48].mxu0 %v10034_v32 }
 0x5c3   : > { %8113 = vmatpush3.bf16.msra.mxu0 %v8110_v15  ;;  %7451 = vmatprep.mubr.f32.mxu0 %v10038_v59 }
 0x5c4   : > { %8115 = vmatprep.subr.bf16.mxu0 %v8114_v49 }
 0x5c6   : > { %7452 = vmatmul.mubr.f32.gmra.mrb[50].mxu0 %v10053_v47 }
 0x5c7   : > { %8117 = vmatpush3.bf16.msra.mxu0 %v8114_v49  ;;  %7462 = vmatprep.mubr.f32.mxu0 %v10009_v45 }
 0x5c8   : > { %8119 = vmatprep.subr.bf16.mxu0 %v8094_v38 }
 0x5ca   : > { %7463 = vmatmul.mubr.f32.vlgmr.msra.gmra.mrb[48].mxu0 %v10046_v29 }
 0x5cb   : > { %8121 = vmatpush3.bf16.msra.mxu0 %v8094_v38  ;;  %7465 = vmatprep.mubr.f32.mxu0 %v10056_v2 }
 0x5cc   : > { %8123 = vmatprep.subr.bf16.mxu0 %v8098_v51 }
 0x5ce   : > { %7466 = vmatmul.mubr.f32.gmra.mrb[50].mxu0 %v10070_v25 }
 0x5cf   : > { %8125 = vmatpush3.bf16.msra.mxu0 %v8098_v51  ;;  %7476 = vmatprep.mubr.f32.mxu0 %v10012_v8 }
 0x5d0   : > { %8127 = vmatprep.subr.bf16.mxu0 %v8126_v43 }
 0x5d2   : > { %7477 = vmatmul.mubr.f32.vlgmr.msra.gmra.mrb[48].mxu0 %v10065_v4 }
 0x5d3   : > { %8129 = vmatpush3.bf16.msra.mxu0 %v8126_v43  ;;  %7479 = vmatprep.mubr.f32.mxu0 %v10073_v36 }
 0x5d4   : > { %8131 = vmatprep.subr.bf16.mxu0 %v8130_v53 }
 0x5d6   : > { %7480 = vmatmul.mubr.f32.gmra.mrb[50].mxu0 %v10085_v22 }
 0x5d7   : > { %8133 = vmatpush3.bf16.msra.mxu0 %v8130_v53  ;;  %7490 = vmatprep.mubr.f32.mxu0 %v10006_v39 }
 0x5d8   : > { %8135 = vmatprep.subr.bf16.mxu0 %v8094_v38 }
 0x5da   : > { %7491 = vmatmul.mubr.f32.vlgmr.msra.gmra.mrb[48].mxu0 %v10034_v32 }
 0x5db   : > { %8137 = vmatpush3.bf16.msra.mxu0 %v8094_v38  ;;  %7493 = vmatprep.mubr.f32.mxu0 %v10038_v59 }
 0x5dc   : > { %8139 = vmatprep.subr.bf16.mxu0 %v8098_v51 }
 0x5de   : > { %7494 = vmatmul.mubr.f32.gmra.mrb[50].mxu0 %v10053_v47 }
 0x5df   : > { %8141 = vmatpush3.bf16.msra.mxu0 %v8098_v51  ;;  %7504 = vmatprep.mubr.f32.mxu0 %v10006_v39 }
 0x5e2   : > { %7505 = vmatmul.mubr.f32.vlgmr.msra.gmra.mrb[48].mxu0 %v10034_v32 }
 0x5e3   : > { %7507 = vmatprep.mubr.f32.mxu0 %v10038_v59 }
 0x5e6   : > { %7508 = vmatmul.mubr.f32.gmra.mrb[50].mxu0 %v10053_v47 }
 0x5e7   : > { %7602 = vmatprep.mubr.f32.mxu0 %v10016_v46 }
 0x685   : > { %v7422_v61 = vpop.f32.mrb[44].mxu0 }
 0x686   : > { %v4049_v5 = vmul.f32 0.25, %v7422_v61  ;;  %v4026_v9 = vpop.f32.mrb[45].mxu0 }
 0x687   : > { %v4048_v62 = vmul.f32 0.25, %v4026_v9 }
 0x688   : > { %v4671_v40 = vsub.f32 %v10036_v21, %v4049_v5 }
 0x689   : > { %v4670_v28 = vsub.f32 %v10026_v24, %v4048_v62  ;;  %v7425_v38 = vpop.f32.mrb[46].mxu0 }
 0x68a   : > { %v4676_v10 = vmul.f32 1.442695, %v4671_v40  ;;  %v4051_v11 = vmul.f32 0.25, %v7425_v38  ;;  %v4038_v12 = vpop.f32.mrb[47].mxu0 }
 0x68b   : > { %v4674_v6 = vmul.f32 1.442695, %v4670_v28  ;;  %v4050_v51 = vmul.f32 0.25, %v4038_v12 }
 0x68c   : > { %8554 = vpow2.f32 %v4676_v10  ;;  %v4673_v33 = vsub.f32 %v10078_v54, %v4051_v11 }
 0x68d   : > { %8556 = vpow2.f32 %v4674_v6  ;;  %v4672_v58 = vsub.f32 %v10058_v30, %v4050_v51 }
 0x68e   : > { %v4680_v19 = vmul.f32 1.442695, %v4673_v33 }
 0x68f   : > { %v4678_v55 = vmul.f32 1.442695, %v4672_v58 }
 0x690   : > { %8558 = vpow2.f32 %v4680_v19 }
 0x691   : > { %8560 = vpow2.f32 %v4678_v55 }
 0x696   : > { %v10193_v18 = vpop.eup %8554 }
 0x697   : > { %v10195_v21 = vpop.eup %8556  ;;  %v4698_v24 = vand.u32 4294901760, %v10193_v18 }
 0x698   : > { %v4695_v37 = vand.u32 4294901760, %v10195_v21 }
 0x699   : > { %v4812_v17 = vsub.f32 %v10193_v18, %v4698_v24 }
 0x69a   : > { %v10200_v15 = vpop.eup %8558  ;;  %v10202_v54 = vpack.c.bf16 %v4698_v24, %v4695_v37  ;;  %v4805_v30 = vsub.f32 %v10195_v21, %v4695_v37 }
 0x69b   : > { %v10205_v49 = vpop.eup %8560  ;;  %v4704_v43 = vand.u32 4294901760, %v10200_v15  ;;  %v4813_v53 = vand.u32 4294901760, %v4812_v17 }
 0x69c   : > { %8143 = vmatprep.subr.bf16.mxu1 %v10202_v54  ;;  %v4701_v61 = vand.u32 4294901760, %v10205_v49  ;;  %v4806_v5 = vand.u32 4294901760, %v4805_v30  ;;  %v8158_v37 = vpack.c.bf16 %v4812_v17, %v4805_v30 }
 0x69d   : > { %8145 = vmatpush3.bf16.msra.mxu1 %v10202_v54  ;;  %v4814_v9 = vsub.f32 %v4812_v17, %v4813_v53  ;;  %v4826_v62 = vsub.f32 %v10200_v15, %v4704_v43 }
 0x69e   : > { %v10212_v40 = vpack.c.bf16 %v4704_v43, %v4701_v61  ;;  %v4807_v28 = vsub.f32 %v4805_v30, %v4806_v5  ;;  %v4819_v38 = vsub.f32 %v10205_v49, %v4701_v61 }
 0x69f   : > { %v4815_v10 = vand.u32 4294901760, %v4814_v9  ;;  %v4827_v11 = vand.u32 4294901760, %v4826_v62 }
 0x6a0   : > { %8147 = vmatprep.subr.bf16.mxu1 %v10212_v40  ;;  %v4808_v12 = vand.u32 4294901760, %v4807_v28  ;;  %v4820_v6 = vand.u32 4294901760, %v4819_v38  ;;  %v8162_v43 = vpack.c.bf16 %v4826_v62, %v4819_v38  ;;  %v8174_v28 = vpack.c.bf16 %v4813_v53, %v4806_v5 }
 0x6a1   : > { %8149 = vmatpush3.bf16.msra.mxu1 %v10212_v40  ;;  %v4828_v51 = vsub.f32 %v4826_v62, %v4827_v11 }
 0x6a2   : > { %v8150_v33 = vpack.c.bf16 %v4815_v10, %v4808_v12  ;;  %v4821_v58 = vsub.f32 %v4819_v38, %v4820_v6 }
 0x6a3   : > { %v4829_v19 = vand.u32 4294901760, %v4828_v51 }
 0x6a4   : > { %7519 = vmatmul.mubr.f32.vlgmr.msra.gmra.mrb[32].mxu1 %v10093_v50  ;;  %8151 = vmatprep.subr.bf16.mxu1 %v8150_v33  ;;  %v4822_v55 = vand.u32 4294901760, %v4821_v58 }
 0x6a5   : > { %8153 = vmatpush3.bf16.msra.mxu1 %v8150_v33  ;;  %7521 = vmatprep.mubr.f32.mxu1 %v10100_v35 }
 0x6a6   : > { %v8154_v24 = vpack.c.bf16 %v4829_v19, %v4822_v55 }
 0x6a8   : > { %7522 = vmatmul.mubr.f32.gmra.mrb[34].mxu1 %v10103_v26  ;;  %8155 = vmatprep.subr.bf16.mxu1 %v8154_v24 }
 0x6a9   : > { %8157 = vmatpush3.bf16.msra.mxu1 %v8154_v24  ;;  %7532 = vmatprep.mubr.f32.mxu1 %v10006_v39 }
 0x6aa   : > { %8159 = vmatprep.subr.bf16.mxu1 %v8158_v37 }
 0x6ac   : > { %7533 = vmatmul.mubr.f32.vlgmr.msra.gmra.mrb[32].mxu1 %v10034_v32 }
 0x6ad   : > { %8161 = vmatpush3.bf16.msra.mxu1 %v8158_v37  ;;  %7535 = vmatprep.mubr.f32.mxu1 %v10038_v59 }
 0x6ae   : > { %8163 = vmatprep.subr.bf16.mxu1 %v8162_v43 }
 0x6b0   : > { %7536 = vmatmul.mubr.f32.gmra.mrb[34].mxu1 %v10053_v47 }
 0x6b1   : > { %8165 = vmatpush3.bf16.msra.mxu1 %v8162_v43  ;;  %7546 = vmatprep.mubr.f32.mxu1 %v10009_v45 }
 0x6b2   : > { %8167 = vmatprep.subr.bf16.mxu1 %v10202_v54 }
 0x6b4   : > { %7547 = vmatmul.mubr.f32.vlgmr.msra.gmra.mrb[32].mxu1 %v10046_v29 }
 0x6b5   : > { %v7506_v17 = vpop.f32.mrb[48].mxu0  ;;  %8169 = vmatpush3.bf16.msra.mxu1 %v10202_v54  ;;  %7549 = vmatprep.mubr.f32.mxu1 %v10056_v2 }
 0x6b6   : > { %v4667_v30 = vmul.f32 0.25, %v7506_v17  ;;  %v4644_v61 = vpop.f32.mrb[49].mxu0  ;;  %8171 = vmatprep.subr.bf16.mxu1 %v10212_v40 }
 0x6b7   : > { %v4666_v9 = vmul.f32 0.25, %v4644_v61 }
 0x6b8   : > { %v4683_v62 = vsub.f32 %v10122_v14, %v4667_v30  ;;  %7550 = vmatmul.mubr.f32.gmra.mrb[34].mxu1 %v10070_v25  ;;  %v8178_v14 = vpack.c.bf16 %v4827_v11, %v4820_v6 }
 0x6b9   : > { %v4682_v38 = vsub.f32 %v10120_v7, %v4666_v9  ;;  %v7509_v10 = vpop.f32.mrb[50].mxu0  ;;  %8173 = vmatpush3.bf16.msra.mxu1 %v10212_v40  ;;  %7560 = vmatprep.mubr.f32.mxu1 %v10012_v8 }
 0x6ba   : > { %v4688_v12 = vmul.f32 1.442695, %v4683_v62  ;;  %v4669_v51 = vmul.f32 0.25, %v7509_v10  ;;  %v4656_v33 = vpop.f32.mrb[51].mxu0  ;;  %8175 = vmatprep.subr.bf16.mxu1 %v8174_v28 }
 0x6bb   : > { %v4686_v58 = vmul.f32 1.442695, %v4682_v38  ;;  %v4668_v19 = vmul.f32 0.25, %v4656_v33 }
 0x6bc   : > { %8562 = vpow2.f32 %v4688_v12  ;;  %v4685_v55 = vsub.f32 %v10129_v0, %v4669_v51  ;;  %7561 = vmatmul.mubr.f32.vlgmr.msra.gmra.mrb[32].mxu1 %v10065_v4 }
 0x6bd   : > { %8564 = vpow2.f32 %v4686_v58  ;;  %v4684_v7 = vsub.f32 %v10131_v60, %v4668_v19  ;;  %8177 = vmatpush3.bf16.msra.mxu1 %v8174_v28  ;;  %7563 = vmatprep.mubr.f32.mxu1 %v10073_v36 }
 0x6be   : > { %v4692_v53 = vmul.f32 1.442695, %v4685_v55  ;;  %8179 = vmatprep.subr.bf16.mxu1 %v8178_v14 }
 0x6bf   : > { %v4690_v5 = vmul.f32 1.442695, %v4684_v7 }
 0x6c0   : > { %8566 = vpow2.f32 %v4692_v53  ;;  %7564 = vmatmul.mubr.f32.gmra.mrb[34].mxu1 %v10085_v22 }
 0x6c1   : > { %8568 = vpow2.f32 %v4690_v5  ;;  %8181 = vmatpush3.bf16.msra.mxu1 %v8178_v14  ;;  %7574 = vmatprep.mubr.f32.mxu1 %v10006_v39 }
 0x6c2   : > { %8183 = vmatprep.subr.bf16.mxu1 %v10202_v54 }
 0x6c4   : > { %7575 = vmatmul.mubr.f32.vlgmr.msra.gmra.mrb[32].mxu1 %v10034_v32 }
 0x6c5   : > { %8185 = vmatpush3.bf16.msra.mxu1 %v10202_v54  ;;  %7577 = vmatprep.mubr.f32.mxu1 %v10038_v59 }
 0x6c6   : > { %v10245_v0 = vpop.eup %8562  ;;  %8187 = vmatprep.subr.bf16.mxu1 %v10212_v40 }
 0x6c7   : > { %v10248_v60 = vpop.eup %8564  ;;  %v5312_v11 = vand.u32 4294901760, %v10245_v0 }
 0x6c8   : > { %7578 = vmatmul.mubr.f32.gmra.mrb[34].mxu1 %v10053_v47  ;;  %v5309_v6 = vand.u32 4294901760, %v10248_v60 }
 0x6c9   : > { %8189 = vmatpush3.bf16.msra.mxu1 %v10212_v40  ;;  %7588 = vmatprep.mubr.f32.mxu1 %v10006_v39  ;;  %v5426_v54 = vsub.f32 %v10245_v0, %v5312_v11 }
 0x6ca   : > { %v10256_v24 = vpop.eup %8566  ;;  %v10258_v37 = vpack.c.bf16 %v5312_v11, %v5309_v6  ;;  %v5419_v43 = vsub.f32 %v10248_v60, %v5309_v6 }
 0x6cb   : > { %v10261_v17 = vpop.eup %8568  ;;  %v5318_v30 = vand.u32 4294901760, %v10256_v24  ;;  %v5427_v61 = vand.u32 4294901760, %v5426_v54 }
 0x6cc   : > { %7589 = vmatmul.mubr.f32.vlgmr.msra.gmra.mrb[32].mxu1 %v10034_v32  ;;  %8191 = vmatprep.subr.bf16.mxu0 %v10258_v37  ;;  %v5315_v40 = vand.u32 4294901760, %v10261_v17  ;;  %v5420_v9 = vand.u32 4294901760, %v5419_v43  ;;  %v8206_v6 = vpack.c.bf16 %v5426_v54, %v5419_v43 }
 0x6cd   : > { %8193 = vmatpush3.bf16.msra.mxu0 %v10258_v37  ;;  %7591 = vmatprep.mubr.f32.mxu1 %v10038_v59  ;;  %v5428_v62 = vsub.f32 %v5426_v54, %v5427_v61  ;;  %v5440_v28 = vsub.f32 %v10256_v24, %v5318_v30 }
 0x6ce   : > { %v8194_v38 = vpack.c.bf16 %v5318_v30, %v5315_v40  ;;  %v5421_v10 = vsub.f32 %v5419_v43, %v5420_v9  ;;  %v5433_v12 = vsub.f32 %v10261_v17, %v5315_v40  ;;  %v8222_v54 = vpack.c.bf16 %v5427_v61, %v5420_v9 }
 0x6cf   : > { %v5429_v51 = vand.u32 4294901760, %v5428_v62  ;;  %v5441_v33 = vand.u32 4294901760, %v5440_v28 }
 0x6d0   : > { %7592 = vmatmul.mubr.f32.gmra.mrb[34].mxu1 %v10053_v47  ;;  %8195 = vmatprep.subr.bf16.mxu0 %v8194_v38  ;;  %v5422_v58 = vand.u32 4294901760, %v5421_v10  ;;  %v5434_v19 = vand.u32 4294901760, %v5433_v12  ;;  %v8210_v30 = vpack.c.bf16 %v5440_v28, %v5433_v12 }
 0x6d1   : > { %8197 = vmatpush3.bf16.msra.mxu0 %v8194_v38  ;;  %v5442_v55 = vsub.f32 %v5440_v28, %v5441_v33  ;;  %6085 = vmatprep.mubr.f32.mxu1 %v8647_v52 }
 0x6d2   : > { %v8198_v14 = vpack.c.bf16 %v5429_v51, %v5422_v58  ;;  %v5435_v7 = vsub.f32 %v5433_v12, %v5434_v19  ;;  %v8226_v43 = vpack.c.bf16 %v5441_v33, %v5434_v19 }
 0x6d3   : > { %v5443_v53 = vand.u32 4294901760, %v5442_v55 }
 0x6d4   : > { %7603 = vmatmul.mubr.f32.vlgmr.msra.gmra.mrb[52].mxu0 %v10093_v50  ;;  %8199 = vmatprep.subr.bf16.mxu0 %v8198_v14  ;;  %v5436_v5 = vand.u32 4294901760, %v5435_v7 }
 0x6d5   : > { %8201 = vmatpush3.bf16.msra.mxu0 %v8198_v14  ;;  %7605 = vmatprep.mubr.f32.mxu0 %v10100_v35 }
 0x6d6   : > { %v8202_v11 = vpack.c.bf16 %v5443_v53, %v5436_v5 }
 0x6d8   : > { %7606 = vmatmul.mubr.f32.gmra.mrb[54].mxu0 %v10103_v26  ;;  %8203 = vmatprep.subr.bf16.mxu0 %v8202_v11 }
 0x6d9   : > { %8205 = vmatpush3.bf16.msra.mxu0 %v8202_v11  ;;  %7616 = vmatprep.mubr.f32.mxu0 %v10006_v39 }
 0x6da   : > { %8207 = vmatprep.subr.bf16.mxu0 %v8206_v6 }
 0x6dc   : > { %7617 = vmatmul.mubr.f32.vlgmr.msra.gmra.mrb[52].mxu0 %v10034_v32 }
 0x6dd   : > { %8209 = vmatpush3.bf16.msra.mxu0 %v8206_v6  ;;  %7619 = vmatprep.mubr.f32.mxu0 %v10038_v59 }
 0x6de   : > { %8211 = vmatprep.subr.bf16.mxu0 %v8210_v30 }
 0x6e0   : > { %7620 = vmatmul.mubr.f32.gmra.mrb[54].mxu0 %v10053_v47 }
 0x6e1   : > { %8213 = vmatpush3.bf16.msra.mxu0 %v8210_v30  ;;  %7630 = vmatprep.mubr.f32.mxu0 %v10009_v45 }
 0x6e2   : > { %8215 = vmatprep.subr.bf16.mxu0 %v10258_v37 }
 0x6e4   : > { %7631 = vmatmul.mubr.f32.vlgmr.msra.gmra.mrb[52].mxu0 %v10046_v29 }
 0x6e5   : > { %8217 = vmatpush3.bf16.msra.mxu0 %v10258_v37  ;;  %7633 = vmatprep.mubr.f32.mxu0 %v10056_v2 }
 0x6e6   : > { %8219 = vmatprep.subr.bf16.mxu0 %v8194_v38 }
 0x6e8   : > { %7634 = vmatmul.mubr.f32.gmra.mrb[54].mxu0 %v10070_v25 }
 0x6e9   : > { %8221 = vmatpush3.bf16.msra.mxu0 %v8194_v38  ;;  %7644 = vmatprep.mubr.f32.mxu0 %v10012_v8 }
 0x6ea   : > { %8223 = vmatprep.subr.bf16.mxu0 %v8222_v54 }
 0x6ec   : > { %7645 = vmatmul.mubr.f32.vlgmr.msra.gmra.mrb[52].mxu0 %v10065_v4 }
 0x6ed   : > { %8225 = vmatpush3.bf16.msra.mxu0 %v8222_v54  ;;  %7647 = vmatprep.mubr.f32.mxu0 %v10073_v36 }
 0x6ee   : > { %8227 = vmatprep.subr.bf16.mxu0 %v8226_v43 }
 0x6f0   : > { %7648 = vmatmul.mubr.f32.gmra.mrb[54].mxu0 %v10085_v22 }
 0x6f1   : > { %8229 = vmatpush3.bf16.msra.mxu0 %v8226_v43  ;;  %7658 = vmatprep.mubr.f32.mxu0 %v10006_v39 }
 0x6f2   : > { %8231 = vmatprep.subr.bf16.mxu0 %v10258_v37 }
 0x6f4   : > { %7659 = vmatmul.mubr.f32.vlgmr.msra.gmra.mrb[52].mxu0 %v10034_v32 }
 0x6f5   : > { %8233 = vmatpush3.bf16.msra.mxu0 %v10258_v37  ;;  %7661 = vmatprep.mubr.f32.mxu0 %v10038_v59 }
 0x6f6   : > { %8235 = vmatprep.subr.bf16.mxu0 %v8194_v38 }
 0x6f8   : > { %7662 = vmatmul.mubr.f32.gmra.mrb[54].mxu0 %v10053_v47 }
 0x6f9   : > { %8237 = vmatpush3.bf16.msra.mxu0 %v8194_v38  ;;  %7672 = vmatprep.mubr.f32.mxu0 %v10006_v39 }
 0x6fc   : > { %7673 = vmatmul.mubr.f32.vlgmr.msra.gmra.mrb[52].mxu0 %v10034_v32 }
 0x6fd   : > { %7675 = vmatprep.mubr.f32.mxu0 %v10038_v59 }
 0x700   : > { %7676 = vmatmul.mubr.f32.gmra.mrb[54].mxu0 %v10053_v47 }
 0x701   : > { %6074 = vmatprep.mubr.f32.mxu0 %v8647_v52 }
 0x79f   : > { %v7590_v61 = vpop.f32.mrb[32].mxu1 }
 0x7a0   : > { %8570 = vrcp.f32 %v7590_v61  ;;  %v5286_v40 = vpop.f32.mrb[33].mxu1 }
 0x7a1   : > { %8572 = vrcp.f32 %v5286_v40 }
 0x7a3   : > { %v7593_v37 = vpop.f32.mrb[34].mxu1 }
 0x7a4   : > { %8574 = vrcp.f32 %v7593_v37  ;;  %v5298_v9 = vpop.f32.mrb[35].mxu1 }
 0x7a5   : > { %8576 = vrcp.f32 %v5298_v9 }
 0x7aa   : > { %v8571_v62 = vpop.eup %8570 }
 0x7ab   : > { %v8573_v28 = vpop.eup %8572  ;;  %v5925_v38 = vmul.f32 %v8571_v62, %v10193_v18 }
 0x7ac   : > { %v5923_v10 = vmul.f32 %v8573_v28, %v10195_v21 }
 0x7ad   : > { %5945 = vperm.xlu1 %8529, %v5925_v38  }
 0x7ae   : > { %v8575_v12 = vpop.eup %8574  ;;  %5940 = vperm.xlu0 %8528, %v5923_v10  }
 0x7af   : > { %v5929_v51 = vmul.f32 %v8575_v12, %v10200_v15  ;;  %v8577_v33 = vpop.eup %8576 }
 0x7b0   : > { %v5927_v58 = vmul.f32 %v8577_v33, %v10205_v49 }
 0x7b1   : > { %5955 = vperm.xlu1 %8529, %v5929_v51  }
 0x7b5   : > { %5950 = vperm.xlu1 %8529, %v5927_v58  }
 0x7cf   : > { %v7674_v19 = vpop.f32.mrb[52].mxu0 }
 0x7d0   : > { %8578 = vrcp.f32 %v7674_v19  ;;  %v5900_v55 = vpop.f32.mrb[53].mxu0 }
 0x7d1   : > { %8580 = vrcp.f32 %v5900_v55 }
 0x7d3   : > { %v7677_v14 = vpop.f32.mrb[54].mxu0 }
 0x7d4   : > { %v5912_v7 = vpop.f32.mrb[55].mxu0 }
 0x7d5   : > { %8582 = vrcp.f32 %v5912_v7 }
 0x7d6   : > { %8584 = vrcp.f32 %v7677_v14 }
 0x7da   : > { %v8579_v18 = vpop.eup %8578 }
 0x7db   : > { %v5933_v21 = vmul.f32 %v8579_v18, %v10245_v0  ;;  %v8581_v53 = vpop.eup %8580 }
 0x7dc   : > { %v5931_v15 = vmul.f32 %v8581_v53, %v10248_v60 }
 0x7dd   : > { %5973 = vperm.xlu1 %8529, %v5933_v21  }
 0x7df   : > { %v8583_v5 = vpop.eup %8582 }
 0x7e0   : > { %v5935_v49 = vmul.f32 %v8583_v5, %v10261_v17  ;;  %v8585_v11 = vpop.eup %8584 }
 0x7e1   : > { %5968 = vperm.xlu1 %8529, %v5931_v15   ;;  %v5937_v6 = vmul.f32 %v8585_v11, %v10256_v24 }
 0x7e5   : > { %5978 = vperm.xlu1 %8529, %v5935_v49  }
 0x7e9   : > { %5983 = vperm.xlu1 %8529, %v5937_v6  }
 0x82c   : > { %v5946_v30 = vpop.permute.xlu1 %5945 }
 0x82d   : > { %v5960_v40 = vmul.f32 %v9985_v63, %v5946_v30  ;;  %v5961_v0 = vmul.f32 %v9988_v44, %v5946_v30  ;;  %v5941_v37 = vpop.permute.xlu0 %5940 }
 0x82e   : > { %v5958_v28 = vmul.f32 %v9971_v23, %v5941_v37  ;;  %v5959_v24 = vmul.f32 %v9974_v3, %v5941_v37 }
 0x830   : > { %v5956_v54 = vpop.permute.xlu1 %5955 }
 0x831   : > { %v5965_v15 = vmul.f32 %v9998_v41, %v5956_v54 }
 0x834   : > { %v5951_v43 = vpop.permute.xlu1 %5950 }
 0x835   : > { %v5963_v14 = vmul.f32 %v9980_v34, %v5951_v43 }
 0x85c   : > { %v5974_v61 = vpop.permute.xlu1 %5973 }
 0x85d   : > { %v5988_v60 = vmul.f32 %v5974_v61, %v9950_v56  ;;  %v5989_v9 = vmul.f32 %v5974_v61, %v9952_v42  ;;  %v5962_v42 = vmul.f32 %v9977_v31, %v5951_v43  ;;  %v5964_v31 = vmul.f32 %v9995_v13, %v5956_v54 }
 0x85f   : > { %v5996_v62 = vadd.f32 %v5988_v60, %v5960_v40  ;;  %v5997_v17 = vadd.f32 %v5989_v9, %v5961_v0 }
 0x860   : > { %v5969_v38 = vpop.permute.xlu1 %5968 }
 0x861   : > { %v6006_v10 = vand.u32 4294901760, %v5997_v17  ;;  %v5986_v12 = vmul.f32 %v5969_v38, %v9940_v1  ;;  %v5987_v51 = vmul.f32 %v5969_v38, %v9942_v57  ;;  %v6008_v63 = vand.u32 4294901760, %v5996_v62 }
 0x863   : > { %v10317_v33 = vsub.f32 %v5997_v17, %v6006_v10  ;;  %v5994_v44 = vadd.f32 %v5986_v12, %v5958_v28  ;;  %v5995_v58 = vadd.f32 %v5987_v51, %v5959_v24  ;;  %v10322_v3 = vsub.f32 %v5996_v62, %v6008_v63 }
 0x864   : > { %v5979_v56 = vpop.permute.xlu1 %5978 }
 0x865   : > { %v6002_v19 = vand.u32 4294901760, %v5995_v58  ;;  %v6004_v55 = vand.u32 4294901760, %v5994_v44  ;;  %v5990_v23 = vmul.f32 %v5979_v56, %v9958_v20  ;;  %v5991_v1 = vmul.f32 %v5979_v56, %v9960_v48 }
 0x866   : > { %v6133_v57 = vand.u32 4294901760, %v10317_v33  ;;  %v6139_v30 = vand.u32 4294901760, %v10322_v3 }
 0x867   : > { %v10326_v7 = vsub.f32 %v5995_v58, %v6002_v19  ;;  %v10328_v18 = vsub.f32 %v5994_v44, %v6004_v55  ;;  %v5998_v21 = vadd.f32 %v5990_v23, %v5962_v42  ;;  %v10330_v53 = vpack.c.bf16 %v6006_v10, %v6002_v19 }
 0x868   : > { %v5999_v20 = vadd.f32 %v5991_v1, %v5963_v14  ;;  %v5984_v5 = vpop.permute.xlu1 %5983  ;;  %v10334_v34 = vpack.c.bf16 %v6008_v63, %v6004_v55  ;;  %v6134_v54 = vsub.f32 %v10317_v33, %v6133_v57  ;;  %v6140_v28 = vsub.f32 %v10322_v3, %v6139_v30 }
 0x869   : > { %v6127_v49 = vand.u32 4294901760, %v10328_v18  ;;  %v6012_v48 = vand.u32 4294901760, %v5998_v21  ;;  %v5992_v11 = vmul.f32 %v5984_v5, %v9964_v16  ;;  %v5993_v6 = vmul.f32 %v5984_v5, %v9966_v27  ;;  %8239 = vmatprep.subr.bf16.mxu0 %v10330_v53  ;;  %8286 = vmatprep.subr.bf16.mxu1 %v10330_v53 }
 0x86a   : > { %v6010_v13 = vand.u32 4294901760, %v5999_v20  ;;  %8241 = vmatpush1.bf16.msra.mxu0 %v10334_v34  ;;  %8288 = vmatpush1.bf16.msra.mxu1 %v10334_v34  ;;  %v6121_v41 = vand.u32 4294901760, %v10326_v7  ;;  %v6135_v17 = vand.u32 4294901760, %v6134_v54  ;;  %v6141_v55 = vand.u32 4294901760, %v6140_v28 }
 0x86b   : > { %v10348_v16 = vsub.f32 %v5998_v21, %v6012_v48  ;;  %v6000_v27 = vadd.f32 %v5992_v11, %v5964_v31  ;;  %v6001_v43 = vadd.f32 %v5993_v6, %v5965_v15  ;;  %v6128_v0 = vsub.f32 %v10328_v18, %v6127_v49 }
 0x86c   : > { %v10350_v61 = vsub.f32 %v5999_v20, %v6010_v13  ;;  %v6122_v40 = vsub.f32 %v10326_v7, %v6121_v41  ;;  %v8254_v11 = vpack.c.bf16 %v10317_v33, %v10326_v7 }
 0x86d   : > { %v6151_v37 = vand.u32 4294901760, %v10348_v16  ;;  %v6014_v60 = vand.u32 4294901760, %v6001_v43  ;;  %v6016_v9 = vand.u32 4294901760, %v6000_v27  ;;  %v6129_v44 = vand.u32 4294901760, %v6128_v0 }
 0x86e   : > { %v6123_v62 = vand.u32 4294901760, %v6122_v40  ;;  %v6145_v38 = vand.u32 4294901760, %v10350_v61 }
 0x86f   : > { %v10363_v24 = vpack.c.bf16 %v6014_v60, %v6010_v13  ;;  %v10365_v10 = vpack.c.bf16 %v6016_v9, %v6012_v48  ;;  %v10367_v12 = vsub.f32 %v6001_v43, %v6014_v60  ;;  %v10369_v51 = vsub.f32 %v6000_v27, %v6016_v9 }
 0x870   : > { %v8246_v63 = vpack.c.bf16 %v6135_v17, %v6123_v62  ;;  %v6146_v56 = vsub.f32 %v10350_v61, %v6145_v38  ;;  %v6152_v19 = vsub.f32 %v10348_v16, %v6151_v37  ;;  %v8248_v1 = vpack.c.bf16 %v6141_v55, %v6129_v44  ;;  %v8631_v44 = vld [vmem:[%s8873_s9 + $0x8] sm:$0xff]  ;;  %v8633_v55 = vld [vmem:[%s8873_s9 + $0x18] sm:$0xff] }
 0x871   : > { %v6163_v58 = vand.u32 4294901760, %v10369_v51  ;;  %8243 = vmatprep.subr.bf16.mxu0 %v10363_v24  ;;  %8287 = vmatprep.subr.bf16.mxu1 %v10363_v24  ;;  %v6157_v42 = vand.u32 4294901760, %v10367_v12 }
 0x872   : > { %8245 = vmatpush1.bf16.msra.mxu0 %v10365_v10  ;;  %8289 = vmatpush1.bf16.msra.mxu1 %v10365_v10  ;;  %v6147_v21 = vand.u32 4294901760, %v6146_v56  ;;  %v6153_v15 = vand.u32 4294901760, %v6152_v19 }
 0x873   : > { %v6164_v23 = vsub.f32 %v10369_v51, %v6163_v58  ;;  %8247 = vmatprep.subr.bf16.mxu1 %v8246_v63  ;;  %v6158_v14 = vsub.f32 %v10367_v12, %v6157_v42 }
 0x875   : > { %6091 = vmatmul.mubr.f32.vlgmr.msra.gmra.mrb[36].mxu1 %v10093_v50  ;;  %v6159_v31 = vand.u32 4294901760, %v6158_v14  ;;  %v6165_v20 = vand.u32 4294901760, %v6164_v23  ;;  %6080 = vmatmul.mubr.f32.vlgmr.msra.gmra.mrb[56].mxu0 %v10016_v46  ;;  %v8256_v46 = vpack.c.bf16 %v10322_v3, %v10328_v18  ;;  %v8258_v50 = vpack.c.bf16 %v10367_v12, %v10350_v61  ;;  %v8630_v12 = vld [vmem:[%s8873_s9] sm:$0xff] }
 0x876   : > { %8249 = vmatpush1.bf16.msra.mxu1 %v8248_v1  ;;  %6096 = vmatprep.mubr.f32.mxu1 %v8647_v52 }
 0x877   : > { %v8250_v5 = vpack.c.bf16 %v6159_v31, %v6147_v21  ;;  %v8252_v48 = vpack.c.bf16 %v6165_v20, %v6153_v15  ;;  %v8634_v21 = vld [vmem:[%s8873_s9 + $0x20] sm:$0xff]  ;;  %v8635_v15 = vld [vmem:[%s8873_s9 + $0x28] sm:$0xff] }
 0x879   : > { %6102 = vmatmul.mubr.f32.gmra.mrb[38].mxu1 %v10100_v35  ;;  %8251 = vmatprep.subr.bf16.mxu1 %v8250_v5  ;;  %v8260_v35 = vpack.c.bf16 %v10369_v51, %v10348_v16 }
 0x87a   : > { %8253 = vmatpush1.bf16.msra.mxu1 %v8252_v48  ;;  %6107 = vmatprep.mubr.f32.mxu1 %v8647_v52 }
 0x87b   : > { %8255 = vmatprep.subr.bf16.mxu1 %v8254_v11  ;;  %v8636_v11 = vld [vmem:[%s8873_s9 + $0x30] sm:$0xff] }
 0x87d   : > { %6113 = vmatmul.mubr.f32.gmra.mrb[40].mxu1 %v10103_v26  ;;  %v8270_v26 = vpack.c.bf16 %v6133_v57, %v6121_v41 }
 0x87e   : > { %6223 = vmatprep.mubr.f32.mxu1 %v8647_v52 }
 0x881   : > { %6225 = vmatmul.mubr.f32.vlgmr.msra.gmra.mrb[42].mxu1 %v10006_v39 }
 0x882   : > { %8257 = vmatpush1.bf16.msra.mxu1 %v8256_v46  ;;  %6230 = vmatprep.mubr.f32.mxu1 %v8647_v52 }
 0x883   : > { %8259 = vmatprep.subr.bf16.mxu1 %v8258_v50  ;;  %v8637_v50 = vld [vmem:[%s8873_s9 + $0x38] sm:$0xff] }
 0x885   : > { %6232 = vmatmul.mubr.f32.gmra.mrb[36].mxu1 %v10034_v32 }
 0x886   : > { %8261 = vmatpush1.bf16.msra.mxu1 %v8260_v35  ;;  %6237 = vmatprep.mubr.f32.mxu1 %v8647_v52 }
 0x887   : > { %8263 = vmatprep.subr.bf16.mxu1 %v10330_v53 }
 0x889   : > { %6239 = vmatmul.mubr.f32.gmra.mrb[38].mxu1 %v10038_v59 }
 0x88a   : > { %6244 = vmatprep.mubr.f32.mxu1 %v8647_v52 }
 0x88d   : > { %6246 = vmatmul.mubr.f32.gmra.mrb[40].mxu1 %v10053_v47 }
 0x88e   : > { %6332 = vmatprep.mubr.f32.mxu1 %v8647_v52 }
 0x891   : > { %6335 = vmatmul.mubr.f32.vlgmr.msra.gmra.mrb[42].mxu1 %v10009_v45  ;;  %v8272_v45 = vpack.c.bf16 %v6139_v30, %v6127_v49 }
 0x892   : > { %8265 = vmatpush1.bf16.msra.mxu1 %v10334_v34  ;;  %6340 = vmatprep.mubr.f32.mxu1 %v8647_v52 }
 0x893   : > { %8267 = vmatprep.subr.bf16.mxu1 %v10363_v24 }
 0x895   : > { %6343 = vmatmul.mubr.f32.gmra.mrb[36].mxu1 %v10046_v29  ;;  %v8274_v29 = vpack.c.bf16 %v6157_v42, %v6145_v38  ;;  %v8632_v42 = vld [vmem:[%s8873_s9 + $0x10] sm:$0xff] }
 0x896   : > { %8269 = vmatpush1.bf16.msra.mxu1 %v10365_v10  ;;  %6348 = vmatprep.mubr.f32.mxu1 %v8647_v52 }
 0x897   : > { %8271 = vmatprep.subr.bf16.mxu1 %v8270_v26 }
 0x899   : > { %6351 = vmatmul.mubr.f32.gmra.mrb[38].mxu1 %v10056_v2  ;;  %v8276_v2 = vpack.c.bf16 %v6163_v58, %v6151_v37 }
 0x89a   : > { %6356 = vmatprep.mubr.f32.mxu1 %v8647_v52 }
 0x89d   : > { %6359 = vmatmul.mubr.f32.gmra.mrb[40].mxu1 %v10070_v25 }
 0x89e   : > { %6437 = vmatprep.mubr.f32.mxu1 %v8647_v52 }
 0x8a1   : > { %6441 = vmatmul.mubr.f32.vlgmr.msra.gmra.mrb[42].mxu1 %v10012_v8 }
 0x8a2   : > { %8273 = vmatpush1.bf16.msra.mxu1 %v8272_v45  ;;  %6446 = vmatprep.mubr.f32.mxu1 %v8647_v52 }
 0x8a3   : > { %8275 = vmatprep.subr.bf16.mxu1 %v8274_v29 }
 0x8a5   : > { %6450 = vmatmul.mubr.f32.gmra.mrb[36].mxu1 %v10065_v4 }
 0x8a6   : > { %8277 = vmatpush1.bf16.msra.mxu1 %v8276_v2  ;;  %6455 = vmatprep.mubr.f32.mxu1 %v8647_v52 }
 0x8a7   : > { %8279 = vmatprep.subr.bf16.mxu1 %v10330_v53 }
 0x8a9   : > { %6459 = vmatmul.mubr.f32.gmra.mrb[38].mxu1 %v10073_v36 }
 0x8aa   : > { %6464 = vmatprep.mubr.f32.mxu1 %v8647_v52 }
 0x8ad   : > { %6468 = vmatmul.mubr.f32.gmra.mrb[40].mxu1 %v10085_v22 }
 0x8ae   : > { %6562 = vmatprep.mubr.f32.mxu1 %v8647_v52 }
 0x8b1   : > { %6564 = vmatmul.mubr.f32.vlgmr.msra.gmra.mrb[42].mxu1 %v10006_v39 }
 0x8b2   : > { %8281 = vmatpush1.bf16.msra.mxu1 %v10334_v34  ;;  %6569 = vmatprep.mubr.f32.mxu1 %v8647_v52 }
 0x8b3   : > { %8283 = vmatprep.subr.bf16.mxu1 %v10363_v24 }
 0x8b5   : > { %6571 = vmatmul.mubr.f32.gmra.mrb[36].mxu1 %v10034_v32 }
 0x8b6   : > { %8285 = vmatpush1.bf16.msra.mxu1 %v10365_v10  ;;  %6576 = vmatprep.mubr.f32.mxu1 %v8647_v52 }
 0x8b9   : > { %6578 = vmatmul.mubr.f32.gmra.mrb[38].mxu1 %v10038_v59 }
 0x8ba   : > { %6583 = vmatprep.mubr.f32.mxu1 %v8647_v52 }
 0x8bd   : > { %6585 = vmatmul.mubr.f32.gmra.mrb[40].mxu1 %v10053_v47 }
 0x8be   : > { %6663 = vmatprep.mubr.f32.mxu1 %v8647_v52 }
 0x8c1   : > { %6665 = vmatmul.mubr.f32.vlgmr.msra.gmra.mrb[42].mxu1 %v10006_v39 }
 0x8c2   : > { %6670 = vmatprep.mubr.f32.mxu1 %v8647_v52 }
 0x8c5   : > { %6672 = vmatmul.mubr.f32.gmra.mrb[36].mxu1 %v10034_v32 }
 0x8c6   : > { %6677 = vmatprep.mubr.f32.mxu1 %v8647_v52 }
 0x8c9   : > { %6679 = vmatmul.mubr.f32.gmra.mrb[38].mxu1 %v10038_v59 }
 0x8ca   : > { %6684 = vmatprep.mubr.f32.mxu1 %v8647_v52 }
 0x8cd   : > { %6686 = vmatmul.mubr.f32.gmra.mrb[40].mxu1 %v10053_v47 }
 0x948   : > { %v6081_v8 = vpop.f32.mrb[56].mxu0 }
 0x949   : > { %v6083_v4 = vpop.f32.mrb[57].mxu0 }
 0x994   : > { %v6666_v25 = vpop.f32.mrb[42].mxu1 }
 0x995   : > { %v8298_v36 = vadd.f32 %v6666_v25, %v6081_v8  ;;  %v6668_v22 = vpop.f32.mrb[43].mxu1 }
 0x996   : > { %v8299_v33 = vadd.f32 %v6668_v22, %v6083_v4 }
 0x997   : > { %v6851_v3 = vmul.f32 -1.442695, %v8298_v36 }
 0x998   : > { %v6852_v39 = vmul.f32 -1.442695, %v8299_v33  ;;  %v6673_v57 = vpop.f32.mrb[36].mxu1 }
 0x999   : > { %8586 = vpow2.f32 %v6851_v3  ;;  %v6853_v7 = vmul.f32 -1.442695, %v6673_v57  ;;  %v6675_v32 = vpop.f32.mrb[37].mxu1 }
 0x99a   : > { %8588 = vpow2.f32 %v6852_v39  ;;  %v6854_v18 = vmul.f32 -1.442695, %v6675_v32 }
 0x99b   : > { %8590 = vpow2.f32 %v6853_v7 }
 0x99c   : > { %8592 = vpow2.f32 %v6854_v18  ;;  %v6680_v59 = vpop.f32.mrb[38].mxu1 }
 0x99d   : > { %v6855_v52 = vmul.f32 -1.442695, %v6680_v59  ;;  %v6682_v53 = vpop.f32.mrb[39].mxu1 }
 0x99e   : > { %v6856_v47 = vmul.f32 -1.442695, %v6682_v53 }
 0x99f   : > { %8594 = vpow2.f32 %v6855_v52 }
 0x9a0   : > { %8596 = vpow2.f32 %v6856_v47  ;;  %v6687_v34 = vpop.f32.mrb[40].mxu1 }
 0x9a1   : > { %v6857_v49 = vmul.f32 -1.442695, %v6687_v34  ;;  %v6689_v6 = vpop.f32.mrb[41].mxu1 }
 0x9a2   : > { %v6858_v30 = vmul.f32 -1.442695, %v6689_v6 }
 0x9a3   : > { %v8587_v13 = vpop.eup %8586  ;;  %8598 = vpow2.f32 %v6857_v49 }
 0x9a4   : > { %v8589_v41 = vpop.eup %8588  ;;  %v6716_v54 = vadd.f32 1.0, %v8587_v13  ;;  %8600 = vpow2.f32 %v6858_v30 }
 0x9a5   : > { %v8591_v16 = vpop.eup %8590  ;;  %v6717_v27 = vadd.f32 1.0, %v8589_v41 }
 0x9a6   : > { %v8593_v43 = vpop.eup %8592  ;;  %8602 = vrcp.f32 %v6716_v54  ;;  %v6718_v61 = vadd.f32 1.0, %v8591_v16 }
 0x9a7   : > { %8604 = vrcp.f32 %v6717_v27  ;;  %v6719_v40 = vadd.f32 1.0, %v8593_v43 }
 0x9a8   : > { %8606 = vrcp.f32 %v6718_v61 }
 0x9a9   : > { %v8595_v0 = vpop.eup %8594  ;;  %8608 = vrcp.f32 %v6719_v40 }
 0x9aa   : > { %v8597_v37 = vpop.eup %8596  ;;  %v6720_v60 = vadd.f32 1.0, %v8595_v0 }
 0x9ab   : > { %v6721_v9 = vadd.f32 1.0, %v8597_v37 }
 0x9ac   : > { %8610 = vrcp.f32 %v6720_v60 }
 0x9ad   : > { %v8599_v62 = vpop.eup %8598  ;;  %8612 = vrcp.f32 %v6721_v9 }
 0x9ae   : > { %v8601_v17 = vpop.eup %8600  ;;  %v6722_v28 = vadd.f32 1.0, %v8599_v62 }
 0x9af   : > { %v6723_v38 = vadd.f32 1.0, %v8601_v17 }
 0x9b0   : > { %v8603_v24 = vpop.eup %8602  ;;  %8614 = vrcp.f32 %v6722_v28 }
 0x9b1   : > { %v8605_v10 = vpop.eup %8604  ;;  %v6740_v51 = vmul.f32 %v8630_v12, %v8603_v24  ;;  %8616 = vrcp.f32 %v6723_v38 }
 0x9b2   : > { %v8607_v63 = vpop.eup %8606  ;;  %v6741_v58 = vmul.f32 %v8631_v44, %v8605_v10 }
 0x9b3   : > { %v8609_v56 = vpop.eup %8608  ;;  %6748 = vst [vmem:[%s10468_s29] sm:$0xff] %v6740_v51  ;;  %v6742_v19 = vmul.f32 %v8632_v42, %v8607_v63 }
 0x9b4   : > { %6749 = vst [vmem:[%s10468_s29 + $0x8] sm:$0xff] %v6741_v58  ;;  %v6743_v23 = vmul.f32 %v8633_v55, %v8609_v56 }
 0x9b5   : > { %6750 = vst [vmem:[%s10468_s29 + $0x10] sm:$0xff] %v6742_v19 }
 0x9b6   : > { %v8611_v14 = vpop.eup %8610  ;;  %6751 = vst [vmem:[%s10468_s29 + $0x18] sm:$0xff] %v6743_v23 }
 0x9b7   : > { %v8613_v1 = vpop.eup %8612  ;;  %v6744_v31 = vmul.f32 %v8634_v21, %v8611_v14 }
 0x9b8   : > { %v6745_v20 = vmul.f32 %v8635_v15, %v8613_v1 }
 0x9b9   : > { %6752 = vst [vmem:[%s10468_s29 + $0x20] sm:$0xff] %v6744_v31 }
 0x9ba   : > { %v8615_v5 = vpop.eup %8614  ;;  %6753 = vst [vmem:[%s10468_s29 + $0x28] sm:$0xff] %v6745_v20 }
 0x9bb   : > { %v8617_v48 = vpop.eup %8616  ;;  %v6746_v46 = vmul.f32 %v8636_v11, %v8615_v5 }
 0x9bc   : > { %v6747_v35 = vmul.f32 %v8637_v50, %v8617_v48 }
 0x9bd   : > { %6754 = vst [vmem:[%s10468_s29 + $0x30] sm:$0xff] %v6746_v46 }
 0x9be   : > { %6755 = vst [vmem:[%s10468_s29 + $0x38] sm:$0xff] %v6747_v35 }
 0x9bf PF: > { %s18_s27 = sadd.s32 1, %s8644_s27  }
 0x9c0   : > { %p15_p5 = scmp.ge.s32.totalorder %s18_s27, 4  }
 0x9c2   :  { %17 = sbr.rel (!%p15_p5) target bundleno = 1 (0x1), region = 85 }

</bundles_post_ra>
